<compile_context>
chip_gen: v6e
topology: v6e:2x2x1
jax: 0.10.0
libtpu: 0.0.40
codegen_flags: <defaults>
</compile_context>

<pallas_src>
import jax
import jax.numpy as jnp
from jax.experimental import pallas as pl
from jax.experimental.pallas import tpu as pltpu

_TB_MAX = 64  # batch tile (multiple of 8); VMEM-aware, see header comment.


def _round_up(x, m):
    return ((x + m - 1) // m) * m


# ---------------------------------------------------------------------------
# Kernel A: conv1 + bias + ReLU + MaxPool(3, 3), fused.
#   p_ref : (9, TB*8, 72)  patches grouped by pool-window offset d (3x3);
#                          rows = (b, ph), lanes = (pw, kh*3+kw)
#   w_ref : (72, 128)      block-diagonal conv1 weight: kron(I_8, W[9,16])
#   b_ref : (1, 128)       conv1 bias tiled over the 8 pool columns
#   o_ref : (TB*8, 128)    pooled activations, rows=(b,ph), lanes=(pw,oc)
# ---------------------------------------------------------------------------
def _conv1_pool1_kernel(p_ref, w_ref, b_ref, o_ref):
    m = jnp.dot(p_ref[0], w_ref[...], preferred_element_type=jnp.float32)
    for d in range(1, 9):
        m = jnp.maximum(
            m, jnp.dot(p_ref[d], w_ref[...], preferred_element_type=jnp.float32))
    o_ref[...] = jnp.maximum(m + b_ref[...], 0.0)


# ---------------------------------------------------------------------------
# Kernel B: conv2 + bias + ReLU + MaxPool(2, 2) + fc1 + ReLU + fc2 + ReLU + fc3.
#   p_ref   : (4, 9, TB, 144)  conv2 patches grouped by (pool offset d, pool pos s)
#   w2_ref  : (144, 64)        conv2 weight (kh, kw, ic) x oc
#   b2_ref  : (1, 64)
#   w1r_ref : (9, 64, 128)     fc1 weight regrouped per spatial position s
#   bf1_ref : (1, 128)
#   wf2_ref : (128, 64), bf2_ref: (1, 64)
#   wf3_ref : (64, 2),   bf3_ref: (1, 2)
#   o_ref   : (TB, 2)
# ---------------------------------------------------------------------------
def _conv2_pool2_fc_kernel(p_ref, w2_ref, b2_ref, w1r_ref, bf1_ref,
                           wf2_ref, bf2_ref, wf3_ref, bf3_ref, o_ref):
    tb = p_ref.shape[2]
    h1 = jnp.zeros((tb, 128), jnp.float32)
    for s in range(9):                       # 9 pool2 output positions
        z = jnp.dot(p_ref[0, s], w2_ref[...], preferred_element_type=jnp.float32)
        for d in range(1, 4):                # 4 positions per 2x2 pool window
            z = jnp.maximum(
                z, jnp.dot(p_ref[d, s], w2_ref[...],
                           preferred_element_type=jnp.float32))
        a = jnp.maximum(z + b2_ref[...], 0.0)                       # (TB, 64)
        h1 = h1 + jnp.dot(a, w1r_ref[s], preferred_element_type=jnp.float32)
    h1 = jnp.maximum(h1 + bf1_ref[...], 0.0)                        # fc1 + ReLU
    # TODO(synk): nn.Dropout(0.2) is stochastic at train time; eval-mode identity here.
    h2 = jnp.maximum(
        jnp.dot(h1, wf2_ref[...], preferred_element_type=jnp.float32)
        + bf2_ref[...], 0.0)                                        # fc2 + ReLU
    o_ref[...] = (jnp.dot(h2, wf3_ref[...], preferred_element_type=jnp.float32)
                  + bf3_ref[...]).astype(o_ref.dtype)               # fc3


# ---------------------------------------------------------------------------
# Wrappers (cheap glue builds patch tensors; heavy math runs in the kernels).
# ---------------------------------------------------------------------------
def _conv1_pool1(x, w1, b1, tb):
    """x: (Bp, 28, 28) -> pooled conv1 activations as NHWC (Bp, 8, 8, 16)."""
    Bp = x.shape[0]
    # im2col patches grouped by pool-window offset d = (di, dj) in the 3x3,
    # stride-3 pool window; conv output position = (3*ph + di, 3*pw + dj).
    # Row = (b, ph), lane = (pw, kh*3+kw) so all 8 pool columns share one dot.
    groups = []
    for di in range(3):
        for dj in range(3):
            taps = []
            for ki in range(3):
                for kj in range(3):
                    r, c = di + ki, dj + kj
                    taps.append(x[:, r:r + 22:3, c:c + 22:3])     # (Bp, 8, 8)
            groups.append(jnp.stack(taps, axis=-1).reshape(Bp * 8, 72))
    patches = jnp.stack(groups, axis=0)                           # (9, Bp*8, 72)

    # Block-diagonal weight: out lane (pw*16+oc) only contracts lanes pw*9+k.
    w_k_oc = w1.reshape(16, 9).T                                  # (9, 16)
    w_bd = jnp.kron(jnp.eye(8, dtype=jnp.float32), w_k_oc)       # (72, 128)
    b_row = jnp.tile(b1, 8).reshape(1, 128)                       # per-pw bias

    act1 = pl.pallas_call(
        _conv1_pool1_kernel,
        out_shape=jax.ShapeDtypeStruct((Bp * 8, 128), jnp.float32),
        grid=(Bp // tb,),
        in_specs=[
            pl.BlockSpec((9, tb * 8, 72), lambda i: (0, i, 0)),
            pl.BlockSpec((72, 128), lambda i: (0, 0)),
            pl.BlockSpec((1, 128), lambda i: (0, 0)),
        ],
        out_specs=pl.BlockSpec((tb * 8, 128), lambda i: (i, 0)),
        compiler_params=pltpu.CompilerParams(dimension_semantics=("parallel",)),
    )(patches, w_bd, b_row)
    # rows=(b,ph), lanes=(pw,oc) -> contiguous row-major reshape to NHWC.
    return act1.reshape(Bp, 8, 8, 16)


def _conv2_pool2_fc(act1, params, tb):
    """act1: (Bp, 8, 8, 16) NHWC -> logits (Bp, 2)."""
    Bp = act1.shape[0]
    # conv2 patches grouped by pool-window offset d (2x2) and pool output
    # position s (3x3): patches[d, s, b, :] = act1[b, 2ph+di:+3, 2pw+dj:+3, :].
    dgroups = []
    for di in range(2):
        for dj in range(2):
            sgroups = []
            for ph in range(3):
                for pw in range(3):
                    oh, ow = 2 * ph + di, 2 * pw + dj
                    sgroups.append(
                        act1[:, oh:oh + 3, ow:ow + 3, :].reshape(Bp, 144))
            dgroups.append(jnp.stack(sgroups, axis=0))            # (9, Bp, 144)
    patches = jnp.stack(dgroups, axis=0)                          # (4, 9, Bp, 144)

    # conv2 weight flattened in (kh, kw, ic) order to match the NHWC patches.
    w2mat = params["conv2_w"].transpose(2, 3, 1, 0).reshape(144, 64)
    b2row = params["conv2_b"].reshape(1, 64)
    # fc1 weight regrouped so that torch's channel-major view(-1, 576) order is
    # reproduced exactly: fc1(x)[o] = sum_{oc,s} fc1_w[o, oc*9+s] * act2[b,s,oc].
    w1r = params["fc1_w"].reshape(128, 64, 9).transpose(2, 1, 0)  # (9, 64, 128)
    bf1 = params["fc1_b"].reshape(1, 128)
    wf2 = params["fc2_w"].T                                       # (128, 64)
    bf2 = params["fc2_b"].reshape(1, 64)
    wf3 = params["fc3_w"].T                                       # (64, 2)
    bf3 = params["fc3_b"].reshape(1, 2)

    out = pl.pallas_call(
        _conv2_pool2_fc_kernel,
        out_shape=jax.ShapeDtypeStruct((Bp, 2), jnp.float32),
        grid=(Bp // tb,),
        in_specs=[
            pl.BlockSpec((4, 9, tb, 144), lambda i: (0, 0, i, 0)),
            pl.BlockSpec((144, 64), lambda i: (0, 0)),
            pl.BlockSpec((1, 64), lambda i: (0, 0)),
            pl.BlockSpec((9, 64, 128), lambda i: (0, 0, 0)),
            pl.BlockSpec((1, 128), lambda i: (0, 0)),
            pl.BlockSpec((128, 64), lambda i: (0, 0)),
            pl.BlockSpec((1, 64), lambda i: (0, 0)),
            pl.BlockSpec((64, 2), lambda i: (0, 0)),
            pl.BlockSpec((1, 2), lambda i: (0, 0)),
        ],
        out_specs=pl.BlockSpec((tb, 2), lambda i: (i, 0)),
        compiler_params=pltpu.CompilerParams(dimension_semantics=("parallel",)),
    )(patches, w2mat, b2row, w1r, bf1, wf2, bf2, wf3, bf3)
    return out


# ---------------------------------------------------------------------------
# BinaryCNN forward
# ---------------------------------------------------------------------------
def binary_cnn_forward(params, x):
    B = x.shape[0]
    assert x.shape[1:] == (1, 28, 28), x.shape
    x = x.reshape(B, 28, 28)                         # IC == 1

    # Batch tiling: tile must be a multiple of 8 (sublane layout) and divide
    # the (padded) batch; padded samples are zeros and sliced away at the end.
    Bp = _round_up(B, 8)
    tb = min(Bp, _TB_MAX)
    Bp = _round_up(Bp, tb)
    if Bp != B:
        x = jnp.pad(x, ((0, Bp - B), (0, 0), (0, 0)))

    act1 = _conv1_pool1(x, params["conv1_w"], params["conv1_b"], tb)
    out = _conv2_pool2_fc(act1, params, tb)
    return out[:B]


def init_params(key):
    """Deterministic init, shapes exactly as in the PyTorch module."""
    ks = jax.random.split(key, 10)

    def uni(k, shape, fan_in):
        bound = 1.0 / jnp.sqrt(float(fan_in))
        return jax.random.uniform(k, shape, jnp.float32, -bound, bound)

    return {
        "conv1_w": uni(ks[0], (16, 1, 3, 3), 1 * 3 * 3),
        "conv1_b": uni(ks[1], (16,), 1 * 3 * 3),
        "conv2_w": uni(ks[2], (64, 16, 3, 3), 16 * 3 * 3),
        "conv2_b": uni(ks[3], (64,), 16 * 3 * 3),
        "fc1_w": uni(ks[4], (128, 576), 576),
        "fc1_b": uni(ks[5], (128,), 576),
        "fc2_w": uni(ks[6], (64, 128), 128),
        "fc2_b": uni(ks[7], (64,), 128),
        "fc3_w": uni(ks[8], (2, 64), 64),
        "fc3_b": uni(ks[9], (2,), 64),
    }


if __name__ == "__main__":
    key = jax.random.PRNGKey(0)
    k_param, k_x = jax.random.split(key)
    params = init_params(k_param)
    # Input must be (B, 1, 28, 28) so the flatten yields 64*3*3 = 576.
    x = jax.random.normal(k_x, (2, 1, 28, 28), jnp.float32)

    fwd = jax.jit(binary_cnn_forward)
    out = jax.block_until_ready(fwd(params, x))
    assert out.shape == (2, 2), out.shape
    assert bool(jnp.all(jnp.isfinite(out)))
    print("KERNEL_OK")
</pallas_src>

<mosaic_0001>
module attributes {stable_mosaic.version = 11 : i64} {
  func.func @_conv1_pool1_kernel(%arg0: i32, %arg1: memref<9x64x72xf32, #tpu.memory_space<vmem>>, %arg2: memref<72x128xf32, #tpu.memory_space<vmem>>, %arg3: memref<1x128xf32, #tpu.memory_space<vmem>>, %arg4: memref<64x128xf32, #tpu.memory_space<vmem>>) attributes {dimension_semantics = [#tpu.dimension_semantics<parallel>], iteration_bounds = array<i64: 1>, scalar_prefetch = 0 : i64, scratch_operands = 0 : i64, tpu.core_type = #tpu.core_type<tc>, window_params = [{transform_indices = @transform_0, window_bounds = array<i64: 9, 64, 72>}, {pipeline_mode = #tpu.pipeline_mode<synchronous>, transform_indices = @transform_1, window_bounds = array<i64: 72, 128>}, {pipeline_mode = #tpu.pipeline_mode<synchronous>, transform_indices = @transform_2, window_bounds = array<i64: 1, 128>}, {transform_indices = @transform_3, window_bounds = array<i64: 64, 128>}]} {
    %c0 = arith.constant 0 : index
    %c0_0 = arith.constant 0 : index
    %c0_1 = arith.constant 0 : index
    %0 = vector.load %arg1[%c0, %c0_0, %c0_1] : memref<9x64x72xf32, #tpu.memory_space<vmem>>, vector<1x64x72xf32>
    %1 = vector.shape_cast %0 : vector<1x64x72xf32> to vector<64x72xf32>
    %c0_2 = arith.constant 0 : index
    %c0_3 = arith.constant 0 : index
    %2 = vector.load %arg2[%c0_2, %c0_3] : memref<72x128xf32, #tpu.memory_space<vmem>>, vector<72x128xf32>
    %cst = arith.constant dense<0.000000e+00> : vector<64x128xf32>
    %3 = tpu.matmul %1, %2, %cst {dimension_numbers = #tpu.dot_dimension_numbers<[1], [0], [0], [1], [0, 0, 1, 1], [], []>} : vector<64x72xf32>, vector<72x128xf32>, vector<64x128xf32> -> vector<64x128xf32>
    %c1 = arith.constant 1 : index
    %c0_4 = arith.constant 0 : index
    %c0_5 = arith.constant 0 : index
    %4 = vector.load %arg1[%c1, %c0_4, %c0_5] : memref<9x64x72xf32, #tpu.memory_space<vmem>>, vector<1x64x72xf32>
    %5 = vector.shape_cast %4 : vector<1x64x72xf32> to vector<64x72xf32>
    %c0_6 = arith.constant 0 : index
    %c0_7 = arith.constant 0 : index
    %6 = vector.load %arg2[%c0_6, %c0_7] : memref<72x128xf32, #tpu.memory_space<vmem>>, vector<72x128xf32>
    %cst_8 = arith.constant dense<0.000000e+00> : vector<64x128xf32>
    %7 = tpu.matmul %5, %6, %cst_8 {dimension_numbers = #tpu.dot_dimension_numbers<[1], [0], [0], [1], [0, 0, 1, 1], [], []>} : vector<64x72xf32>, vector<72x128xf32>, vector<64x128xf32> -> vector<64x128xf32>
    %8 = arith.maximumf %3, %7 : vector<64x128xf32>
    %c2 = arith.constant 2 : index
    %c0_9 = arith.constant 0 : index
    %c0_10 = arith.constant 0 : index
    %9 = vector.load %arg1[%c2, %c0_9, %c0_10] : memref<9x64x72xf32, #tpu.memory_space<vmem>>, vector<1x64x72xf32>
    %10 = vector.shape_cast %9 : vector<1x64x72xf32> to vector<64x72xf32>
    %c0_11 = arith.constant 0 : index
    %c0_12 = arith.constant 0 : index
    %11 = vector.load %arg2[%c0_11, %c0_12] : memref<72x128xf32, #tpu.memory_space<vmem>>, vector<72x128xf32>
    %cst_13 = arith.constant dense<0.000000e+00> : vector<64x128xf32>
    %12 = tpu.matmul %10, %11, %cst_13 {dimension_numbers = #tpu.dot_dimension_numbers<[1], [0], [0], [1], [0, 0, 1, 1], [], []>} : vector<64x72xf32>, vector<72x128xf32>, vector<64x128xf32> -> vector<64x128xf32>
    %13 = arith.maximumf %8, %12 : vector<64x128xf32>
    %c3 = arith.constant 3 : index
    %c0_14 = arith.constant 0 : index
    %c0_15 = arith.constant 0 : index
    %14 = vector.load %arg1[%c3, %c0_14, %c0_15] : memref<9x64x72xf32, #tpu.memory_space<vmem>>, vector<1x64x72xf32>
    %15 = vector.shape_cast %14 : vector<1x64x72xf32> to vector<64x72xf32>
    %c0_16 = arith.constant 0 : index
    %c0_17 = arith.constant 0 : index
    %16 = vector.load %arg2[%c0_16, %c0_17] : memref<72x128xf32, #tpu.memory_space<vmem>>, vector<72x128xf32>
    %cst_18 = arith.constant dense<0.000000e+00> : vector<64x128xf32>
    %17 = tpu.matmul %15, %16, %cst_18 {dimension_numbers = #tpu.dot_dimension_numbers<[1], [0], [0], [1], [0, 0, 1, 1], [], []>} : vector<64x72xf32>, vector<72x128xf32>, vector<64x128xf32> -> vector<64x128xf32>
    %18 = arith.maximumf %13, %17 : vector<64x128xf32>
    %c4 = arith.constant 4 : index
    %c0_19 = arith.constant 0 : index
    %c0_20 = arith.constant 0 : index
    %19 = vector.load %arg1[%c4, %c0_19, %c0_20] : memref<9x64x72xf32, #tpu.memory_space<vmem>>, vector<1x64x72xf32>
    %20 = vector.shape_cast %19 : vector<1x64x72xf32> to vector<64x72xf32>
    %c0_21 = arith.constant 0 : index
    %c0_22 = arith.constant 0 : index
    %21 = vector.load %arg2[%c0_21, %c0_22] : memref<72x128xf32, #tpu.memory_space<vmem>>, vector<72x128xf32>
    %cst_23 = arith.constant dense<0.000000e+00> : vector<64x128xf32>
    %22 = tpu.matmul %20, %21, %cst_23 {dimension_numbers = #tpu.dot_dimension_numbers<[1], [0], [0], [1], [0, 0, 1, 1], [], []>} : vector<64x72xf32>, vector<72x128xf32>, vector<64x128xf32> -> vector<64x128xf32>
    %23 = arith.maximumf %18, %22 : vector<64x128xf32>
    %c5 = arith.constant 5 : index
    %c0_24 = arith.constant 0 : index
    %c0_25 = arith.constant 0 : index
    %24 = vector.load %arg1[%c5, %c0_24, %c0_25] : memref<9x64x72xf32, #tpu.memory_space<vmem>>, vector<1x64x72xf32>
    %25 = vector.shape_cast %24 : vector<1x64x72xf32> to vector<64x72xf32>
    %c0_26 = arith.constant 0 : index
    %c0_27 = arith.constant 0 : index
    %26 = vector.load %arg2[%c0_26, %c0_27] : memref<72x128xf32, #tpu.memory_space<vmem>>, vector<72x128xf32>
    %cst_28 = arith.constant dense<0.000000e+00> : vector<64x128xf32>
    %27 = tpu.matmul %25, %26, %cst_28 {dimension_numbers = #tpu.dot_dimension_numbers<[1], [0], [0], [1], [0, 0, 1, 1], [], []>} : vector<64x72xf32>, vector<72x128xf32>, vector<64x128xf32> -> vector<64x128xf32>
    %28 = arith.maximumf %23, %27 : vector<64x128xf32>
    %c6 = arith.constant 6 : index
    %c0_29 = arith.constant 0 : index
    %c0_30 = arith.constant 0 : index
    %29 = vector.load %arg1[%c6, %c0_29, %c0_30] : memref<9x64x72xf32, #tpu.memory_space<vmem>>, vector<1x64x72xf32>
    %30 = vector.shape_cast %29 : vector<1x64x72xf32> to vector<64x72xf32>
    %c0_31 = arith.constant 0 : index
    %c0_32 = arith.constant 0 : index
    %31 = vector.load %arg2[%c0_31, %c0_32] : memref<72x128xf32, #tpu.memory_space<vmem>>, vector<72x128xf32>
    %cst_33 = arith.constant dense<0.000000e+00> : vector<64x128xf32>
    %32 = tpu.matmul %30, %31, %cst_33 {dimension_numbers = #tpu.dot_dimension_numbers<[1], [0], [0], [1], [0, 0, 1, 1], [], []>} : vector<64x72xf32>, vector<72x128xf32>, vector<64x128xf32> -> vector<64x128xf32>
    %33 = arith.maximumf %28, %32 : vector<64x128xf32>
    %c7 = arith.constant 7 : index
    %c0_34 = arith.constant 0 : index
    %c0_35 = arith.constant 0 : index
    %34 = vector.load %arg1[%c7, %c0_34, %c0_35] : memref<9x64x72xf32, #tpu.memory_space<vmem>>, vector<1x64x72xf32>
    %35 = vector.shape_cast %34 : vector<1x64x72xf32> to vector<64x72xf32>
    %c0_36 = arith.constant 0 : index
    %c0_37 = arith.constant 0 : index
    %36 = vector.load %arg2[%c0_36, %c0_37] : memref<72x128xf32, #tpu.memory_space<vmem>>, vector<72x128xf32>
    %cst_38 = arith.constant dense<0.000000e+00> : vector<64x128xf32>
    %37 = tpu.matmul %35, %36, %cst_38 {dimension_numbers = #tpu.dot_dimension_numbers<[1], [0], [0], [1], [0, 0, 1, 1], [], []>} : vector<64x72xf32>, vector<72x128xf32>, vector<64x128xf32> -> vector<64x128xf32>
    %38 = arith.maximumf %33, %37 : vector<64x128xf32>
    %c8 = arith.constant 8 : index
    %c0_39 = arith.constant 0 : index
    %c0_40 = arith.constant 0 : index
    %39 = vector.load %arg1[%c8, %c0_39, %c0_40] : memref<9x64x72xf32, #tpu.memory_space<vmem>>, vector<1x64x72xf32>
    %40 = vector.shape_cast %39 : vector<1x64x72xf32> to vector<64x72xf32>
    %c0_41 = arith.constant 0 : index
    %c0_42 = arith.constant 0 : index
    %41 = vector.load %arg2[%c0_41, %c0_42] : memref<72x128xf32, #tpu.memory_space<vmem>>, vector<72x128xf32>
    %cst_43 = arith.constant dense<0.000000e+00> : vector<64x128xf32>
    %42 = tpu.matmul %40, %41, %cst_43 {dimension_numbers = #tpu.dot_dimension_numbers<[1], [0], [0], [1], [0, 0, 1, 1], [], []>} : vector<64x72xf32>, vector<72x128xf32>, vector<64x128xf32> -> vector<64x128xf32>
    %43 = arith.maximumf %38, %42 : vector<64x128xf32>
    %c0_44 = arith.constant 0 : index
    %c0_45 = arith.constant 0 : index
    %44 = vector.load %arg3[%c0_44, %c0_45] : memref<1x128xf32, #tpu.memory_space<vmem>>, vector<1x128xf32>
    %45 = vector.broadcast %44 : vector<1x128xf32> to vector<64x128xf32>
    %46 = arith.addf %43, %45 : vector<64x128xf32>
    %cst_46 = arith.constant 0.000000e+00 : f32
    %47 = vector.broadcast %cst_46 : f32 to vector<64x128xf32>
    %48 = arith.maximumf %46, %47 : vector<64x128xf32>
    %c0_47 = arith.constant 0 : index
    %c0_48 = arith.constant 0 : index
    %49 = vector.load %arg4[%c0_47, %c0_48] : memref<64x128xf32, #tpu.memory_space<vmem>>, vector<64x128xf32>
    tpu.vector_store %arg4[%c0_47, %c0_48], %48 {strides = array<i32>} : memref<64x128xf32, #tpu.memory_space<vmem>>, vector<64x128xf32>,
    return
  }
  func.func @transform_0(%arg0: i32) -> (i32, i32, i32) {
    %c0_i32 = arith.constant 0 : i32
    %c0_i32_0 = arith.constant 0 : i32
    %c0_i32_1 = arith.constant 0 : i32
    return %c0_i32, %arg0, %c0_i32_0 : i32, i32, i32
  }
  func.func @transform_1(%arg0: i32) -> (i32, i32) {
    %c0_i32 = arith.constant 0 : i32
    %c0_i32_0 = arith.constant 0 : i32
    %c0_i32_1 = arith.constant 0 : i32
    return %c0_i32, %c0_i32_0 : i32, i32
  }
  func.func @transform_2(%arg0: i32) -> (i32, i32) {
    %c0_i32 = arith.constant 0 : i32
    %c0_i32_0 = arith.constant 0 : i32
    %c0_i32_1 = arith.constant 0 : i32
    return %c0_i32, %c0_i32_0 : i32, i32
  }
  func.func @transform_3(%arg0: i32) -> (i32, i32) {
    %c0_i32 = arith.constant 0 : i32
    %c0_i32_0 = arith.constant 0 : i32
    return %arg0, %c0_i32 : i32, i32
  }
}

module attributes {stable_mosaic.version = 11 : i64} {
  func.func @_conv2_pool2_fc_kernel(%arg0: i32, %arg1: memref<4x9x8x144xf32, #tpu.memory_space<vmem>>, %arg2: memref<144x64xf32, #tpu.memory_space<vmem>>, %arg3: memref<1x64xf32, #tpu.memory_space<vmem>>, %arg4: memref<9x64x128xf32, #tpu.memory_space<vmem>>, %arg5: memref<1x128xf32, #tpu.memory_space<vmem>>, %arg6: memref<128x64xf32, #tpu.memory_space<vmem>>, %arg7: memref<1x64xf32, #tpu.memory_space<vmem>>, %arg8: memref<64x2xf32, #tpu.memory_space<vmem>>, %arg9: memref<1x2xf32, #tpu.memory_space<vmem>>, %arg10: memref<8x2xf32, #tpu.memory_space<vmem>>) attributes {dimension_semantics = [#tpu.dimension_semantics<parallel>], iteration_bounds = array<i64: 1>, scalar_prefetch = 0 : i64, scratch_operands = 0 : i64, tpu.core_type = #tpu.core_type<tc>, window_params = [{transform_indices = @transform_0, window_bounds = array<i64: 4, 9, 8, 144>}, {pipeline_mode = #tpu.pipeline_mode<synchronous>, transform_indices = @transform_1, window_bounds = array<i64: 144, 64>}, {pipeline_mode = #tpu.pipeline_mode<synchronous>, transform_indices = @transform_2, window_bounds = array<i64: 1, 64>}, {pipeline_mode = #tpu.pipeline_mode<synchronous>, transform_indices = @transform_3, window_bounds = array<i64: 9, 64, 128>}, {pipeline_mode = #tpu.pipeline_mode<synchronous>, transform_indices = @transform_4, window_bounds = array<i64: 1, 128>}, {pipeline_mode = #tpu.pipeline_mode<synchronous>, transform_indices = @transform_5, window_bounds = array<i64: 128, 64>}, {pipeline_mode = #tpu.pipeline_mode<synchronous>, transform_indices = @transform_6, window_bounds = array<i64: 1, 64>}, {pipeline_mode = #tpu.pipeline_mode<synchronous>, transform_indices = @transform_7, window_bounds = array<i64: 64, 2>}, {pipeline_mode = #tpu.pipeline_mode<synchronous>, transform_indices = @transform_8, window_bounds = array<i64: 1, 2>}, {transform_indices = @transform_9, window_bounds = array<i64: 8, 2>}]} {
    %cst = arith.constant 0.000000e+00 : f32
    %0 = vector.broadcast %cst : f32 to vector<8x128xf32>
    %c0 = arith.constant 0 : index
    %c0_0 = arith.constant 0 : index
    %c0_1 = arith.constant 0 : index
    %c0_2 = arith.constant 0 : index
    %1 = vector.load %arg1[%c0, %c0_0, %c0_1, %c0_2] : memref<4x9x8x144xf32, #tpu.memory_space<vmem>>, vector<1x1x8x144xf32>
    %2 = vector.shape_cast %1 : vector<1x1x8x144xf32> to vector<8x144xf32>
    %c0_3 = arith.constant 0 : index
    %c0_4 = arith.constant 0 : index
    %3 = vector.load %arg2[%c0_3, %c0_4] : memref<144x64xf32, #tpu.memory_space<vmem>>, vector<144x64xf32>
    %cst_5 = arith.constant dense<0.000000e+00> : vector<8x64xf32>
    %4 = tpu.matmul %2, %3, %cst_5 {dimension_numbers = #tpu.dot_dimension_numbers<[1], [0], [0], [1], [0, 0, 1, 1], [], []>} : vector<8x144xf32>, vector<144x64xf32>, vector<8x64xf32> -> vector<8x64xf32>
    %c1 = arith.constant 1 : index
    %c0_6 = arith.constant 0 : index
    %c0_7 = arith.constant 0 : index
    %c0_8 = arith.constant 0 : index
    %5 = vector.load %arg1[%c1, %c0_6, %c0_7, %c0_8] : memref<4x9x8x144xf32, #tpu.memory_space<vmem>>, vector<1x1x8x144xf32>
    %6 = vector.shape_cast %5 : vector<1x1x8x144xf32> to vector<8x144xf32>
    %c0_9 = arith.constant 0 : index
    %c0_10 = arith.constant 0 : index
    %7 = vector.load %arg2[%c0_9, %c0_10] : memref<144x64xf32, #tpu.memory_space<vmem>>, vector<144x64xf32>
    %cst_11 = arith.constant dense<0.000000e+00> : vector<8x64xf32>
    %8 = tpu.matmul %6, %7, %cst_11 {dimension_numbers = #tpu.dot_dimension_numbers<[1], [0], [0], [1], [0, 0, 1, 1], [], []>} : vector<8x144xf32>, vector<144x64xf32>, vector<8x64xf32> -> vector<8x64xf32>
    %9 = arith.maximumf %4, %8 : vector<8x64xf32>
    %c2 = arith.constant 2 : index
    %c0_12 = arith.constant 0 : index
    %c0_13 = arith.constant 0 : index
    %c0_14 = arith.constant 0 : index
    %10 = vector.load %arg1[%c2, %c0_12, %c0_13, %c0_14] : memref<4x9x8x144xf32, #tpu.memory_space<vmem>>, vector<1x1x8x144xf32>
    %11 = vector.shape_cast %10 : vector<1x1x8x144xf32> to vector<8x144xf32>
    %c0_15 = arith.constant 0 : index
    %c0_16 = arith.constant 0 : index
    %12 = vector.load %arg2[%c0_15, %c0_16] : memref<144x64xf32, #tpu.memory_space<vmem>>, vector<144x64xf32>
    %cst_17 = arith.constant dense<0.000000e+00> : vector<8x64xf32>
    %13 = tpu.matmul %11, %12, %cst_17 {dimension_numbers = #tpu.dot_dimension_numbers<[1], [0], [0], [1], [0, 0, 1, 1], [], []>} : vector<8x144xf32>, vector<144x64xf32>, vector<8x64xf32> -> vector<8x64xf32>
    %14 = arith.maximumf %9, %13 : vector<8x64xf32>
    %c3 = arith.constant 3 : index
    %c0_18 = arith.constant 0 : index
    %c0_19 = arith.constant 0 : index
    %c0_20 = arith.constant 0 : index
    %15 = vector.load %arg1[%c3, %c0_18, %c0_19, %c0_20] : memref<4x9x8x144xf32, #tpu.memory_space<vmem>>, vector<1x1x8x144xf32>
    %16 = vector.shape_cast %15 : vector<1x1x8x144xf32> to vector<8x144xf32>
    %c0_21 = arith.constant 0 : index
    %c0_22 = arith.constant 0 : index
    %17 = vector.load %arg2[%c0_21, %c0_22] : memref<144x64xf32, #tpu.memory_space<vmem>>, vector<144x64xf32>
    %cst_23 = arith.constant dense<0.000000e+00> : vector<8x64xf32>
    %18 = tpu.matmul %16, %17, %cst_23 {dimension_numbers = #tpu.dot_dimension_numbers<[1], [0], [0], [1], [0, 0, 1, 1], [], []>} : vector<8x144xf32>, vector<144x64xf32>, vector<8x64xf32> -> vector<8x64xf32>
    %19 = arith.maximumf %14, %18 : vector<8x64xf32>
    %c0_24 = arith.constant 0 : index
    %c0_25 = arith.constant 0 : index
    %20 = vector.load %arg3[%c0_24, %c0_25] : memref<1x64xf32, #tpu.memory_space<vmem>>, vector<1x64xf32>
    %21 = vector.broadcast %20 : vector<1x64xf32> to vector<8x64xf32>
    %22 = arith.addf %19, %21 : vector<8x64xf32>
    %cst_26 = arith.constant 0.000000e+00 : f32
    %23 = vector.broadcast %cst_26 : f32 to vector<8x64xf32>
    %24 = arith.maximumf %22, %23 : vector<8x64xf32>
    %c0_27 = arith.constant 0 : index
    %c0_28 = arith.constant 0 : index
    %c0_29 = arith.constant 0 : index
    %25 = vector.load %arg4[%c0_27, %c0_28, %c0_29] : memref<9x64x128xf32, #tpu.memory_space<vmem>>, vector<1x64x128xf32>
    %26 = vector.shape_cast %25 : vector<1x64x128xf32> to vector<64x128xf32>
    %cst_30 = arith.constant dense<0.000000e+00> : vector<8x128xf32>
    %27 = tpu.matmul %24, %26, %cst_30 {dimension_numbers = #tpu.dot_dimension_numbers<[1], [0], [0], [1], [0, 0, 1, 1], [], []>} : vector<8x64xf32>, vector<64x128xf32>, vector<8x128xf32> -> vector<8x128xf32>
    %28 = arith.addf %0, %27 : vector<8x128xf32>
    %c0_31 = arith.constant 0 : index
    %c1_32 = arith.constant 1 : index
    %c0_33 = arith.constant 0 : index
    %c0_34 = arith.constant 0 : index
    %29 = vector.load %arg1[%c0_31, %c1_32, %c0_33, %c0_34] : memref<4x9x8x144xf32, #tpu.memory_space<vmem>>, vector<1x1x8x144xf32>
    %30 = vector.shape_cast %29 : vector<1x1x8x144xf32> to vector<8x144xf32>
    %c0_35 = arith.constant 0 : index
    %c0_36 = arith.constant 0 : index
    %31 = vector.load %arg2[%c0_35, %c0_36] : memref<144x64xf32, #tpu.memory_space<vmem>>, vector<144x64xf32>
    %cst_37 = arith.constant dense<0.000000e+00> : vector<8x64xf32>
    %32 = tpu.matmul %30, %31, %cst_37 {dimension_numbers = #tpu.dot_dimension_numbers<[1], [0], [0], [1], [0, 0, 1, 1], [], []>} : vector<8x144xf32>, vector<144x64xf32>, vector<8x64xf32> -> vector<8x64xf32>
    %c1_38 = arith.constant 1 : index
    %c1_39 = arith.constant 1 : index
    %c0_40 = arith.constant 0 : index
    %c0_41 = arith.constant 0 : index
    %33 = vector.load %arg1[%c1_38, %c1_39, %c0_40, %c0_41] : memref<4x9x8x144xf32, #tpu.memory_space<vmem>>, vector<1x1x8x144xf32>
    %34 = vector.shape_cast %33 : vector<1x1x8x144xf32> to vector<8x144xf32>
    %c0_42 = arith.constant 0 : index
    %c0_43 = arith.constant 0 : index
    %35 = vector.load %arg2[%c0_42, %c0_43] : memref<144x64xf32, #tpu.memory_space<vmem>>, vector<144x64xf32>
    %cst_44 = arith.constant dense<0.000000e+00> : vector<8x64xf32>
    %36 = tpu.matmul %34, %35, %cst_44 {dimension_numbers = #tpu.dot_dimension_numbers<[1], [0], [0], [1], [0, 0, 1, 1], [], []>} : vector<8x144xf32>, vector<144x64xf32>, vector<8x64xf32> -> vector<8x64xf32>
    %37 = arith.maximumf %32, %36 : vector<8x64xf32>
    %c2_45 = arith.constant 2 : index
    %c1_46 = arith.constant 1 : index
    %c0_47 = arith.constant 0 : index
    %c0_48 = arith.constant 0 : index
    %38 = vector.load %arg1[%c2_45, %c1_46, %c0_47, %c0_48] : memref<4x9x8x144xf32, #tpu.memory_space<vmem>>, vector<1x1x8x144xf32>
    %39 = vector.shape_cast %38 : vector<1x1x8x144xf32> to vector<8x144xf32>
    %c0_49 = arith.constant 0 : index
    %c0_50 = arith.constant 0 : index
    %40 = vector.load %arg2[%c0_49, %c0_50] : memref<144x64xf32, #tpu.memory_space<vmem>>, vector<144x64xf32>
    %cst_51 = arith.constant dense<0.000000e+00> : vector<8x64xf32>
    %41 = tpu.matmul %39, %40, %cst_51 {dimension_numbers = #tpu.dot_dimension_numbers<[1], [0], [0], [1], [0, 0, 1, 1], [], []>} : vector<8x144xf32>, vector<144x64xf32>, vector<8x64xf32> -> vector<8x64xf32>
    %42 = arith.maximumf %37, %41 : vector<8x64xf32>
    %c3_52 = arith.constant 3 : index
    %c1_53 = arith.constant 1 : index
    %c0_54 = arith.constant 0 : index
    %c0_55 = arith.constant 0 : index
    %43 = vector.load %arg1[%c3_52, %c1_53, %c0_54, %c0_55] : memref<4x9x8x144xf32, #tpu.memory_space<vmem>>, vector<1x1x8x144xf32>
    %44 = vector.shape_cast %43 : vector<1x1x8x144xf32> to vector<8x144xf32>
    %c0_56 = arith.constant 0 : index
    %c0_57 = arith.constant 0 : index
    %45 = vector.load %arg2[%c0_56, %c0_57] : memref<144x64xf32, #tpu.memory_space<vmem>>, vector<144x64xf32>
    %cst_58 = arith.constant dense<0.000000e+00> : vector<8x64xf32>
    %46 = tpu.matmul %44, %45, %cst_58 {dimension_numbers = #tpu.dot_dimension_numbers<[1], [0], [0], [1], [0, 0, 1, 1], [], []>} : vector<8x144xf32>, vector<144x64xf32>, vector<8x64xf32> -> vector<8x64xf32>
    %47 = arith.maximumf %42, %46 : vector<8x64xf32>
    %c0_59 = arith.constant 0 : index
    %c0_60 = arith.constant 0 : index
    %48 = vector.load %arg3[%c0_59, %c0_60] : memref<1x64xf32, #tpu.memory_space<vmem>>, vector<1x64xf32>
    %49 = vector.broadcast %48 : vector<1x64xf32> to vector<8x64xf32>
    %50 = arith.addf %47, %49 : vector<8x64xf32>
    %cst_61 = arith.constant 0.000000e+00 : f32
    %51 = vector.broadcast %cst_61 : f32 to vector<8x64xf32>
    %52 = arith.maximumf %50, %51 : vector<8x64xf32>
    %c1_62 = arith.constant 1 : index
    %c0_63 = arith.constant 0 : index
    %c0_64 = arith.constant 0 : index
    %53 = vector.load %arg4[%c1_62, %c0_63, %c0_64] : memref<9x64x128xf32, #tpu.memory_space<vmem>>, vector<1x64x128xf32>
    %54 = vector.shape_cast %53 : vector<1x64x128xf32> to vector<64x128xf32>
    %cst_65 = arith.constant dense<0.000000e+00> : vector<8x128xf32>
    %55 = tpu.matmul %52, %54, %cst_65 {dimension_numbers = #tpu.dot_dimension_numbers<[1], [0], [0], [1], [0, 0, 1, 1], [], []>} : vector<8x64xf32>, vector<64x128xf32>, vector<8x128xf32> -> vector<8x128xf32>
    %56 = arith.addf %28, %55 : vector<8x128xf32>
    %c0_66 = arith.constant 0 : index
    %c2_67 = arith.constant 2 : index
    %c0_68 = arith.constant 0 : index
    %c0_69 = arith.constant 0 : index
    %57 = vector.load %arg1[%c0_66, %c2_67, %c0_68, %c0_69] : memref<4x9x8x144xf32, #tpu.memory_space<vmem>>, vector<1x1x8x144xf32>
    %58 = vector.shape_cast %57 : vector<1x1x8x144xf32> to vector<8x144xf32>
    %c0_70 = arith.constant 0 : index
    %c0_71 = arith.constant 0 : index
    %59 = vector.load %arg2[%c0_70, %c0_71] : memref<144x64xf32, #tpu.memory_space<vmem>>, vector<144x64xf32>
    %cst_72 = arith.constant dense<0.000000e+00> : vector<8x64xf32>
    %60 = tpu.matmul %58, %59, %cst_72 {dimension_numbers = #tpu.dot_dimension_numbers<[1], [0], [0], [1], [0, 0, 1, 1], [], []>} : vector<8x144xf32>, vector<144x64xf32>, vector<8x64xf32> -> vector<8x64xf32>
    %c1_73 = arith.constant 1 : index
    %c2_74 = arith.constant 2 : index
    %c0_75 = arith.constant 0 : index
    %c0_76 = arith.constant 0 : index
    %61 = vector.load %arg1[%c1_73, %c2_74, %c0_75, %c0_76] : memref<4x9x8x144xf32, #tpu.memory_space<vmem>>, vector<1x1x8x144xf32>
    %62 = vector.shape_cast %61 : vector<1x1x8x144xf32> to vector<8x144xf32>
    %c0_77 = arith.constant 0 : index
    %c0_78 = arith.constant 0 : index
    %63 = vector.load %arg2[%c0_77, %c0_78] : memref<144x64xf32, #tpu.memory_space<vmem>>, vector<144x64xf32>
    %cst_79 = arith.constant dense<0.000000e+00> : vector<8x64xf32>
    %64 = tpu.matmul %62, %63, %cst_79 {dimension_numbers = #tpu.dot_dimension_numbers<[1], [0], [0], [1], [0, 0, 1, 1], [], []>} : vector<8x144xf32>, vector<144x64xf32>, vector<8x64xf32> -> vector<8x64xf32>
    %65 = arith.maximumf %60, %64 : vector<8x64xf32>
    %c2_80 = arith.constant 2 : index
    %c2_81 = arith.constant 2 : index
    %c0_82 = arith.constant 0 : index
    %c0_83 = arith.constant 0 : index
    %66 = vector.load %arg1[%c2_80, %c2_81, %c0_82, %c0_83] : memref<4x9x8x144xf32, #tpu.memory_space<vmem>>, vector<1x1x8x144xf32>
    %67 = vector.shape_cast %66 : vector<1x1x8x144xf32> to vector<8x144xf32>
    %c0_84 = arith.constant 0 : index
    %c0_85 = arith.constant 0 : index
    %68 = vector.load %arg2[%c0_84, %c0_85] : memref<144x64xf32, #tpu.memory_space<vmem>>, vector<144x64xf32>
    %cst_86 = arith.constant dense<0.000000e+00> : vector<8x64xf32>
    %69 = tpu.matmul %67, %68, %cst_86 {dimension_numbers = #tpu.dot_dimension_numbers<[1], [0], [0], [1], [0, 0, 1, 1], [], []>} : vector<8x144xf32>, vector<144x64xf32>, vector<8x64xf32> -> vector<8x64xf32>
    %70 = arith.maximumf %65, %69 : vector<8x64xf32>
    %c3_87 = arith.constant 3 : index
    %c2_88 = arith.constant 2 : index
    %c0_89 = arith.constant 0 : index
    %c0_90 = arith.constant 0 : index
    %71 = vector.load %arg1[%c3_87, %c2_88, %c0_89, %c0_90] : memref<4x9x8x144xf32, #tpu.memory_space<vmem>>, vector<1x1x8x144xf32>
    %72 = vector.shape_cast %71 : vector<1x1x8x144xf32> to vector<8x144xf32>
    %c0_91 = arith.constant 0 : index
    %c0_92 = arith.constant 0 : index
    %73 = vector.load %arg2[%c0_91, %c0_92] : memref<144x64xf32, #tpu.memory_space<vmem>>, vector<144x64xf32>
    %cst_93 = arith.constant dense<0.000000e+00> : vector<8x64xf32>
    %74 = tpu.matmul %72, %73, %cst_93 {dimension_numbers = #tpu.dot_dimension_numbers<[1], [0], [0], [1], [0, 0, 1, 1], [], []>} : vector<8x144xf32>, vector<144x64xf32>, vector<8x64xf32> -> vector<8x64xf32>
    %75 = arith.maximumf %70, %74 : vector<8x64xf32>
    %c0_94 = arith.constant 0 : index
    %c0_95 = arith.constant 0 : index
    %76 = vector.load %arg3[%c0_94, %c0_95] : memref<1x64xf32, #tpu.memory_space<vmem>>, vector<1x64xf32>
    %77 = vector.broadcast %76 : vector<1x64xf32> to vector<8x64xf32>
    %78 = arith.addf %75, %77 : vector<8x64xf32>
    %cst_96 = arith.constant 0.000000e+00 : f32
    %79 = vector.broadcast %cst_96 : f32 to vector<8x64xf32>
    %80 = arith.maximumf %78, %79 : vector<8x64xf32>
    %c2_97 = arith.constant 2 : index
    %c0_98 = arith.constant 0 : index
    %c0_99 = arith.constant 0 : index
    %81 = vector.load %arg4[%c2_97, %c0_98, %c0_99] : memref<9x64x128xf32, #tpu.memory_space<vmem>>, vector<1x64x128xf32>
    %82 = vector.shape_cast %81 : vector<1x64x128xf32> to vector<64x128xf32>
    %cst_100 = arith.constant dense<0.000000e+00> : vector<8x128xf32>
    %83 = tpu.matmul %80, %82, %cst_100 {dimension_numbers = #tpu.dot_dimension_numbers<[1], [0], [0], [1], [0, 0, 1, 1], [], []>} : vector<8x64xf32>, vector<64x128xf32>, vector<8x128xf32> -> vector<8x128xf32>
    %84 = arith.addf %56, %83 : vector<8x128xf32>
    %c0_101 = arith.constant 0 : index
    %c3_102 = arith.constant 3 : index
    %c0_103 = arith.constant 0 : index
    %c0_104 = arith.constant 0 : index
    %85 = vector.load %arg1[%c0_101, %c3_102, %c0_103, %c0_104] : memref<4x9x8x144xf32, #tpu.memory_space<vmem>>, vector<1x1x8x144xf32>
    %86 = vector.shape_cast %85 : vector<1x1x8x144xf32> to vector<8x144xf32>
    %c0_105 = arith.constant 0 : index
    %c0_106 = arith.constant 0 : index
    %87 = vector.load %arg2[%c0_105, %c0_106] : memref<144x64xf32, #tpu.memory_space<vmem>>, vector<144x64xf32>
    %cst_107 = arith.constant dense<0.000000e+00> : vector<8x64xf32>
    %88 = tpu.matmul %86, %87, %cst_107 {dimension_numbers = #tpu.dot_dimension_numbers<[1], [0], [0], [1], [0, 0, 1, 1], [], []>} : vector<8x144xf32>, vector<144x64xf32>, vector<8x64xf32> -> vector<8x64xf32>
    %c1_108 = arith.constant 1 : index
    %c3_109 = arith.constant 3 : index
    %c0_110 = arith.constant 0 : index
    %c0_111 = arith.constant 0 : index
    %89 = vector.load %arg1[%c1_108, %c3_109, %c0_110, %c0_111] : memref<4x9x8x144xf32, #tpu.memory_space<vmem>>, vector<1x1x8x144xf32>
    %90 = vector.shape_cast %89 : vector<1x1x8x144xf32> to vector<8x144xf32>
    %c0_112 = arith.constant 0 : index
    %c0_113 = arith.constant 0 : index
    %91 = vector.load %arg2[%c0_112, %c0_113] : memref<144x64xf32, #tpu.memory_space<vmem>>, vector<144x64xf32>
    %cst_114 = arith.constant dense<0.000000e+00> : vector<8x64xf32>
    %92 = tpu.matmul %90, %91, %cst_114 {dimension_numbers = #tpu.dot_dimension_numbers<[1], [0], [0], [1], [0, 0, 1, 1], [], []>} : vector<8x144xf32>, vector<144x64xf32>, vector<8x64xf32> -> vector<8x64xf32>
    %93 = arith.maximumf %88, %92 : vector<8x64xf32>
    %c2_115 = arith.constant 2 : index
    %c3_116 = arith.constant 3 : index
    %c0_117 = arith.constant 0 : index
    %c0_118 = arith.constant 0 : index
    %94 = vector.load %arg1[%c2_115, %c3_116, %c0_117, %c0_118] : memref<4x9x8x144xf32, #tpu.memory_space<vmem>>, vector<1x1x8x144xf32>
    %95 = vector.shape_cast %94 : vector<1x1x8x144xf32> to vector<8x144xf32>
    %c0_119 = arith.constant 0 : index
    %c0_120 = arith.constant 0 : index
    %96 = vector.load %arg2[%c0_119, %c0_120] : memref<144x64xf32, #tpu.memory_space<vmem>>, vector<144x64xf32>
    %cst_121 = arith.constant dense<0.000000e+00> : vector<8x64xf32>
    %97 = tpu.matmul %95, %96, %cst_121 {dimension_numbers = #tpu.dot_dimension_numbers<[1], [0], [0], [1], [0, 0, 1, 1], [], []>} : vector<8x144xf32>, vector<144x64xf32>, vector<8x64xf32> -> vector<8x64xf32>
    %98 = arith.maximumf %93, %97 : vector<8x64xf32>
    %c3_122 = arith.constant 3 : index
    %c3_123 = arith.constant 3 : index
    %c0_124 = arith.constant 0 : index
    %c0_125 = arith.constant 0 : index
    %99 = vector.load %arg1[%c3_122, %c3_123, %c0_124, %c0_125] : memref<4x9x8x144xf32, #tpu.memory_space<vmem>>, vector<1x1x8x144xf32>
    %100 = vector.shape_cast %99 : vector<1x1x8x144xf32> to vector<8x144xf32>
    %c0_126 = arith.constant 0 : index
    %c0_127 = arith.constant 0 : index
    %101 = vector.load %arg2[%c0_126, %c0_127] : memref<144x64xf32, #tpu.memory_space<vmem>>, vector<144x64xf32>
    %cst_128 = arith.constant dense<0.000000e+00> : vector<8x64xf32>
    %102 = tpu.matmul %100, %101, %cst_128 {dimension_numbers = #tpu.dot_dimension_numbers<[1], [0], [0], [1], [0, 0, 1, 1], [], []>} : vector<8x144xf32>, vector<144x64xf32>, vector<8x64xf32> -> vector<8x64xf32>
    %103 = arith.maximumf %98, %102 : vector<8x64xf32>
    %c0_129 = arith.constant 0 : index
    %c0_130 = arith.constant 0 : index
    %104 = vector.load %arg3[%c0_129, %c0_130] : memref<1x64xf32, #tpu.memory_space<vmem>>, vector<1x64xf32>
    %105 = vector.broadcast %104 : vector<1x64xf32> to vector<8x64xf32>
    %106 = arith.addf %103, %105 : vector<8x64xf32>
    %cst_131 = arith.constant 0.000000e+00 : f32
    %107 = vector.broadcast %cst_131 : f32 to vector<8x64xf32>
    %108 = arith.maximumf %106, %107 : vector<8x64xf32>
    %c3_132 = arith.constant 3 : index
    %c0_133 = arith.constant 0 : index
    %c0_134 = arith.constant 0 : index
    %109 = vector.load %arg4[%c3_132, %c0_133, %c0_134] : memref<9x64x128xf32, #tpu.memory_space<vmem>>, vector<1x64x128xf32>
    %110 = vector.shape_cast %109 : vector<1x64x128xf32> to vector<64x128xf32>
    %cst_135 = arith.constant dense<0.000000e+00> : vector<8x128xf32>
    %111 = tpu.matmul %108, %110, %cst_135 {dimension_numbers = #tpu.dot_dimension_numbers<[1], [0], [0], [1], [0, 0, 1, 1], [], []>} : vector<8x64xf32>, vector<64x128xf32>, vector<8x128xf32> -> vector<8x128xf32>
    %112 = arith.addf %84, %111 : vector<8x128xf32>
    %c0_136 = arith.constant 0 : index
    %c4 = arith.constant 4 : index
    %c0_137 = arith.constant 0 : index
    %c0_138 = arith.constant 0 : index
    %113 = vector.load %arg1[%c0_136, %c4, %c0_137, %c0_138] : memref<4x9x8x144xf32, #tpu.memory_space<vmem>>, vector<1x1x8x144xf32>
    %114 = vector.shape_cast %113 : vector<1x1x8x144xf32> to vector<8x144xf32>
    %c0_139 = arith.constant 0 : index
    %c0_140 = arith.constant 0 : index
    %115 = vector.load %arg2[%c0_139, %c0_140] : memref<144x64xf32, #tpu.memory_space<vmem>>, vector<144x64xf32>
    %cst_141 = arith.constant dense<0.000000e+00> : vector<8x64xf32>
    %116 = tpu.matmul %114, %115, %cst_141 {dimension_numbers = #tpu.dot_dimension_numbers<[1], [0], [0], [1], [0, 0, 1, 1], [], []>} : vector<8x144xf32>, vector<144x64xf32>, vector<8x64xf32> -> vector<8x64xf32>
    %c1_142 = arith.constant 1 : index
    %c4_143 = arith.constant 4 : index
    %c0_144 = arith.constant 0 : index
    %c0_145 = arith.constant 0 : index
    %117 = vector.load %arg1[%c1_142, %c4_143, %c0_144, %c0_145] : memref<4x9x8x144xf32, #tpu.memory_space<vmem>>, vector<1x1x8x144xf32>
    %118 = vector.shape_cast %117 : vector<1x1x8x144xf32> to vector<8x144xf32>
    %c0_146 = arith.constant 0 : index
    %c0_147 = arith.constant 0 : index
    %119 = vector.load %arg2[%c0_146, %c0_147] : memref<144x64xf32, #tpu.memory_space<vmem>>, vector<144x64xf32>
    %cst_148 = arith.constant dense<0.000000e+00> : vector<8x64xf32>
    %120 = tpu.matmul %118, %119, %cst_148 {dimension_numbers = #tpu.dot_dimension_numbers<[1], [0], [0], [1], [0, 0, 1, 1], [], []>} : vector<8x144xf32>, vector<144x64xf32>, vector<8x64xf32> -> vector<8x64xf32>
    %121 = arith.maximumf %116, %120 : vector<8x64xf32>
    %c2_149 = arith.constant 2 : index
    %c4_150 = arith.constant 4 : index
    %c0_151 = arith.constant 0 : index
    %c0_152 = arith.constant 0 : index
    %122 = vector.load %arg1[%c2_149, %c4_150, %c0_151, %c0_152] : memref<4x9x8x144xf32, #tpu.memory_space<vmem>>, vector<1x1x8x144xf32>
    %123 = vector.shape_cast %122 : vector<1x1x8x144xf32> to vector<8x144xf32>
    %c0_153 = arith.constant 0 : index
    %c0_154 = arith.constant 0 : index
    %124 = vector.load %arg2[%c0_153, %c0_154] : memref<144x64xf32, #tpu.memory_space<vmem>>, vector<144x64xf32>
    %cst_155 = arith.constant dense<0.000000e+00> : vector<8x64xf32>
    %125 = tpu.matmul %123, %124, %cst_155 {dimension_numbers = #tpu.dot_dimension_numbers<[1], [0], [0], [1], [0, 0, 1, 1], [], []>} : vector<8x144xf32>, vector<144x64xf32>, vector<8x64xf32> -> vector<8x64xf32>
    %126 = arith.maximumf %121, %125 : vector<8x64xf32>
    %c3_156 = arith.constant 3 : index
    %c4_157 = arith.constant 4 : index
    %c0_158 = arith.constant 0 : index
    %c0_159 = arith.constant 0 : index
    %127 = vector.load %arg1[%c3_156, %c4_157, %c0_158, %c0_159] : memref<4x9x8x144xf32, #tpu.memory_space<vmem>>, vector<1x1x8x144xf32>
    %128 = vector.shape_cast %127 : vector<1x1x8x144xf32> to vector<8x144xf32>
    %c0_160 = arith.constant 0 : index
    %c0_161 = arith.constant 0 : index
    %129 = vector.load %arg2[%c0_160, %c0_161] : memref<144x64xf32, #tpu.memory_space<vmem>>, vector<144x64xf32>
    %cst_162 = arith.constant dense<0.000000e+00> : vector<8x64xf32>
    %130 = tpu.matmul %128, %129, %cst_162 {dimension_numbers = #tpu.dot_dimension_numbers<[1], [0], [0], [1], [0, 0, 1, 1], [], []>} : vector<8x144xf32>, vector<144x64xf32>, vector<8x64xf32> -> vector<8x64xf32>
    %131 = arith.maximumf %126, %130 : vector<8x64xf32>
    %c0_163 = arith.constant 0 : index
    %c0_164 = arith.constant 0 : index
    %132 = vector.load %arg3[%c0_163, %c0_164] : memref<1x64xf32, #tpu.memory_space<vmem>>, vector<1x64xf32>
    %133 = vector.broadcast %132 : vector<1x64xf32> to vector<8x64xf32>
    %134 = arith.addf %131, %133 : vector<8x64xf32>
    %cst_165 = arith.constant 0.000000e+00 : f32
    %135 = vector.broadcast %cst_165 : f32 to vector<8x64xf32>
    %136 = arith.maximumf %134, %135 : vector<8x64xf32>
    %c4_166 = arith.constant 4 : index
    %c0_167 = arith.constant 0 : index
    %c0_168 = arith.constant 0 : index
    %137 = vector.load %arg4[%c4_166, %c0_167, %c0_168] : memref<9x64x128xf32, #tpu.memory_space<vmem>>, vector<1x64x128xf32>
    %138 = vector.shape_cast %137 : vector<1x64x128xf32> to vector<64x128xf32>
    %cst_169 = arith.constant dense<0.000000e+00> : vector<8x128xf32>
    %139 = tpu.matmul %136, %138, %cst_169 {dimension_numbers = #tpu.dot_dimension_numbers<[1], [0], [0], [1], [0, 0, 1, 1], [], []>} : vector<8x64xf32>, vector<64x128xf32>, vector<8x128xf32> -> vector<8x128xf32>
    %140 = arith.addf %112, %139 : vector<8x128xf32>
    %c0_170 = arith.constant 0 : index
    %c5 = arith.constant 5 : index
    %c0_171 = arith.constant 0 : index
    %c0_172 = arith.constant 0 : index
    %141 = vector.load %arg1[%c0_170, %c5, %c0_171, %c0_172] : memref<4x9x8x144xf32, #tpu.memory_space<vmem>>, vector<1x1x8x144xf32>
    %142 = vector.shape_cast %141 : vector<1x1x8x144xf32> to vector<8x144xf32>
    %c0_173 = arith.constant 0 : index
    %c0_174 = arith.constant 0 : index
    %143 = vector.load %arg2[%c0_173, %c0_174] : memref<144x64xf32, #tpu.memory_space<vmem>>, vector<144x64xf32>
    %cst_175 = arith.constant dense<0.000000e+00> : vector<8x64xf32>
    %144 = tpu.matmul %142, %143, %cst_175 {dimension_numbers = #tpu.dot_dimension_numbers<[1], [0], [0], [1], [0, 0, 1, 1], [], []>} : vector<8x144xf32>, vector<144x64xf32>, vector<8x64xf32> -> vector<8x64xf32>
    %c1_176 = arith.constant 1 : index
    %c5_177 = arith.constant 5 : index
    %c0_178 = arith.constant 0 : index
    %c0_179 = arith.constant 0 : index
    %145 = vector.load %arg1[%c1_176, %c5_177, %c0_178, %c0_179] : memref<4x9x8x144xf32, #tpu.memory_space<vmem>>, vector<1x1x8x144xf32>
    %146 = vector.shape_cast %145 : vector<1x1x8x144xf32> to vector<8x144xf32>
    %c0_180 = arith.constant 0 : index
    %c0_181 = arith.constant 0 : index
    %147 = vector.load %arg2[%c0_180, %c0_181] : memref<144x64xf32, #tpu.memory_space<vmem>>, vector<144x64xf32>
    %cst_182 = arith.constant dense<0.000000e+00> : vector<8x64xf32>
    %148 = tpu.matmul %146, %147, %cst_182 {dimension_numbers = #tpu.dot_dimension_numbers<[1], [0], [0], [1], [0, 0, 1, 1], [], []>} : vector<8x144xf32>, vector<144x64xf32>, vector<8x64xf32> -> vector<8x64xf32>
    %149 = arith.maximumf %144, %148 : vector<8x64xf32>
    %c2_183 = arith.constant 2 : index
    %c5_184 = arith.constant 5 : index
    %c0_185 = arith.constant 0 : index
    %c0_186 = arith.constant 0 : index
    %150 = vector.load %arg1[%c2_183, %c5_184, %c0_185, %c0_186] : memref<4x9x8x144xf32, #tpu.memory_space<vmem>>, vector<1x1x8x144xf32>
    %151 = vector.shape_cast %150 : vector<1x1x8x144xf32> to vector<8x144xf32>
    %c0_187 = arith.constant 0 : index
    %c0_188 = arith.constant 0 : index
    %152 = vector.load %arg2[%c0_187, %c0_188] : memref<144x64xf32, #tpu.memory_space<vmem>>, vector<144x64xf32>
    %cst_189 = arith.constant dense<0.000000e+00> : vector<8x64xf32>
    %153 = tpu.matmul %151, %152, %cst_189 {dimension_numbers = #tpu.dot_dimension_numbers<[1], [0], [0], [1], [0, 0, 1, 1], [], []>} : vector<8x144xf32>, vector<144x64xf32>, vector<8x64xf32> -> vector<8x64xf32>
    %154 = arith.maximumf %149, %153 : vector<8x64xf32>
    %c3_190 = arith.constant 3 : index
    %c5_191 = arith.constant 5 : index
    %c0_192 = arith.constant 0 : index
    %c0_193 = arith.constant 0 : index
    %155 = vector.load %arg1[%c3_190, %c5_191, %c0_192, %c0_193] : memref<4x9x8x144xf32, #tpu.memory_space<vmem>>, vector<1x1x8x144xf32>
    %156 = vector.shape_cast %155 : vector<1x1x8x144xf32> to vector<8x144xf32>
    %c0_194 = arith.constant 0 : index
    %c0_195 = arith.constant 0 : index
    %157 = vector.load %arg2[%c0_194, %c0_195] : memref<144x64xf32, #tpu.memory_space<vmem>>, vector<144x64xf32>
    %cst_196 = arith.constant dense<0.000000e+00> : vector<8x64xf32>
    %158 = tpu.matmul %156, %157, %cst_196 {dimension_numbers = #tpu.dot_dimension_numbers<[1], [0], [0], [1], [0, 0, 1, 1], [], []>} : vector<8x144xf32>, vector<144x64xf32>, vector<8x64xf32> -> vector<8x64xf32>
    %159 = arith.maximumf %154, %158 : vector<8x64xf32>
    %c0_197 = arith.constant 0 : index
    %c0_198 = arith.constant 0 : index
    %160 = vector.load %arg3[%c0_197, %c0_198] : memref<1x64xf32, #tpu.memory_space<vmem>>, vector<1x64xf32>
    %161 = vector.broadcast %160 : vector<1x64xf32> to vector<8x64xf32>
    %162 = arith.addf %159, %161 : vector<8x64xf32>
    %cst_199 = arith.constant 0.000000e+00 : f32
    %163 = vector.broadcast %cst_199 : f32 to vector<8x64xf32>
    %164 = arith.maximumf %162, %163 : vector<8x64xf32>
    %c5_200 = arith.constant 5 : index
    %c0_201 = arith.constant 0 : index
    %c0_202 = arith.constant 0 : index
    %165 = vector.load %arg4[%c5_200, %c0_201, %c0_202] : memref<9x64x128xf32, #tpu.memory_space<vmem>>, vector<1x64x128xf32>
    %166 = vector.shape_cast %165 : vector<1x64x128xf32> to vector<64x128xf32>
    %cst_203 = arith.constant dense<0.000000e+00> : vector<8x128xf32>
    %167 = tpu.matmul %164, %166, %cst_203 {dimension_numbers = #tpu.dot_dimension_numbers<[1], [0], [0], [1], [0, 0, 1, 1], [], []>} : vector<8x64xf32>, vector<64x128xf32>, vector<8x128xf32> -> vector<8x128xf32>
    %168 = arith.addf %140, %167 : vector<8x128xf32>
    %c0_204 = arith.constant 0 : index
    %c6 = arith.constant 6 : index
    %c0_205 = arith.constant 0 : index
    %c0_206 = arith.constant 0 : index
    %169 = vector.load %arg1[%c0_204, %c6, %c0_205, %c0_206] : memref<4x9x8x144xf32, #tpu.memory_space<vmem>>, vector<1x1x8x144xf32>
    %170 = vector.shape_cast %169 : vector<1x1x8x144xf32> to vector<8x144xf32>
    %c0_207 = arith.constant 0 : index
    %c0_208 = arith.constant 0 : index
    %171 = vector.load %arg2[%c0_207, %c0_208] : memref<144x64xf32, #tpu.memory_space<vmem>>, vector<144x64xf32>
    %cst_209 = arith.constant dense<0.000000e+00> : vector<8x64xf32>
    %172 = tpu.matmul %170, %171, %cst_209 {dimension_numbers = #tpu.dot_dimension_numbers<[1], [0], [0], [1], [0, 0, 1, 1], [], []>} : vector<8x144xf32>, vector<144x64xf32>, vector<8x64xf32> -> vector<8x64xf32>
    %c1_210 = arith.constant 1 : index
    %c6_211 = arith.constant 6 : index
    %c0_212 = arith.constant 0 : index
    %c0_213 = arith.constant 0 : index
    %173 = vector.load %arg1[%c1_210, %c6_211, %c0_212, %c0_213] : memref<4x9x8x144xf32, #tpu.memory_space<vmem>>, vector<1x1x8x144xf32>
    %174 = vector.shape_cast %173 : vector<1x1x8x144xf32> to vector<8x144xf32>
    %c0_214 = arith.constant 0 : index
    %c0_215 = arith.constant 0 : index
    %175 = vector.load %arg2[%c0_214, %c0_215] : memref<144x64xf32, #tpu.memory_space<vmem>>, vector<144x64xf32>
    %cst_216 = arith.constant dense<0.000000e+00> : vector<8x64xf32>
    %176 = tpu.matmul %174, %175, %cst_216 {dimension_numbers = #tpu.dot_dimension_numbers<[1], [0], [0], [1], [0, 0, 1, 1], [], []>} : vector<8x144xf32>, vector<144x64xf32>, vector<8x64xf32> -> vector<8x64xf32>
    %177 = arith.maximumf %172, %176 : vector<8x64xf32>
    %c2_217 = arith.constant 2 : index
    %c6_218 = arith.constant 6 : index
    %c0_219 = arith.constant 0 : index
    %c0_220 = arith.constant 0 : index
    %178 = vector.load %arg1[%c2_217, %c6_218, %c0_219, %c0_220] : memref<4x9x8x144xf32, #tpu.memory_space<vmem>>, vector<1x1x8x144xf32>
    %179 = vector.shape_cast %178 : vector<1x1x8x144xf32> to vector<8x144xf32>
    %c0_221 = arith.constant 0 : index
    %c0_222 = arith.constant 0 : index
    %180 = vector.load %arg2[%c0_221, %c0_222] : memref<144x64xf32, #tpu.memory_space<vmem>>, vector<144x64xf32>
    %cst_223 = arith.constant dense<0.000000e+00> : vector<8x64xf32>
    %181 = tpu.matmul %179, %180, %cst_223 {dimension_numbers = #tpu.dot_dimension_numbers<[1], [0], [0], [1], [0, 0, 1, 1], [], []>} : vector<8x144xf32>, vector<144x64xf32>, vector<8x64xf32> -> vector<8x64xf32>
    %182 = arith.maximumf %177, %181 : vector<8x64xf32>
    %c3_224 = arith.constant 3 : index
    %c6_225 = arith.constant 6 : index
    %c0_226 = arith.constant 0 : index
    %c0_227 = arith.constant 0 : index
    %183 = vector.load %arg1[%c3_224, %c6_225, %c0_226, %c0_227] : memref<4x9x8x144xf32, #tpu.memory_space<vmem>>, vector<1x1x8x144xf32>
    %184 = vector.shape_cast %183 : vector<1x1x8x144xf32> to vector<8x144xf32>
    %c0_228 = arith.constant 0 : index
    %c0_229 = arith.constant 0 : index
    %185 = vector.load %arg2[%c0_228, %c0_229] : memref<144x64xf32, #tpu.memory_space<vmem>>, vector<144x64xf32>
    %cst_230 = arith.constant dense<0.000000e+00> : vector<8x64xf32>
    %186 = tpu.matmul %184, %185, %cst_230 {dimension_numbers = #tpu.dot_dimension_numbers<[1], [0], [0], [1], [0, 0, 1, 1], [], []>} : vector<8x144xf32>, vector<144x64xf32>, vector<8x64xf32> -> vector<8x64xf32>
    %187 = arith.maximumf %182, %186 : vector<8x64xf32>
    %c0_231 = arith.constant 0 : index
    %c0_232 = arith.constant 0 : index
    %188 = vector.load %arg3[%c0_231, %c0_232] : memref<1x64xf32, #tpu.memory_space<vmem>>, vector<1x64xf32>
    %189 = vector.broadcast %188 : vector<1x64xf32> to vector<8x64xf32>
    %190 = arith.addf %187, %189 : vector<8x64xf32>
    %cst_233 = arith.constant 0.000000e+00 : f32
    %191 = vector.broadcast %cst_233 : f32 to vector<8x64xf32>
    %192 = arith.maximumf %190, %191 : vector<8x64xf32>
    %c6_234 = arith.constant 6 : index
    %c0_235 = arith.constant 0 : index
    %c0_236 = arith.constant 0 : index
    %193 = vector.load %arg4[%c6_234, %c0_235, %c0_236] : memref<9x64x128xf32, #tpu.memory_space<vmem>>, vector<1x64x128xf32>
    %194 = vector.shape_cast %193 : vector<1x64x128xf32> to vector<64x128xf32>
    %cst_237 = arith.constant dense<0.000000e+00> : vector<8x128xf32>
    %195 = tpu.matmul %192, %194, %cst_237 {dimension_numbers = #tpu.dot_dimension_numbers<[1], [0], [0], [1], [0, 0, 1, 1], [], []>} : vector<8x64xf32>, vector<64x128xf32>, vector<8x128xf32> -> vector<8x128xf32>
    %196 = arith.addf %168, %195 : vector<8x128xf32>
    %c0_238 = arith.constant 0 : index
    %c7 = arith.constant 7 : index
    %c0_239 = arith.constant 0 : index
    %c0_240 = arith.constant 0 : index
    %197 = vector.load %arg1[%c0_238, %c7, %c0_239, %c0_240] : memref<4x9x8x144xf32, #tpu.memory_space<vmem>>, vector<1x1x8x144xf32>
    %198 = vector.shape_cast %197 : vector<1x1x8x144xf32> to vector<8x144xf32>
    %c0_241 = arith.constant 0 : index
    %c0_242 = arith.constant 0 : index
    %199 = vector.load %arg2[%c0_241, %c0_242] : memref<144x64xf32, #tpu.memory_space<vmem>>, vector<144x64xf32>
    %cst_243 = arith.constant dense<0.000000e+00> : vector<8x64xf32>
    %200 = tpu.matmul %198, %199, %cst_243 {dimension_numbers = #tpu.dot_dimension_numbers<[1], [0], [0], [1], [0, 0, 1, 1], [], []>} : vector<8x144xf32>, vector<144x64xf32>, vector<8x64xf32> -> vector<8x64xf32>
    %c1_244 = arith.constant 1 : index
    %c7_245 = arith.constant 7 : index
    %c0_246 = arith.constant 0 : index
    %c0_247 = arith.constant 0 : index
    %201 = vector.load %arg1[%c1_244, %c7_245, %c0_246, %c0_247] : memref<4x9x8x144xf32, #tpu.memory_space<vmem>>, vector<1x1x8x144xf32>
    %202 = vector.shape_cast %201 : vector<1x1x8x144xf32> to vector<8x144xf32>
    %c0_248 = arith.constant 0 : index
    %c0_249 = arith.constant 0 : index
    %203 = vector.load %arg2[%c0_248, %c0_249] : memref<144x64xf32, #tpu.memory_space<vmem>>, vector<144x64xf32>
    %cst_250 = arith.constant dense<0.000000e+00> : vector<8x64xf32>
    %204 = tpu.matmul %202, %203, %cst_250 {dimension_numbers = #tpu.dot_dimension_numbers<[1], [0], [0], [1], [0, 0, 1, 1], [], []>} : vector<8x144xf32>, vector<144x64xf32>, vector<8x64xf32> -> vector<8x64xf32>
    %205 = arith.maximumf %200, %204 : vector<8x64xf32>
    %c2_251 = arith.constant 2 : index
    %c7_252 = arith.constant 7 : index
    %c0_253 = arith.constant 0 : index
    %c0_254 = arith.constant 0 : index
    %206 = vector.load %arg1[%c2_251, %c7_252, %c0_253, %c0_254] : memref<4x9x8x144xf32, #tpu.memory_space<vmem>>, vector<1x1x8x144xf32>
    %207 = vector.shape_cast %206 : vector<1x1x8x144xf32> to vector<8x144xf32>
    %c0_255 = arith.constant 0 : index
    %c0_256 = arith.constant 0 : index
    %208 = vector.load %arg2[%c0_255, %c0_256] : memref<144x64xf32, #tpu.memory_space<vmem>>, vector<144x64xf32>
    %cst_257 = arith.constant dense<0.000000e+00> : vector<8x64xf32>
    %209 = tpu.matmul %207, %208, %cst_257 {dimension_numbers = #tpu.dot_dimension_numbers<[1], [0], [0], [1], [0, 0, 1, 1], [], []>} : vector<8x144xf32>, vector<144x64xf32>, vector<8x64xf32> -> vector<8x64xf32>
    %210 = arith.maximumf %205, %209 : vector<8x64xf32>
    %c3_258 = arith.constant 3 : index
    %c7_259 = arith.constant 7 : index
    %c0_260 = arith.constant 0 : index
    %c0_261 = arith.constant 0 : index
    %211 = vector.load %arg1[%c3_258, %c7_259, %c0_260, %c0_261] : memref<4x9x8x144xf32, #tpu.memory_space<vmem>>, vector<1x1x8x144xf32>
    %212 = vector.shape_cast %211 : vector<1x1x8x144xf32> to vector<8x144xf32>
    %c0_262 = arith.constant 0 : index
    %c0_263 = arith.constant 0 : index
    %213 = vector.load %arg2[%c0_262, %c0_263] : memref<144x64xf32, #tpu.memory_space<vmem>>, vector<144x64xf32>
    %cst_264 = arith.constant dense<0.000000e+00> : vector<8x64xf32>
    %214 = tpu.matmul %212, %213, %cst_264 {dimension_numbers = #tpu.dot_dimension_numbers<[1], [0], [0], [1], [0, 0, 1, 1], [], []>} : vector<8x144xf32>, vector<144x64xf32>, vector<8x64xf32> -> vector<8x64xf32>
    %215 = arith.maximumf %210, %214 : vector<8x64xf32>
    %c0_265 = arith.constant 0 : index
    %c0_266 = arith.constant 0 : index
    %216 = vector.load %arg3[%c0_265, %c0_266] : memref<1x64xf32, #tpu.memory_space<vmem>>, vector<1x64xf32>
    %217 = vector.broadcast %216 : vector<1x64xf32> to vector<8x64xf32>
    %218 = arith.addf %215, %217 : vector<8x64xf32>
    %cst_267 = arith.constant 0.000000e+00 : f32
    %219 = vector.broadcast %cst_267 : f32 to vector<8x64xf32>
    %220 = arith.maximumf %218, %219 : vector<8x64xf32>
    %c7_268 = arith.constant 7 : index
    %c0_269 = arith.constant 0 : index
    %c0_270 = arith.constant 0 : index
    %221 = vector.load %arg4[%c7_268, %c0_269, %c0_270] : memref<9x64x128xf32, #tpu.memory_space<vmem>>, vector<1x64x128xf32>
    %222 = vector.shape_cast %221 : vector<1x64x128xf32> to vector<64x128xf32>
    %cst_271 = arith.constant dense<0.000000e+00> : vector<8x128xf32>
    %223 = tpu.matmul %220, %222, %cst_271 {dimension_numbers = #tpu.dot_dimension_numbers<[1], [0], [0], [1], [0, 0, 1, 1], [], []>} : vector<8x64xf32>, vector<64x128xf32>, vector<8x128xf32> -> vector<8x128xf32>
    %224 = arith.addf %196, %223 : vector<8x128xf32>
    %c0_272 = arith.constant 0 : index
    %c8 = arith.constant 8 : index
    %c0_273 = arith.constant 0 : index
    %c0_274 = arith.constant 0 : index
    %225 = vector.load %arg1[%c0_272, %c8, %c0_273, %c0_274] : memref<4x9x8x144xf32, #tpu.memory_space<vmem>>, vector<1x1x8x144xf32>
    %226 = vector.shape_cast %225 : vector<1x1x8x144xf32> to vector<8x144xf32>
    %c0_275 = arith.constant 0 : index
    %c0_276 = arith.constant 0 : index
    %227 = vector.load %arg2[%c0_275, %c0_276] : memref<144x64xf32, #tpu.memory_space<vmem>>, vector<144x64xf32>
    %cst_277 = arith.constant dense<0.000000e+00> : vector<8x64xf32>
    %228 = tpu.matmul %226, %227, %cst_277 {dimension_numbers = #tpu.dot_dimension_numbers<[1], [0], [0], [1], [0, 0, 1, 1], [], []>} : vector<8x144xf32>, vector<144x64xf32>, vector<8x64xf32> -> vector<8x64xf32>
    %c1_278 = arith.constant 1 : index
    %c8_279 = arith.constant 8 : index
    %c0_280 = arith.constant 0 : index
    %c0_281 = arith.constant 0 : index
    %229 = vector.load %arg1[%c1_278, %c8_279, %c0_280, %c0_281] : memref<4x9x8x144xf32, #tpu.memory_space<vmem>>, vector<1x1x8x144xf32>
    %230 = vector.shape_cast %229 : vector<1x1x8x144xf32> to vector<8x144xf32>
    %c0_282 = arith.constant 0 : index
    %c0_283 = arith.constant 0 : index
    %231 = vector.load %arg2[%c0_282, %c0_283] : memref<144x64xf32, #tpu.memory_space<vmem>>, vector<144x64xf32>
    %cst_284 = arith.constant dense<0.000000e+00> : vector<8x64xf32>
    %232 = tpu.matmul %230, %231, %cst_284 {dimension_numbers = #tpu.dot_dimension_numbers<[1], [0], [0], [1], [0, 0, 1, 1], [], []>} : vector<8x144xf32>, vector<144x64xf32>, vector<8x64xf32> -> vector<8x64xf32>
    %233 = arith.maximumf %228, %232 : vector<8x64xf32>
    %c2_285 = arith.constant 2 : index
    %c8_286 = arith.constant 8 : index
    %c0_287 = arith.constant 0 : index
    %c0_288 = arith.constant 0 : index
    %234 = vector.load %arg1[%c2_285, %c8_286, %c0_287, %c0_288] : memref<4x9x8x144xf32, #tpu.memory_space<vmem>>, vector<1x1x8x144xf32>
    %235 = vector.shape_cast %234 : vector<1x1x8x144xf32> to vector<8x144xf32>
    %c0_289 = arith.constant 0 : index
    %c0_290 = arith.constant 0 : index
    %236 = vector.load %arg2[%c0_289, %c0_290] : memref<144x64xf32, #tpu.memory_space<vmem>>, vector<144x64xf32>
    %cst_291 = arith.constant dense<0.000000e+00> : vector<8x64xf32>
    %237 = tpu.matmul %235, %236, %cst_291 {dimension_numbers = #tpu.dot_dimension_numbers<[1], [0], [0], [1], [0, 0, 1, 1], [], []>} : vector<8x144xf32>, vector<144x64xf32>, vector<8x64xf32> -> vector<8x64xf32>
    %238 = arith.maximumf %233, %237 : vector<8x64xf32>
    %c3_292 = arith.constant 3 : index
    %c8_293 = arith.constant 8 : index
    %c0_294 = arith.constant 0 : index
    %c0_295 = arith.constant 0 : index
    %239 = vector.load %arg1[%c3_292, %c8_293, %c0_294, %c0_295] : memref<4x9x8x144xf32, #tpu.memory_space<vmem>>, vector<1x1x8x144xf32>
    %240 = vector.shape_cast %239 : vector<1x1x8x144xf32> to vector<8x144xf32>
    %c0_296 = arith.constant 0 : index
    %c0_297 = arith.constant 0 : index
    %241 = vector.load %arg2[%c0_296, %c0_297] : memref<144x64xf32, #tpu.memory_space<vmem>>, vector<144x64xf32>
    %cst_298 = arith.constant dense<0.000000e+00> : vector<8x64xf32>
    %242 = tpu.matmul %240, %241, %cst_298 {dimension_numbers = #tpu.dot_dimension_numbers<[1], [0], [0], [1], [0, 0, 1, 1], [], []>} : vector<8x144xf32>, vector<144x64xf32>, vector<8x64xf32> -> vector<8x64xf32>
    %243 = arith.maximumf %238, %242 : vector<8x64xf32>
    %c0_299 = arith.constant 0 : index
    %c0_300 = arith.constant 0 : index
    %244 = vector.load %arg3[%c0_299, %c0_300] : memref<1x64xf32, #tpu.memory_space<vmem>>, vector<1x64xf32>
    %245 = vector.broadcast %244 : vector<1x64xf32> to vector<8x64xf32>
    %246 = arith.addf %243, %245 : vector<8x64xf32>
    %cst_301 = arith.constant 0.000000e+00 : f32
    %247 = vector.broadcast %cst_301 : f32 to vector<8x64xf32>
    %248 = arith.maximumf %246, %247 : vector<8x64xf32>
    %c8_302 = arith.constant 8 : index
    %c0_303 = arith.constant 0 : index
    %c0_304 = arith.constant 0 : index
    %249 = vector.load %arg4[%c8_302, %c0_303, %c0_304] : memref<9x64x128xf32, #tpu.memory_space<vmem>>, vector<1x64x128xf32>
    %250 = vector.shape_cast %249 : vector<1x64x128xf32> to vector<64x128xf32>
    %cst_305 = arith.constant dense<0.000000e+00> : vector<8x128xf32>
    %251 = tpu.matmul %248, %250, %cst_305 {dimension_numbers = #tpu.dot_dimension_numbers<[1], [0], [0], [1], [0, 0, 1, 1], [], []>} : vector<8x64xf32>, vector<64x128xf32>, vector<8x128xf32> -> vector<8x128xf32>
    %252 = arith.addf %224, %251 : vector<8x128xf32>
    %c0_306 = arith.constant 0 : index
    %c0_307 = arith.constant 0 : index
    %253 = vector.load %arg5[%c0_306, %c0_307] : memref<1x128xf32, #tpu.memory_space<vmem>>, vector<1x128xf32>
    %254 = vector.broadcast %253 : vector<1x128xf32> to vector<8x128xf32>
    %255 = arith.addf %252, %254 : vector<8x128xf32>
    %cst_308 = arith.constant 0.000000e+00 : f32
    %256 = vector.broadcast %cst_308 : f32 to vector<8x128xf32>
    %257 = arith.maximumf %255, %256 : vector<8x128xf32>
    %c0_309 = arith.constant 0 : index
    %c0_310 = arith.constant 0 : index
    %258 = vector.load %arg6[%c0_309, %c0_310] : memref<128x64xf32, #tpu.memory_space<vmem>>, vector<128x64xf32>
    %cst_311 = arith.constant dense<0.000000e+00> : vector<8x64xf32>
    %259 = tpu.matmul %257, %258, %cst_311 {dimension_numbers = #tpu.dot_dimension_numbers<[1], [0], [0], [1], [0, 0, 1, 1], [], []>} : vector<8x128xf32>, vector<128x64xf32>, vector<8x64xf32> -> vector<8x64xf32>
    %c0_312 = arith.constant 0 : index
    %c0_313 = arith.constant 0 : index
    %260 = vector.load %arg7[%c0_312, %c0_313] : memref<1x64xf32, #tpu.memory_space<vmem>>, vector<1x64xf32>
    %261 = vector.broadcast %260 : vector<1x64xf32> to vector<8x64xf32>
    %262 = arith.addf %259, %261 : vector<8x64xf32>
    %cst_314 = arith.constant 0.000000e+00 : f32
    %263 = vector.broadcast %cst_314 : f32 to vector<8x64xf32>
    %264 = arith.maximumf %262, %263 : vector<8x64xf32>
    %c0_315 = arith.constant 0 : index
    %c0_316 = arith.constant 0 : index
    %265 = vector.load %arg8[%c0_315, %c0_316] : memref<64x2xf32, #tpu.memory_space<vmem>>, vector<64x2xf32>
    %cst_317 = arith.constant dense<0.000000e+00> : vector<8x2xf32>
    %266 = tpu.matmul %264, %265, %cst_317 {dimension_numbers = #tpu.dot_dimension_numbers<[1], [0], [0], [1], [0, 0, 1, 1], [], []>} : vector<8x64xf32>, vector<64x2xf32>, vector<8x2xf32> -> vector<8x2xf32>
    %c0_318 = arith.constant 0 : index
    %c0_319 = arith.constant 0 : index
    %267 = vector.load %arg9[%c0_318, %c0_319] : memref<1x2xf32, #tpu.memory_space<vmem>>, vector<1x2xf32>
    %268 = vector.broadcast %267 : vector<1x2xf32> to vector<8x2xf32>
    %269 = arith.addf %266, %268 : vector<8x2xf32>
    %c0_320 = arith.constant 0 : index
    %c0_321 = arith.constant 0 : index
    %270 = vector.load %arg10[%c0_320, %c0_321] : memref<8x2xf32, #tpu.memory_space<vmem>>, vector<8x2xf32>
    tpu.vector_store %arg10[%c0_320, %c0_321], %269 {strides = array<i32>} : memref<8x2xf32, #tpu.memory_space<vmem>>, vector<8x2xf32>,
    return
  }
  func.func @transform_0(%arg0: i32) -> (i32, i32, i32, i32) {
    %c0_i32 = arith.constant 0 : i32
    %c0_i32_0 = arith.constant 0 : i32
    %c0_i32_1 = arith.constant 0 : i32
    %c0_i32_2 = arith.constant 0 : i32
    return %c0_i32, %c0_i32_0, %arg0, %c0_i32_1 : i32, i32, i32, i32
  }
  func.func @transform_1(%arg0: i32) -> (i32, i32) {
    %c0_i32 = arith.constant 0 : i32
    %c0_i32_0 = arith.constant 0 : i32
    %c0_i32_1 = arith.constant 0 : i32
    return %c0_i32, %c0_i32_0 : i32, i32
  }
  func.func @transform_2(%arg0: i32) -> (i32, i32) {
    %c0_i32 = arith.constant 0 : i32
    %c0_i32_0 = arith.constant 0 : i32
    %c0_i32_1 = arith.constant 0 : i32
    return %c0_i32, %c0_i32_0 : i32, i32
  }
  func.func @transform_3(%arg0: i32) -> (i32, i32, i32) {
    %c0_i32 = arith.constant 0 : i32
    %c0_i32_0 = arith.constant 0 : i32
    %c0_i32_1 = arith.constant 0 : i32
    %c0_i32_2 = arith.constant 0 : i32
    return %c0_i32, %c0_i32_0, %c0_i32_1 : i32, i32, i32
  }
  func.func @transform_4(%arg0: i32) -> (i32, i32) {
    %c0_i32 = arith.constant 0 : i32
    %c0_i32_0 = arith.constant 0 : i32
    %c0_i32_1 = arith.constant 0 : i32
    return %c0_i32, %c0_i32_0 : i32, i32
  }
  func.func @transform_5(%arg0: i32) -> (i32, i32) {
    %c0_i32 = arith.constant 0 : i32
    %c0_i32_0 = arith.constant 0 : i32
    %c0_i32_1 = arith.constant 0 : i32
    return %c0_i32, %c0_i32_0 : i32, i32
  }
  func.func @transform_6(%arg0: i32) -> (i32, i32) {
    %c0_i32 = arith.constant 0 : i32
    %c0_i32_0 = arith.constant 0 : i32
    %c0_i32_1 = arith.constant 0 : i32
    return %c0_i32, %c0_i32_0 : i32, i32
  }
  func.func @transform_7(%arg0: i32) -> (i32, i32) {
    %c0_i32 = arith.constant 0 : i32
    %c0_i32_0 = arith.constant 0 : i32
    %c0_i32_1 = arith.constant 0 : i32
    return %c0_i32, %c0_i32_0 : i32, i32
  }
  func.func @transform_8(%arg0: i32) -> (i32, i32) {
    %c0_i32 = arith.constant 0 : i32
    %c0_i32_0 = arith.constant 0 : i32
    %c0_i32_1 = arith.constant 0 : i32
    return %c0_i32, %c0_i32_0 : i32, i32
  }
  func.func @transform_9(%arg0: i32) -> (i32, i32) {
    %c0_i32 = arith.constant 0 : i32
    %c0_i32_0 = arith.constant 0 : i32
    return %arg0, %c0_i32 : i32, i32
  }
}

</mosaic_0001>

<bundles_post_ra>
// kernel: tile.8
= control target key start
LH: loop header
LB: loop body
LE: loop exit
PB: predicated region body
PF: predicated region fallthrough
CT: control target
= control target key end

     0   :  { %s22_s0 = inlined_call_operand.vmem [shape: f32[16], index: 0, kind: input, shape index: {}]   ;;  %s23_s1 = inlined_call_operand.vmem [shape: f32[8,16], index: 1, kind: output, shape index: {}]  }
   0x1   :  { %v4_v0 = vld [vmem:[%s22_s0] ss:$0 sm:$0xff] }
   0x2   :  { %5 = vst [vmem:[%s23_s1] sm:$0xff] %v4_v0 }

// kernel: tile.9
= control target key start
LH: loop header
LB: loop body
LE: loop exit
PB: predicated region body
PF: predicated region fallthrough
CT: control target
= control target key end

     0   :  { %s69_s10 = smov 112   ;;  %s70_s11 = smov 80   ;;  %vm3_vm0 = vcmask 130048   ;;  %vm9_vm1 = vcmask 1048448   ;;  %vm15_vm2 = vcmask 917248   ;;  %vm21_vm3 = vcmask 786048   ;;  %s113_s0 = inlined_call_operand.vmem [shape: f32[8,16], index: 0, kind: input, shape index: {}]   ;;  %s114_s1 = inlined_call_operand.vmem [shape: f32[1,128], index: 1, kind: output, shape index: {}]  }
   0x1   :  { %v55_v0 = vld [vmem:[%s113_s0 + $0x7] sm:$0x1]   ;;  %v57_v1 = vld [vmem:[%s113_s0 + $0x5] sm:$0x1]   ;;  %v56_v2 = vld [vmem:[%s113_s0 + $0x6] sm:$0x1]  }
   0x2   :  { %7 = vrot.lane.b32.xlu0 %v55_v0, %s69_s10  ;;  %19 = vrot.lane.b32.xlu1 %v57_v1, %s70_s11  ;;  %v58_v3 = vld [vmem:[%s113_s0 + $0x4] sm:$0x1]   ;;  %v2_v4 = vld [vmem:[%s113_s0] sm:$0x1]   ;;  %s71_s18 = smov 96   ;;  %s72_s19 = smov 64  }
   0x3   :  { %4 = vst.msk [vmem:[#allocation0] sm:$0x1] %vm3_vm0, %v2_v4   ;;  %v59_v5 = vld [vmem:[%s113_s0 + $0x3] sm:$0x1]   ;;  %v60_v6 = vld [vmem:[%s113_s0 + $0x2] sm:$0x1]  }
   0x4   :  { %s73_s24 = smov 48   ;;  %s74_s25 = smov 32   ;;  %v61_v7 = vld [vmem:[%s113_s0 + $0x1] sm:$0x1]   ;;  %vm27_vm4 = vcmask 654848   ;;  %vm33_vm5 = vcmask 523648  }
   0x5   :  { %s75_s0 = smov 16   ;;  %vm39_vm6 = vcmask 392448   ;;  %vm45_vm7 = vcmask 261248  }
   0x6   :  { %13 = vrot.lane.b32.xlu0 %v56_v2, %s71_s18  ;;  %25 = vrot.lane.b32.xlu1 %v58_v3, %s72_s19 }
   0xa   :  { %31 = vrot.lane.b32.xlu0 %v59_v5, %s73_s24  ;;  %37 = vrot.lane.b32.xlu1 %v60_v6, %s74_s25 }
   0xe   :  { %43 = vrot.lane.b32.xlu0 %v61_v7, %s75_s0 }
  0x74   :  { %v8_v8 = vpop.permute.xlu0 %7   ;;  %v20_v9 = vpop.permute.xlu1 %19  }
  0x75   :  { %10 = vst.msk [vmem:[#allocation0] sm:$0x1] %vm9_vm1, %v8_v8  }
  0x78   :  { %v14_v10 = vpop.permute.xlu0 %13   ;;  %v26_v11 = vpop.permute.xlu1 %25  }
  0x79   :  { %16 = vst.msk [vmem:[#allocation0] sm:$0x1] %vm15_vm2, %v14_v10  }
  0x7a   :  { %22 = vst.msk [vmem:[#allocation0] sm:$0x1] %vm21_vm3, %v20_v9  }
  0x7b   :  { %28 = vst.msk [vmem:[#allocation0] sm:$0x1] %vm27_vm4, %v26_v11  }
  0x7c   :  { %v32_v12 = vpop.permute.xlu0 %31   ;;  %v38_v13 = vpop.permute.xlu1 %37  }
  0x7d   :  { %34 = vst.msk [vmem:[#allocation0] sm:$0x1] %vm33_vm5, %v32_v12  }
  0x7e   :  { %40 = vst.msk [vmem:[#allocation0] sm:$0x1] %vm39_vm6, %v38_v13  }
  0x80   :  { %v44_v14 = vpop.permute.xlu0 %43  }
  0x81   :  { %46 = vst.msk [vmem:[#allocation0] sm:$0x1] %vm45_vm7, %v44_v14  }
  0x88   :  { %v51_v15 = vld [vmem:[#allocation0] sm:$0x1] }
  0x89   :  { %54 = vst [vmem:[%s114_s1] sm:$0x1] %v51_v15 }

// kernel: binary_cnn_forward.2
= control target key start
LH: loop header
LB: loop body
LE: loop exit
PB: predicated region body
PF: predicated region fallthrough
CT: control target
= control target key end

     0   :  { %vm31_vm0 = vcmask 588800   ;;  %s2562_s1 = inlined_call_operand.vmem [shape: f32[72,128], index: 1, kind: input, shape index: {}]   ;;  %s2563_s0 = inlined_call_operand.vmem [shape: f32[9,64,72], index: 0, kind: input, shape index: {}]   ;;  %s2564_s2 = inlined_call_operand.vmem [shape: f32[1,128], index: 2, kind: input, shape index: {}]   ;;  %s2565_s3 = inlined_call_operand.vmem [shape: f32[64,128], index: 3, kind: output, shape index: {}]  }
   0x1   :  { %v1965_v0 = vld [vmem:[%s2562_s1 + $0x40] sm:$0xff]  ;;  %v1970_v1 = vld [vmem:[%s2562_s1 + $0x38] sm:$0xff]  ;;  %v1979_v2 = vld [vmem:[%s2562_s1 + $0x30] sm:$0xff] }
   0x2   :  { %1654 = vmatprep.subr.mxu0 %v1965_v0  ;;  %1684 = vmatprep.subr.mxu1 %v1965_v0  ;;  %v1988_v3 = vld [vmem:[%s2562_s1 + $0x28] sm:$0xff]  ;;  %v1997_v4 = vld [vmem:[%s2562_s1 + $0x20] sm:$0xff]  ;;  %v2006_v5 = vld [vmem:[%s2562_s1 + $0x18] sm:$0xff] }
   0x3   :  { %1655 = vmatpush3.msra.mxu0 %v1965_v0  ;;  %1685 = vmatpush3.msra.mxu1 %v1965_v0  ;;  %v2015_v6 = vld [vmem:[%s2562_s1 + $0x10] sm:$0xff]  ;;  %v2024_v7 = vld [vmem:[%s2562_s1 + $0x8] sm:$0xff]  ;;  %v2033_v8 = vld [vmem:[%s2562_s1] sm:$0xff] }
   0x4   :  { %1656 = vmatprep.subr.mxu0 %v1970_v1  ;;  %1686 = vmatprep.subr.mxu1 %v1970_v1  ;;  %v14_v9 = vld [vmem:[%s2563_s0] sm:$0xff]  ;;  %v15_v11 = vld [vmem:[%s2563_s0 + $0x8] sm:$0xff]  ;;  %v16_v13 = vld [vmem:[%s2563_s0 + $0x10] sm:$0xff] }
   0x5   :  { %1657 = vmatpush3.msra.mxu0 %v1970_v1  ;;  %1687 = vmatpush3.msra.mxu1 %v1970_v1  ;;  %v1372_v10 = vld [vmem:[%s2563_s0 + $0x40] sm:$0xff]  ;;  %v1373_v12 = vld [vmem:[%s2563_s0 + $0x48] sm:$0xff]  ;;  %v1374_v14 = vld [vmem:[%s2563_s0 + $0x50] sm:$0xff] }
   0x6   :  { %1658 = vmatprep.subr.mxu0 %v1979_v2  ;;  %1688 = vmatprep.subr.mxu1 %v1979_v2  ;;  %v17_v15 = vld [vmem:[%s2563_s0 + $0x18] sm:$0xff]  ;;  %v18_v17 = vld [vmem:[%s2563_s0 + $0x20] sm:$0xff]  ;;  %v19_v19 = vld [vmem:[%s2563_s0 + $0x28] sm:$0xff] }
   0x7   :  { %1659 = vmatpush3.msra.mxu0 %v1979_v2  ;;  %1689 = vmatpush3.msra.mxu1 %v1979_v2  ;;  %v1375_v16 = vld [vmem:[%s2563_s0 + $0x58] sm:$0xff]  ;;  %v1376_v18 = vld [vmem:[%s2563_s0 + $0x60] sm:$0xff]  ;;  %v1377_v20 = vld [vmem:[%s2563_s0 + $0x68] sm:$0xff] }
   0x8   :  { %1660 = vmatprep.subr.mxu0 %v1988_v3  ;;  %1690 = vmatprep.subr.mxu1 %v1988_v3  ;;  %v20_v21 = vld [vmem:[%s2563_s0 + $0x30] sm:$0xff]  ;;  %v21_v23 = vld [vmem:[%s2563_s0 + $0x38] sm:$0xff]  ;;  %v1388_v25 = vld [vmem:[%s2563_s0 + $0x80] sm:$0xff] }
   0x9   :  { %1661 = vmatpush3.msra.mxu0 %v1988_v3  ;;  %1691 = vmatpush3.msra.mxu1 %v1988_v3  ;;  %v1378_v22 = vld [vmem:[%s2563_s0 + $0x70] sm:$0xff]  ;;  %v1379_v24 = vld [vmem:[%s2563_s0 + $0x78] sm:$0xff]  ;;  %v1404_v26 = vld [vmem:[%s2563_s0 + $0xc0] sm:$0xff] }
   0xa   :  { %1662 = vmatprep.subr.mxu0 %v1997_v4  ;;  %1692 = vmatprep.subr.mxu1 %v1997_v4  ;;  %v1389_v27 = vld [vmem:[%s2563_s0 + $0x88] sm:$0xff]  ;;  %v1390_v29 = vld [vmem:[%s2563_s0 + $0x90] sm:$0xff]  ;;  %v1391_v30 = vld [vmem:[%s2563_s0 + $0x98] sm:$0xff] }
   0xb   :  { %1663 = vmatpush3.msra.mxu0 %v1997_v4  ;;  %1693 = vmatpush3.msra.mxu1 %v1997_v4  ;;  %v1405_v28 = vld [vmem:[%s2563_s0 + $0xc8] sm:$0xff]  ;;  %v1406_v31 = vld [vmem:[%s2563_s0 + $0xd0] sm:$0xff]  ;;  %v1407_v32 = vld [vmem:[%s2563_s0 + $0xd8] sm:$0xff] }
   0xc   :  { %1664 = vmatprep.subr.mxu0 %v2006_v5  ;;  %1694 = vmatprep.subr.mxu1 %v2006_v5  ;;  %v1392_v33 = vld [vmem:[%s2563_s0 + $0xa0] sm:$0xff]  ;;  %v1393_v34 = vld [vmem:[%s2563_s0 + $0xa8] sm:$0xff]  ;;  %v1394_v37 = vld [vmem:[%s2563_s0 + $0xb0] sm:$0xff] }
   0xd   :  { %1665 = vmatpush3.msra.mxu0 %v2006_v5  ;;  %1695 = vmatpush3.msra.mxu1 %v2006_v5  ;;  %v1408_v35 = vld [vmem:[%s2563_s0 + $0xe0] sm:$0xff]  ;;  %v1409_v36 = vld [vmem:[%s2563_s0 + $0xe8] sm:$0xff]  ;;  %v1395_v38 = vld [vmem:[%s2563_s0 + $0xb8] sm:$0xff] }
   0xe   :  { %1666 = vmatprep.subr.mxu0 %v2015_v6  ;;  %1696 = vmatprep.subr.mxu1 %v2015_v6  ;;  %v1410_v39 = vld [vmem:[%s2563_s0 + $0xf0] sm:$0xff]  ;;  %v1411_v40 = vld [vmem:[%s2563_s0 + $0xf8] sm:$0xff]  ;;  %v1420_v41 = vld [vmem:[%s2563_s0 + $0x100] sm:$0xff] }
   0xf   :  { %1667 = vmatpush3.msra.mxu0 %v2015_v6  ;;  %1697 = vmatpush3.msra.mxu1 %v2015_v6  ;;  %v1436_v42 = vld [vmem:[%s2563_s0 + $0x140] sm:$0xff]  ;;  %v1421_v43 = vld [vmem:[%s2563_s0 + $0x108] sm:$0xff]  ;;  %v1422_v45 = vld [vmem:[%s2563_s0 + $0x110] sm:$0xff] }
  0x10   :  { %1668 = vmatprep.subr.mxu0 %v2024_v7  ;;  %1698 = vmatprep.subr.mxu1 %v2024_v7  ;;  %v1437_v44 = vld [vmem:[%s2563_s0 + $0x148] sm:$0xff]  ;;  %v1423_v46 = vld [vmem:[%s2563_s0 + $0x118] sm:$0xff]  ;;  %v1438_v47 = vld [vmem:[%s2563_s0 + $0x150] sm:$0xff] }
  0x11   :  { %1669 = vmatpush3.msra.mxu0 %v2024_v7  ;;  %1699 = vmatpush3.msra.mxu1 %v2024_v7  ;;  %v1439_v48 = vld [vmem:[%s2563_s0 + $0x158] sm:$0xff]  ;;  %v1424_v49 = vld [vmem:[%s2563_s0 + $0x120] sm:$0xff]  ;;  %v1425_v50 = vld [vmem:[%s2563_s0 + $0x128] sm:$0xff] }
  0x12   :  { %1670 = vmatprep.subr.mxu0 %v2033_v8  ;;  %1700 = vmatprep.subr.mxu1 %v2033_v8  ;;  %v1440_v51 = vld [vmem:[%s2563_s0 + $0x160] sm:$0xff]  ;;  %v1441_v52 = vld [vmem:[%s2563_s0 + $0x168] sm:$0xff]  ;;  %v1426_v53 = vld [vmem:[%s2563_s0 + $0x130] sm:$0xff] }
  0x13   :  { %1671 = vmatpush3.msra.mxu0 %v2033_v8  ;;  %1672 = vmatprep.mubr.msk.f32.mxu0 %vm31_vm0, %v14_v9  ;;  %v1427_v54 = vld [vmem:[%s2563_s0 + $0x138] sm:$0xff]  ;;  %v1442_v55 = vld [vmem:[%s2563_s0 + $0x170] sm:$0xff]  ;;  %v1452_v57 = vld [vmem:[%s2563_s0 + $0x180] sm:$0xff] }
  0x14   :  { %1701 = vmatpush3.msra.mxu1 %v2033_v8  ;;  %1702 = vmatprep.mubr.msk.f32.mxu1 %vm31_vm0, %v1372_v10  ;;  %v1443_v56 = vld [vmem:[%s2563_s0 + $0x178] sm:$0xff]  ;;  %v1468_v58 = vld [vmem:[%s2563_s0 + $0x1c0] sm:$0xff]  ;;  %v1453_v59 = vld [vmem:[%s2563_s0 + $0x188] sm:$0xff] }
  0x15   :  { %1673 = vmatmul.mubr.msk.f32.vlgmr.msra.gmra.mxu0 %vm31_vm0, %v15_v11  ;;  %1703 = vmatmul.mubr.msk.f32.vlgmr.msra.gmra.mxu1 %vm31_vm0, %v1373_v12  ;;  %v1469_v60 = vld [vmem:[%s2563_s0 + $0x1c8] sm:$0xff]  ;;  %v1454_v61 = vld [vmem:[%s2563_s0 + $0x190] sm:$0xff]  ;;  %v1455_v63 = vld [vmem:[%s2563_s0 + $0x198] sm:$0xff] }
  0x16   :  { %1714 = vmatprep.subr.mxu0 %v1965_v0  ;;  %1744 = vmatprep.subr.mxu1 %v1965_v0  ;;  %v1470_v62 = vld [vmem:[%s2563_s0 + $0x1d0] sm:$0xff]  ;;  %v1471_v9 = vld [vmem:[%s2563_s0 + $0x1d8] sm:$0xff]  ;;  %v1472_v10 = vld [vmem:[%s2563_s0 + $0x1e0] sm:$0xff] }
  0x17   :  { %1715 = vmatpush3.msra.mxu0 %v1965_v0  ;;  %1745 = vmatpush3.msra.mxu1 %v1965_v0  ;;  %v1473_v11 = vld [vmem:[%s2563_s0 + $0x1e8] sm:$0xff]  ;;  %v1474_v12 = vld [vmem:[%s2563_s0 + $0x1f0] sm:$0xff] }
  0x18   :  { %1716 = vmatprep.subr.mxu0 %v1970_v1  ;;  %1746 = vmatprep.subr.mxu1 %v1970_v1 }
  0x19   :  { %1717 = vmatpush3.msra.mxu0 %v1970_v1  ;;  %1747 = vmatpush3.msra.mxu1 %v1970_v1 }
  0x1a   :  { %1675 = vmatprep.mubr.msk.f32.mxu0 %vm31_vm0, %v16_v13  ;;  %1705 = vmatprep.mubr.msk.f32.mxu1 %vm31_vm0, %v1374_v14  ;;  %v1475_v13 = vld [vmem:[%s2563_s0 + $0x1f8] sm:$0xff]  ;;  %v1486_v14 = vld [vmem:[%s2563_s0 + $0x210] sm:$0xff] }
  0x1b   :  { %1718 = vmatprep.subr.mxu0 %v1979_v2  ;;  %1748 = vmatprep.subr.mxu1 %v1979_v2 }
  0x1c   :  { %1676 = vmatmul.mubr.msk.f32.gmra.mxu0 %vm31_vm0, %v17_v15  ;;  %1706 = vmatmul.mubr.msk.f32.gmra.mxu1 %vm31_vm0, %v1375_v16  ;;  %v1490_v15 = vld [vmem:[%s2563_s0 + $0x230] sm:$0xff]  ;;  %v1491_v16 = vld [vmem:[%s2563_s0 + $0x238] sm:$0xff] }
  0x1d   :  { %1719 = vmatpush3.msra.mxu0 %v1979_v2  ;;  %1749 = vmatpush3.msra.mxu1 %v1979_v2 }
  0x1e   :  { %1720 = vmatprep.subr.mxu0 %v1988_v3  ;;  %1750 = vmatprep.subr.mxu1 %v1988_v3 }
  0x1f   :  { %1721 = vmatpush3.msra.mxu0 %v1988_v3  ;;  %1751 = vmatpush3.msra.mxu1 %v1988_v3 }
  0x20   :  { %1678 = vmatprep.mubr.msk.f32.mxu0 %vm31_vm0, %v18_v17  ;;  %1708 = vmatprep.mubr.msk.f32.mxu1 %vm31_vm0, %v1376_v18 }
  0x21   :  { %1722 = vmatprep.subr.mxu0 %v1997_v4  ;;  %1752 = vmatprep.subr.mxu1 %v1997_v4 }
  0x22   :  { %1679 = vmatmul.mubr.msk.f32.gmra.mxu0 %vm31_vm0, %v19_v19  ;;  %1709 = vmatmul.mubr.msk.f32.gmra.mxu1 %vm31_vm0, %v1377_v20 }
  0x23   :  { %1723 = vmatpush3.msra.mxu0 %v1997_v4  ;;  %1753 = vmatpush3.msra.mxu1 %v1997_v4 }
  0x24   :  { %1724 = vmatprep.subr.mxu0 %v2006_v5  ;;  %1754 = vmatprep.subr.mxu1 %v2006_v5 }
  0x25   :  { %1725 = vmatpush3.msra.mxu0 %v2006_v5  ;;  %1755 = vmatpush3.msra.mxu1 %v2006_v5 }
  0x26   :  { %1681 = vmatprep.mubr.msk.f32.mxu0 %vm31_vm0, %v20_v21  ;;  %1711 = vmatprep.mubr.msk.f32.mxu1 %vm31_vm0, %v1378_v22 }
  0x27   :  { %1726 = vmatprep.subr.mxu0 %v2015_v6  ;;  %1756 = vmatprep.subr.mxu1 %v2015_v6 }
  0x28   :  { %1682 = vmatmul.mubr.msk.f32.gmra.mxu0 %vm31_vm0, %v21_v23  ;;  %1712 = vmatmul.mubr.msk.f32.gmra.mxu1 %vm31_vm0, %v1379_v24 }
  0x29   :  { %1727 = vmatpush3.msra.mxu0 %v2015_v6  ;;  %1757 = vmatpush3.msra.mxu1 %v2015_v6 }
  0x2a   :  { %1728 = vmatprep.subr.mxu0 %v2024_v7  ;;  %1758 = vmatprep.subr.mxu1 %v2024_v7 }
  0x2b   :  { %1729 = vmatpush3.msra.mxu0 %v2024_v7  ;;  %1759 = vmatpush3.msra.mxu1 %v2024_v7 }
  0x2c   :  { %1730 = vmatprep.subr.mxu0 %v2033_v8  ;;  %1760 = vmatprep.subr.mxu1 %v2033_v8 }
  0x2d   :  { %1731 = vmatpush3.msra.mxu0 %v2033_v8  ;;  %1732 = vmatprep.mubr.msk.f32.mxu0 %vm31_vm0, %v1388_v25 }
  0x2e   :  { %1761 = vmatpush3.msra.mxu1 %v2033_v8  ;;  %1762 = vmatprep.mubr.msk.f32.mxu1 %vm31_vm0, %v1404_v26 }
  0x2f   :  { %1733 = vmatmul.mubr.msk.f32.vlgmr.msra.gmra.mxu0 %vm31_vm0, %v1389_v27  ;;  %1763 = vmatmul.mubr.msk.f32.vlgmr.msra.gmra.mxu1 %vm31_vm0, %v1405_v28 }
  0x30   :  { %1774 = vmatprep.subr.mxu0 %v1965_v0  ;;  %1804 = vmatprep.subr.mxu1 %v1965_v0 }
  0x31   :  { %1775 = vmatpush3.msra.mxu0 %v1965_v0  ;;  %1805 = vmatpush3.msra.mxu1 %v1965_v0 }
  0x32   :  { %1776 = vmatprep.subr.mxu0 %v1970_v1  ;;  %1806 = vmatprep.subr.mxu1 %v1970_v1 }
  0x33   :  { %1735 = vmatprep.mubr.msk.f32.mxu0 %vm31_vm0, %v1390_v29  ;;  %1777 = vmatpush3.msra.mxu0 %v1970_v1 }
  0x34   :  { %1807 = vmatpush3.msra.mxu1 %v1970_v1  ;;  %1736 = vmatmul.mubr.msk.f32.gmra.mxu0 %vm31_vm0, %v1391_v30 }
  0x35   :  { %1765 = vmatprep.mubr.msk.f32.mxu1 %vm31_vm0, %v1406_v31  ;;  %1778 = vmatprep.subr.mxu0 %v1979_v2 }
  0x36   :  { %1808 = vmatprep.subr.mxu1 %v1979_v2  ;;  %1766 = vmatmul.mubr.msk.f32.gmra.mxu1 %vm31_vm0, %v1407_v32 }
  0x37   :  { %1779 = vmatpush3.msra.mxu0 %v1979_v2  ;;  %1809 = vmatpush3.msra.mxu1 %v1979_v2 }
  0x38   :  { %1780 = vmatprep.subr.mxu0 %v1988_v3  ;;  %1810 = vmatprep.subr.mxu1 %v1988_v3 }
  0x39   :  { %1738 = vmatprep.mubr.msk.f32.mxu0 %vm31_vm0, %v1392_v33  ;;  %1781 = vmatpush3.msra.mxu0 %v1988_v3 }
  0x3a   :  { %1811 = vmatpush3.msra.mxu1 %v1988_v3  ;;  %1739 = vmatmul.mubr.msk.f32.gmra.mxu0 %vm31_vm0, %v1393_v34 }
  0x3b   :  { %1768 = vmatprep.mubr.msk.f32.mxu1 %vm31_vm0, %v1408_v35  ;;  %1782 = vmatprep.subr.mxu0 %v1997_v4 }
  0x3c   :  { %1812 = vmatprep.subr.mxu1 %v1997_v4  ;;  %1769 = vmatmul.mubr.msk.f32.gmra.mxu1 %vm31_vm0, %v1409_v36 }
  0x3d   :  { %1783 = vmatpush3.msra.mxu0 %v1997_v4  ;;  %1813 = vmatpush3.msra.mxu1 %v1997_v4 }
  0x3e   :  { %1784 = vmatprep.subr.mxu0 %v2006_v5  ;;  %1814 = vmatprep.subr.mxu1 %v2006_v5 }
  0x3f   :  { %1741 = vmatprep.mubr.msk.f32.mxu0 %vm31_vm0, %v1394_v37  ;;  %1785 = vmatpush3.msra.mxu0 %v2006_v5 }
  0x40   :  { %1815 = vmatpush3.msra.mxu1 %v2006_v5  ;;  %1742 = vmatmul.mubr.msk.f32.gmra.mxu0 %vm31_vm0, %v1395_v38 }
  0x41   :  { %1771 = vmatprep.mubr.msk.f32.mxu1 %vm31_vm0, %v1410_v39  ;;  %1786 = vmatprep.subr.mxu0 %v2015_v6 }
  0x42   :  { %1816 = vmatprep.subr.mxu1 %v2015_v6  ;;  %1772 = vmatmul.mubr.msk.f32.gmra.mxu1 %vm31_vm0, %v1411_v40 }
  0x43   :  { %1787 = vmatpush3.msra.mxu0 %v2015_v6  ;;  %1817 = vmatpush3.msra.mxu1 %v2015_v6 }
  0x44   :  { %1788 = vmatprep.subr.mxu0 %v2024_v7  ;;  %1818 = vmatprep.subr.mxu1 %v2024_v7 }
  0x45   :  { %1789 = vmatpush3.msra.mxu0 %v2024_v7  ;;  %1819 = vmatpush3.msra.mxu1 %v2024_v7 }
  0x46   :  { %1790 = vmatprep.subr.mxu0 %v2033_v8  ;;  %1820 = vmatprep.subr.mxu1 %v2033_v8 }
  0x47   :  { %1791 = vmatpush3.msra.mxu0 %v2033_v8  ;;  %1792 = vmatprep.mubr.msk.f32.mxu0 %vm31_vm0, %v1420_v41 }
  0x48   :  { %1821 = vmatpush3.msra.mxu1 %v2033_v8  ;;  %1822 = vmatprep.mubr.msk.f32.mxu1 %vm31_vm0, %v1436_v42 }
  0x49   :  { %1793 = vmatmul.mubr.msk.f32.vlgmr.msra.gmra.mxu0 %vm31_vm0, %v1421_v43  ;;  %1823 = vmatmul.mubr.msk.f32.vlgmr.msra.gmra.mxu1 %vm31_vm0, %v1437_v44 }
  0x4a   :  { %1834 = vmatprep.subr.mxu0 %v1965_v0  ;;  %1864 = vmatprep.subr.mxu1 %v1965_v0 }
  0x4b   :  { %1835 = vmatpush3.msra.mxu0 %v1965_v0  ;;  %1865 = vmatpush3.msra.mxu1 %v1965_v0 }
  0x4c   :  { %1836 = vmatprep.subr.mxu0 %v1970_v1  ;;  %1866 = vmatprep.subr.mxu1 %v1970_v1 }
  0x4d   :  { %1795 = vmatprep.mubr.msk.f32.mxu0 %vm31_vm0, %v1422_v45  ;;  %1837 = vmatpush3.msra.mxu0 %v1970_v1 }
  0x4e   :  { %1867 = vmatpush3.msra.mxu1 %v1970_v1  ;;  %1796 = vmatmul.mubr.msk.f32.gmra.mxu0 %vm31_vm0, %v1423_v46 }
  0x4f   :  { %1825 = vmatprep.mubr.msk.f32.mxu1 %vm31_vm0, %v1438_v47  ;;  %1838 = vmatprep.subr.mxu0 %v1979_v2 }
  0x50   :  { %1868 = vmatprep.subr.mxu1 %v1979_v2  ;;  %1826 = vmatmul.mubr.msk.f32.gmra.mxu1 %vm31_vm0, %v1439_v48 }
  0x51   :  { %1839 = vmatpush3.msra.mxu0 %v1979_v2  ;;  %1869 = vmatpush3.msra.mxu1 %v1979_v2 }
  0x52   :  { %1840 = vmatprep.subr.mxu0 %v1988_v3  ;;  %1870 = vmatprep.subr.mxu1 %v1988_v3 }
  0x53   :  { %1798 = vmatprep.mubr.msk.f32.mxu0 %vm31_vm0, %v1424_v49  ;;  %1841 = vmatpush3.msra.mxu0 %v1988_v3 }
  0x54   :  { %1871 = vmatpush3.msra.mxu1 %v1988_v3  ;;  %1799 = vmatmul.mubr.msk.f32.gmra.mxu0 %vm31_vm0, %v1425_v50 }
  0x55   :  { %1828 = vmatprep.mubr.msk.f32.mxu1 %vm31_vm0, %v1440_v51  ;;  %1842 = vmatprep.subr.mxu0 %v1997_v4 }
  0x56   :  { %1872 = vmatprep.subr.mxu1 %v1997_v4  ;;  %1829 = vmatmul.mubr.msk.f32.gmra.mxu1 %vm31_vm0, %v1441_v52 }
  0x57   :  { %1843 = vmatpush3.msra.mxu0 %v1997_v4  ;;  %1873 = vmatpush3.msra.mxu1 %v1997_v4 }
  0x58   :  { %1844 = vmatprep.subr.mxu0 %v2006_v5  ;;  %1874 = vmatprep.subr.mxu1 %v2006_v5 }
  0x59   :  { %1801 = vmatprep.mubr.msk.f32.mxu0 %vm31_vm0, %v1426_v53  ;;  %1845 = vmatpush3.msra.mxu0 %v2006_v5 }
  0x5a   :  { %1875 = vmatpush3.msra.mxu1 %v2006_v5  ;;  %1802 = vmatmul.mubr.msk.f32.gmra.mxu0 %vm31_vm0, %v1427_v54 }
  0x5b   :  { %1831 = vmatprep.mubr.msk.f32.mxu1 %vm31_vm0, %v1442_v55  ;;  %1846 = vmatprep.subr.mxu0 %v2015_v6 }
  0x5c   :  { %1876 = vmatprep.subr.mxu1 %v2015_v6  ;;  %1832 = vmatmul.mubr.msk.f32.gmra.mxu1 %vm31_vm0, %v1443_v56 }
  0x5d   :  { %1847 = vmatpush3.msra.mxu0 %v2015_v6  ;;  %1877 = vmatpush3.msra.mxu1 %v2015_v6 }
  0x5e   :  { %1848 = vmatprep.subr.mxu0 %v2024_v7  ;;  %1878 = vmatprep.subr.mxu1 %v2024_v7 }
  0x5f   :  { %1849 = vmatpush3.msra.mxu0 %v2024_v7  ;;  %1879 = vmatpush3.msra.mxu1 %v2024_v7 }
  0x60   :  { %1850 = vmatprep.subr.mxu0 %v2033_v8  ;;  %1880 = vmatprep.subr.mxu1 %v2033_v8 }
  0x61   :  { %1851 = vmatpush3.msra.mxu0 %v2033_v8  ;;  %1852 = vmatprep.mubr.msk.f32.mxu0 %vm31_vm0, %v1452_v57 }
  0x62   :  { %1881 = vmatpush3.msra.mxu1 %v2033_v8  ;;  %1882 = vmatprep.mubr.msk.f32.mxu1 %vm31_vm0, %v1468_v58 }
  0x63   :  { %1853 = vmatmul.mubr.msk.f32.vlgmr.msra.gmra.mxu0 %vm31_vm0, %v1453_v59  ;;  %1883 = vmatmul.mubr.msk.f32.vlgmr.msra.gmra.mxu1 %vm31_vm0, %v1469_v60 }
  0x64   :  { %1894 = vmatprep.subr.mxu0 %v1965_v0  ;;  %1924 = vmatprep.subr.mxu1 %v1965_v0 }
  0x65   :  { %1895 = vmatpush3.msra.mxu0 %v1965_v0  ;;  %1933 = vmatpush3.msra.mxu1 %v1965_v0  ;;  %v1456_v0 = vld [vmem:[%s2563_s0 + $0x1a0] sm:$0xff] }
  0x66   :  { %1896 = vmatprep.subr.mxu0 %v1970_v1  ;;  %1925 = vmatprep.subr.mxu1 %v1970_v1 }
  0x67   :  { %1855 = vmatprep.mubr.msk.f32.mxu0 %vm31_vm0, %v1454_v61  ;;  %1885 = vmatprep.mubr.msk.f32.mxu1 %vm31_vm0, %v1470_v62 }
  0x68   :  { %1897 = vmatpush3.msra.mxu0 %v1970_v1  ;;  %1934 = vmatpush3.msra.mxu1 %v1970_v1  ;;  %v1457_v1 = vld [vmem:[%s2563_s0 + $0x1a8] sm:$0xff] }
  0x69   :  { %1856 = vmatmul.mubr.msk.f32.gmra.mxu0 %vm31_vm0, %v1455_v63  ;;  %1886 = vmatmul.mubr.msk.f32.gmra.mxu1 %vm31_vm0, %v1471_v9 }
  0x6a   :  { %1898 = vmatprep.subr.mxu0 %v1979_v2  ;;  %1926 = vmatprep.subr.mxu1 %v1979_v2 }
  0x6b   :  { %1899 = vmatpush3.msra.mxu0 %v1979_v2  ;;  %1935 = vmatpush3.msra.mxu1 %v1979_v2  ;;  %v1458_v2 = vld [vmem:[%s2563_s0 + $0x1b0] sm:$0xff] }
  0x6c   :  { %1900 = vmatprep.subr.mxu0 %v1988_v3  ;;  %1927 = vmatprep.subr.mxu1 %v1988_v3 }
  0x6d   :  { %1858 = vmatprep.mubr.msk.f32.mxu0 %vm31_vm0, %v1456_v0  ;;  %1888 = vmatprep.mubr.msk.f32.mxu1 %vm31_vm0, %v1472_v10 }
  0x6e   :  { %1901 = vmatpush3.msra.mxu0 %v1988_v3  ;;  %1936 = vmatpush3.msra.mxu1 %v1988_v3  ;;  %v1459_v3 = vld [vmem:[%s2563_s0 + $0x1b8] sm:$0xff] }
  0x6f   :  { %1859 = vmatmul.mubr.msk.f32.gmra.mxu0 %vm31_vm0, %v1457_v1  ;;  %1889 = vmatmul.mubr.msk.f32.gmra.mxu1 %vm31_vm0, %v1473_v11 }
  0x70   :  { %1902 = vmatprep.subr.mxu0 %v1997_v4  ;;  %1928 = vmatprep.subr.mxu1 %v1997_v4 }
  0x71   :  { %1903 = vmatpush3.msra.mxu0 %v1997_v4  ;;  %1937 = vmatpush3.msra.mxu1 %v1997_v4  ;;  %v1484_v4 = vld [vmem:[%s2563_s0 + $0x200] sm:$0xff] }
  0x72   :  { %1904 = vmatprep.subr.mxu0 %v2006_v5  ;;  %1929 = vmatprep.subr.mxu1 %v2006_v5 }
  0x73   :  { %1861 = vmatprep.mubr.msk.f32.mxu0 %vm31_vm0, %v1458_v2  ;;  %1891 = vmatprep.mubr.msk.f32.mxu1 %vm31_vm0, %v1474_v12 }
  0x74   :  { %1905 = vmatpush3.msra.mxu0 %v2006_v5  ;;  %1938 = vmatpush3.msra.mxu1 %v2006_v5  ;;  %v1488_v5 = vld [vmem:[%s2563_s0 + $0x220] sm:$0xff] }
  0x75   :  { %1862 = vmatmul.mubr.msk.f32.gmra.mxu0 %vm31_vm0, %v1459_v3  ;;  %1892 = vmatmul.mubr.msk.f32.gmra.mxu1 %vm31_vm0, %v1475_v13 }
  0x76   :  { %1906 = vmatprep.subr.mxu0 %v2015_v6  ;;  %1930 = vmatprep.subr.mxu1 %v2015_v6 }
  0x77   :  { %1907 = vmatpush3.msra.mxu0 %v2015_v6  ;;  %1939 = vmatpush3.msra.mxu1 %v2015_v6  ;;  %v1485_v6 = vld [vmem:[%s2563_s0 + $0x208] sm:$0xff] }
  0x78   :  { %1908 = vmatprep.subr.mxu0 %v2024_v7  ;;  %1931 = vmatprep.subr.mxu1 %v2024_v7 }
  0x79   :  { %1909 = vmatpush3.msra.mxu0 %v2024_v7  ;;  %1940 = vmatpush3.msra.mxu1 %v2024_v7  ;;  %v1489_v7 = vld [vmem:[%s2563_s0 + $0x228] sm:$0xff] }
  0x7a   :  { %1910 = vmatprep.subr.mxu0 %v2033_v8  ;;  %1932 = vmatprep.subr.mxu1 %v2033_v8 }
  0x7b   :  { %1911 = vmatpush3.msra.mxu0 %v2033_v8  ;;  %1941 = vmatpush3.msra.mxu1 %v2033_v8  ;;  %v1487_v8 = vld [vmem:[%s2563_s0 + $0x218] sm:$0xff] }
  0x7c   :  { %1912 = vmatprep.mubr.msk.f32.mxu0 %vm31_vm0, %v1484_v4  ;;  %1918 = vmatprep.mubr.msk.f32.mxu1 %vm31_vm0, %v1488_v5 }
  0x7d   :  { %1913 = vmatmul.mubr.msk.f32.vlgmr.msra.gmra.mxu0 %vm31_vm0, %v1485_v6  ;;  %1919 = vmatmul.mubr.msk.f32.vlgmr.msra.gmra.mxu1 %vm31_vm0, %v1489_v7 }
  0x7e   :  { %1915 = vmatprep.mubr.msk.f32.mxu0 %vm31_vm0, %v1486_v14  ;;  %1921 = vmatprep.mubr.msk.f32.mxu1 %vm31_vm0, %v1490_v15 }
  0x81   :  { %1916 = vmatmul.mubr.msk.f32.gmra.mxu0 %vm31_vm0, %v1487_v8  ;;  %1922 = vmatmul.mubr.msk.f32.gmra.mxu1 %vm31_vm0, %v1491_v16 }
  0xd5   :  { %v1674_v17 = vpop.f32.mrf.mxu0  ;;  %v1704_v18 = vpop.f32.mrf.mxu1 }
  0xd6   :  { %v300_v3 = vmax.f32 %v1674_v17, %v1704_v18 }
  0xd7   :  { %v122_v19 = vpop.f32.mrf.mxu0  ;;  %v260_v20 = vpop.f32.mrf.mxu1 }
  0xd8   :  { %v299_v6 = vmax.f32 %v122_v19, %v260_v20 }
  0xdc   :  { %v2475_v21 = vpop.f32.mrf.mxu0  ;;  %v2477_v22 = vpop.f32.mrf.mxu1 }
  0xde   :  { %v2479_v23 = vpop.f32.mrf.mxu0  ;;  %v2481_v24 = vpop.f32.mrf.mxu1 }
  0xe2   :  { %v1680_v25 = vpop.f32.mrf.mxu0  ;;  %v1710_v26 = vpop.f32.mrf.mxu1 }
  0xe3   :  { %v304_v13 = vmax.f32 %v1680_v25, %v1710_v26 }
  0xe4   :  { %v142_v27 = vpop.f32.mrf.mxu0  ;;  %v280_v28 = vpop.f32.mrf.mxu1 }
  0xe5   :  { %v303_v7 = vmax.f32 %v142_v27, %v280_v28 }
  0xe8   :  { %v2483_v29 = vpop.f32.mrf.mxu0  ;;  %v1713_v30 = vpop.f32.mrf.mxu1 }
  0xea   :  { %v152_v31 = vpop.f32.mrf.mxu0  ;;  %v290_v32 = vpop.f32.mrf.mxu1 }
  0xef   :  { %v1734_v33 = vpop.f32.mrf.mxu0  ;;  %v1764_v34 = vpop.f32.mrf.mxu1 }
  0xf0   :  { %v446_v14 = vmax.f32 %v300_v3, %v1734_v33 }
  0xf1   :  { %v406_v35 = vpop.f32.mrf.mxu0  ;;  %v2485_v36 = vpop.f32.mrf.mxu1 }
  0xf2   :  { %v445_v8 = vmax.f32 %v299_v6, %v406_v35  ;;  %v592_v25 = vmax.f32 %v446_v14, %v1764_v34 }
  0xf4   :  { %v1737_v37 = vpop.f32.mrf.mxu0  ;;  %v591_v28 = vmax.f32 %v445_v8, %v2485_v36 }
  0xf6   :  { %v2487_v38 = vpop.f32.mrf.mxu1  ;;  %v416_v39 = vpop.f32.mrf.mxu0 }
  0xf8   :  { %v2489_v40 = vpop.f32.mrf.mxu1 }
  0xfa   :  { %v1740_v41 = vpop.f32.mrf.mxu0 }
  0xfb   :  { %v450_v15 = vmax.f32 %v304_v13, %v1740_v41 }
  0xfc   :  { %v1770_v42 = vpop.f32.mrf.mxu1  ;;  %v426_v44 = vpop.f32.mrf.mxu0 }
  0xfd   :  { %v449_v16 = vmax.f32 %v303_v7, %v426_v44  ;;  %v596_v26 = vmax.f32 %v450_v15, %v1770_v42 }
  0xfe   :  { %v572_v43 = vpop.f32.mrf.mxu1 }
  0xff   :  { %v595_v33 = vmax.f32 %v449_v16, %v572_v43 }
 0x100   :  { %v1743_v46 = vpop.f32.mrf.mxu0 }
 0x102   :  { %v2491_v45 = vpop.f32.mrf.mxu1  ;;  %v436_v48 = vpop.f32.mrf.mxu0 }
 0x104   :  { %v2493_v47 = vpop.f32.mrf.mxu1 }
 0x109   :  { %v1794_v49 = vpop.f32.mrf.mxu0  ;;  %v2495_v50 = vpop.f32.mrf.mxu1 }
 0x10a   :  { %v738_v35 = vmax.f32 %v592_v25, %v1794_v49 }
 0x10b   :  { %v698_v51 = vpop.f32.mrf.mxu0  ;;  %v2497_v52 = vpop.f32.mrf.mxu1 }
 0x10c   :  { %v737_v44 = vmax.f32 %v591_v28, %v698_v51 }
 0x10e   :  { %v1797_v53 = vpop.f32.mrf.mxu0 }
 0x110   :  { %v2499_v54 = vpop.f32.mrf.mxu1  ;;  %v708_v55 = vpop.f32.mrf.mxu0 }
 0x112   :  { %v2501_v56 = vpop.f32.mrf.mxu1 }
 0x114   :  { %v1800_v57 = vpop.f32.mrf.mxu0 }
 0x115   :  { %v742_v41 = vmax.f32 %v596_v26, %v1800_v57 }
 0x116   :  { %v1830_v58 = vpop.f32.mrf.mxu1  ;;  %v718_v60 = vpop.f32.mrf.mxu0 }
 0x117   :  { %v888_v34 = vmax.f32 %v742_v41, %v1830_v58 }
 0x118   :  { %v864_v59 = vpop.f32.mrf.mxu1 }
 0x11a   :  { %v1803_v62 = vpop.f32.mrf.mxu0 }
 0x11c   :  { %v2503_v61 = vpop.f32.mrf.mxu1  ;;  %v728_v9 = vpop.f32.mrf.mxu0 }
 0x11e   :  { %v2505_v63 = vpop.f32.mrf.mxu1 }
 0x11f   :  { %2566 = vst [vmem:[#allocation2_spill] sm:$0xff] %v2505_v63  ;;  %v306_v63 = vmax.f32 %v2483_v29, %v1713_v30 }
 0x121   :  { %v452_v20 = vmax.f32 %v306_v63, %v1743_v46 }
 0x123   :  { %v1854_v0 = vpop.f32.mrf.mxu0  ;;  %v2507_v10 = vpop.f32.mrf.mxu1  ;;  %v598_v30 = vmax.f32 %v452_v20, %v2491_v45 }
 0x124   :  { %2567 = vst [vmem:[#allocation3_spill] sm:$0xff] %v2507_v10  ;;  %v302_v10 = vmax.f32 %v2475_v21, %v2477_v22 }
 0x125   :  { %v990_v1 = vpop.f32.mrf.mxu0  ;;  %v2509_v11 = vpop.f32.mrf.mxu1  ;;  %v744_v42 = vmax.f32 %v598_v30, %v1803_v62 }
 0x126   :  { %2568 = vst [vmem:[#allocation4_spill] sm:$0xff] %v2509_v11  ;;  %v301_v11 = vmax.f32 %v2479_v23, %v2481_v24  ;;  %v741_v23 = vmax.f32 %v595_v33, %v718_v60  ;;  %v2571_v58 = vld [vmem:[#allocation2_spill] sm:$0xff] }
 0x128   :  { %v447_v19 = vmax.f32 %v301_v11, %v416_v39  ;;  %v887_v49 = vmax.f32 %v741_v23, %v864_v59 }
 0x129   :  { %v1857_v2 = vpop.f32.mrf.mxu0  ;;  %v2511_v12 = vpop.f32.mrf.mxu1 }
 0x12a   :  { %2569 = vst [vmem:[#allocation5_spill] sm:$0xff] %v2511_v12  ;;  %v305_v12 = vmax.f32 %v152_v31, %v290_v32  ;;  %v593_v29 = vmax.f32 %v447_v19, %v2489_v40  ;;  %v884_v32 = vmax.f32 %v738_v35, %v2495_v50  ;;  %v890_v50 = vmax.f32 %v744_v42, %v2503_v61 }
 0x12b   :  { %v1000_v4 = vpop.f32.mrf.mxu0  ;;  %v2513_v5 = vpop.f32.mrf.mxu1  ;;  %v2572_v62 = vld [vmem:[#allocation3_spill] sm:$0xff] }
 0x12c   :  { %2570 = vst [vmem:[#allocation6_spill] sm:$0xff] %v2513_v5  ;;  %v448_v5 = vmax.f32 %v302_v10, %v1737_v37  ;;  %v451_v27 = vmax.f32 %v305_v12, %v436_v48  ;;  %v739_v39 = vmax.f32 %v593_v29, %v708_v55  ;;  %v883_v48 = vmax.f32 %v737_v44, %v2497_v52 }
 0x12d   :  { %v1030_v51 = vmax.f32 %v884_v32, %v1854_v0  ;;  %v2573_v12 = vld [vmem:[#allocation4_spill] sm:$0xff] }
 0x12e   :  { %v594_v24 = vmax.f32 %v448_v5, %v2487_v38  ;;  %v597_v31 = vmax.f32 %v451_v27, %v2493_v47  ;;  %v1029_v57 = vmax.f32 %v883_v48, %v990_v1  ;;  %v885_v47 = vmax.f32 %v739_v39, %v2501_v56  ;;  %v1500_v1 = vld [vmem:[%s2564_s2] ss:$0 sm:$0xff] }
 0x12f   :  { %v1860_v17 = vpop.f32.mrf.mxu0  ;;  %v1890_v18 = vpop.f32.mrf.mxu1  ;;  %v1176_v63 = vmax.f32 %v1030_v51, %v2572_v62 }
 0x130   :  { %v740_v36 = vmax.f32 %v594_v24, %v1797_v53  ;;  %v743_v43 = vmax.f32 %v597_v31, %v728_v9  ;;  %v1034_v38 = vmax.f32 %v888_v34, %v1860_v17  ;;  %v1031_v52 = vmax.f32 %v885_v47, %v1000_v4 }
 0x131   :  { %v1010_v21 = vpop.f32.mrf.mxu0  ;;  %v1156_v22 = vpop.f32.mrf.mxu1  ;;  %v1175_v56 = vmax.f32 %v1029_v57, %v2573_v12  ;;  %v2574_v4 = vld [vmem:[#allocation5_spill] sm:$0xff] }
 0x132   :  { %v1033_v40 = vmax.f32 %v887_v49, %v1010_v21  ;;  %v886_v45 = vmax.f32 %v740_v36, %v2499_v54  ;;  %v889_v53 = vmax.f32 %v743_v43, %v2571_v58  ;;  %v1180_v9 = vmax.f32 %v1034_v38, %v1890_v18 }
 0x133   :  { %v2575_v16 = vld [vmem:[#allocation6_spill] sm:$0xff] }
 0x134   :  { %v1032_v10 = vmax.f32 %v886_v45, %v1857_v2  ;;  %v1179_v3 = vmax.f32 %v1033_v40, %v1156_v22  ;;  %v1177_v17 = vmax.f32 %v1031_v52, %v2575_v16 }
 0x135   :  { %v1863_v37 = vpop.f32.mrf.mxu0  ;;  %v1893_v46 = vpop.f32.mrf.mxu1 }
 0x136   :  { %v1036_v59 = vmax.f32 %v890_v50, %v1863_v37  ;;  %v1178_v8 = vmax.f32 %v1032_v10, %v2574_v4 }
 0x137   :  { %v1020_v60 = vpop.f32.mrf.mxu0  ;;  %v1166_v55 = vpop.f32.mrf.mxu1 }
 0x138   :  { %v1035_v0 = vmax.f32 %v889_v53, %v1020_v60  ;;  %v1182_v18 = vmax.f32 %v1036_v59, %v1893_v46 }
 0x13a   :  { %v1181_v25 = vmax.f32 %v1035_v0, %v1166_v55 }
 0x13d   :  { %v1914_v11 = vpop.f32.mrf.mxu0  ;;  %v1920_v54 = vpop.f32.mrf.mxu1 }
 0x13e   :  { %v1322_v61 = vmax.f32 %v1176_v63, %v1914_v11  ;;  %v1326_v13 = vmax.f32 %v1180_v9, %v1920_v54 }
 0x13f   :  { %v1282_v5 = vpop.f32.mrf.mxu0  ;;  %v1302_v6 = vpop.f32.mrf.mxu1 }
 0x140   :  { %v1337_v7 = vadd.f32 %v1500_v1, %v1322_v61  ;;  %v1341_v14 = vadd.f32 %v1500_v1, %v1326_v13  ;;  %v1321_v15 = vmax.f32 %v1175_v56, %v1282_v5  ;;  %v1325_v2 = vmax.f32 %v1179_v3, %v1302_v6 }
 0x141   :  { %v1917_v26 = vpop.f32.mrf.mxu0  ;;  %v1923_v19 = vpop.f32.mrf.mxu1 }
 0x142   :  { %v1345_v20 = vmax.f32 %v1337_v7, 0.0  ;;  %v1349_v27 = vmax.f32 %v1341_v14, 0.0  ;;  %v1336_v28 = vadd.f32 %v1500_v1, %v1321_v15  ;;  %v1340_v33 = vadd.f32 %v1500_v1, %v1325_v2 }
 0x143   :  { %v1324_v35 = vmax.f32 %v1178_v8, %v1917_v26  ;;  %v1328_v41 = vmax.f32 %v1182_v18, %v1923_v19  ;;  %v1292_v21 = vpop.f32.mrf.mxu0  ;;  %v1312_v22 = vpop.f32.mrf.mxu1 }
 0x144   :  { %1353 = vst [vmem:[%s2565_s3 + $0x8] sm:$0xff] %v1345_v20  ;;  %1357 = vst [vmem:[%s2565_s3 + $0x28] sm:$0xff] %v1349_v27  ;;  %v1344_v44 = vmax.f32 %v1336_v28, 0.0  ;;  %v1348_v23 = vmax.f32 %v1340_v33, 0.0  ;;  %v1323_v24 = vmax.f32 %v1177_v17, %v1292_v21  ;;  %v1327_v29 = vmax.f32 %v1181_v25, %v1312_v22 }
 0x145   :  { %v1339_v30 = vadd.f32 %v1500_v1, %v1324_v35  ;;  %v1343_v31 = vadd.f32 %v1500_v1, %v1328_v41 }
 0x146   :  { %1352 = vst [vmem:[%s2565_s3] sm:$0xff] %v1344_v44  ;;  %1356 = vst [vmem:[%s2565_s3 + $0x20] sm:$0xff] %v1348_v23  ;;  %v1338_v32 = vadd.f32 %v1500_v1, %v1323_v24  ;;  %v1342_v34 = vadd.f32 %v1500_v1, %v1327_v29 }
 0x147   :  { %v1347_v37 = vmax.f32 %v1339_v30, 0.0  ;;  %v1351_v36 = vmax.f32 %v1343_v31, 0.0 }
 0x148   :  { %v1346_v39 = vmax.f32 %v1338_v32, 0.0  ;;  %v1350_v42 = vmax.f32 %v1342_v34, 0.0 }
 0x149   :  { %1355 = vst [vmem:[%s2565_s3 + $0x18] sm:$0xff] %v1347_v37  ;;  %1359 = vst [vmem:[%s2565_s3 + $0x38] sm:$0xff] %v1351_v36 }
 0x14a   :  { %1354 = vst [vmem:[%s2565_s3 + $0x10] sm:$0xff] %v1346_v39  ;;  %1358 = vst [vmem:[%s2565_s3 + $0x30] sm:$0xff] %v1350_v42 }

// kernel: binary_cnn_forward.3
= control target key start
LH: loop header
LB: loop body
LE: loop exit
PB: predicated region body
PF: predicated region fallthrough
CT: control target
= control target key end

     0   :  { %v4354_v0 = vmov 0.0   ;;  %vm52_vm0 = vcmask 130048   ;;  %vm4355_vm1 = vmmov 0   ;;  %vm692_vm2 = vcmask 523264   ;;  %s6823_s1 = inlined_call_operand.vmem [shape: f32[144,64], index: 1, kind: input, shape index: {}]   ;;  %s6824_s0 = inlined_call_operand.vmem [shape: f32[4,9,8,144], index: 0, kind: input, shape index: {}]   ;;  %s6825_s3 = inlined_call_operand.vmem [shape: f32[9,64,128], index: 3, kind: input, shape index: {}]   ;;  %s6826_s2 = inlined_call_operand.vmem [shape: f32[1,64], index: 2, kind: input, shape index: {}]   ;;  %s6827_s5 = inlined_call_operand.vmem [shape: f32[128,64], index: 5, kind: input, shape index: {}]   ;;  %s6828_s7 = inlined_call_operand.vmem [shape: f32[64,2], index: 7, kind: input, shape index: {}]   ;;  %s6829_s4 = inlined_call_operand.vmem [shape: f32[1,128], index: 4, kind: input, shape index: {}]   ;;  %s6830_s6 = inlined_call_operand.vmem [shape: f32[1,64], index: 6, kind: input, shape index: {}]   ;;  %s6831_s8 = inlined_call_operand.vmem [shape: f32[1,2], index: 8, kind: input, shape index: {}]   ;;  %s6832_s9 = inlined_call_operand.vmem [shape: f32[8,2], index: 9, kind: output, shape index: {}]  }
   0x1   :  { %56 = vmatprep.subr.mxu0 %v4354_v0  ;;  %132 = vmatprep.subr.mxu1 %v4354_v0  ;;  %v4411_v1 = vld [vmem:[%s6823_s1 + $0x78] sm:$0xff]  ;;  %v4416_v2 = vld [vmem:[%s6823_s1 + $0x70] sm:$0xff]  ;;  %v4425_v3 = vld [vmem:[%s6823_s1 + $0x68] sm:$0xff]  ;;  %vm3774_vm3 = vcmask 15360  }
   0x2   :  { %57 = vmatpush1.msra.mxu0 %v4411_v1  ;;  %133 = vmatpush1.msra.mxu1 %v4411_v1  ;;  %v4434_v4 = vld [vmem:[%s6823_s1 + $0x60] sm:$0xff]  ;;  %v4443_v5 = vld [vmem:[%s6823_s1 + $0x58] sm:$0xff]  ;;  %v4452_v6 = vld [vmem:[%s6823_s1 + $0x50] sm:$0xff] }
   0x3   :  { %58 = vmatprep.subr.mxu0 %v4354_v0  ;;  %134 = vmatprep.subr.mxu1 %v4354_v0  ;;  %v4461_v7 = vld [vmem:[%s6823_s1 + $0x48] sm:$0xff]  ;;  %v4470_v8 = vld [vmem:[%s6823_s1 + $0x40] sm:$0xff]  ;;  %v4479_v9 = vld [vmem:[%s6823_s1 + $0x38] sm:$0xff] }
   0x4   :  { %59 = vmatpush1.msra.mxu0 %v4416_v2  ;;  %135 = vmatpush1.msra.mxu1 %v4416_v2  ;;  %v4488_v10 = vld [vmem:[%s6823_s1 + $0x30] sm:$0xff]  ;;  %v4497_v11 = vld [vmem:[%s6823_s1 + $0x28] sm:$0xff]  ;;  %v4506_v12 = vld [vmem:[%s6823_s1 + $0x20] sm:$0xff] }
   0x5   :  { %60 = vmatprep.subr.mxu0 %v4354_v0  ;;  %136 = vmatprep.subr.mxu1 %v4354_v0  ;;  %v4515_v13 = vld [vmem:[%s6823_s1 + $0x18] sm:$0xff]  ;;  %v4524_v14 = vld [vmem:[%s6823_s1 + $0x10] sm:$0xff]  ;;  %v4533_v15 = vld [vmem:[%s6823_s1 + $0x8] sm:$0xff] }
   0x6   :  { %61 = vmatpush1.msra.mxu0 %v4425_v3  ;;  %137 = vmatpush1.msra.mxu1 %v4425_v3  ;;  %v4542_v16 = vld [vmem:[%s6823_s1] sm:$0xff]  ;;  %v4551_v17 = vld [vmem:[%s6823_s1 + $0x88] sm:$0xff]  ;;  %v3782_v21 = vld [vmem:[%s6824_s0 + $0x98] sm:$0xff] }
   0x7   :  { %62 = vmatprep.subr.mxu0 %v4354_v0  ;;  %138 = vmatprep.subr.mxu1 %v4354_v0  ;;  %v4560_v18 = vld [vmem:[%s6823_s1 + $0x80] sm:$0xff]  ;;  %v33_v19 = vld [vmem:[%s6824_s0 + $0x8] sm:$0xff]  ;;  %v3781_v22 = vld [vmem:[%s6824_s0 + $0x90] sm:$0xff] }
   0x8   :  { %63 = vmatpush1.msra.mxu0 %v4434_v4  ;;  %139 = vmatpush1.msra.mxu1 %v4434_v4  ;;  %v32_v20 = vld [vmem:[%s6824_s0] sm:$0xff]  ;;  %v3785_v23 = vld [vmem:[%s6824_s0 + $0x128] sm:$0xff]  ;;  %v3788_v25 = vld [vmem:[%s6824_s0 + $0x1b8] sm:$0xff] }
   0x9   :  { %64 = vmatprep.subr.mxu0 %v4354_v0  ;;  %140 = vmatprep.subr.mxu1 %v4354_v0  ;;  %v3784_v24 = vld [vmem:[%s6824_s0 + $0x120] sm:$0xff]  ;;  %v3787_v26 = vld [vmem:[%s6824_s0 + $0x1b0] sm:$0xff]  ;;  %v3792_v27 = vld [vmem:[%s6824_s0 + $0x18] sm:$0xff] }
   0xa   :  { %65 = vmatpush1.msra.mxu0 %v4443_v5  ;;  %141 = vmatpush1.msra.mxu1 %v4443_v5  ;;  %v3791_v28 = vld [vmem:[%s6824_s0 + $0x10] sm:$0xff]  ;;  %v3795_v29 = vld [vmem:[%s6824_s0 + $0xa8] sm:$0xff]  ;;  %v3794_v30 = vld [vmem:[%s6824_s0 + $0xa0] sm:$0xff] }
   0xb   :  { %66 = vmatprep.subr.mxu0 %v4354_v0  ;;  %142 = vmatprep.subr.mxu1 %v4354_v0  ;;  %v3798_v31 = vld [vmem:[%s6824_s0 + $0x138] sm:$0xff]  ;;  %v3801_v32 = vld [vmem:[%s6824_s0 + $0x1c8] sm:$0xff]  ;;  %v3797_v33 = vld [vmem:[%s6824_s0 + $0x130] sm:$0xff] }
   0xc   :  { %67 = vmatpush1.msra.mxu0 %v4452_v6  ;;  %143 = vmatpush1.msra.mxu1 %v4452_v6  ;;  %v3800_v34 = vld [vmem:[%s6824_s0 + $0x1c0] sm:$0xff]  ;;  %v373_v35 = vld [vmem:[%s6825_s3 + $0x38] sm:$0xff]  ;;  %v372_v36 = vld [vmem:[%s6825_s3 + $0x30] sm:$0xff] }
   0xd   :  { %68 = vmatprep.subr.mxu0 %v4354_v0  ;;  %144 = vmatprep.subr.mxu1 %v4354_v0  ;;  %v371_v37 = vld [vmem:[%s6825_s3 + $0x28] sm:$0xff]  ;;  %v370_v38 = vld [vmem:[%s6825_s3 + $0x20] sm:$0xff]  ;;  %v369_v39 = vld [vmem:[%s6825_s3 + $0x18] sm:$0xff] }
   0xe   :  { %69 = vmatpush1.msra.mxu0 %v4461_v7  ;;  %145 = vmatpush1.msra.mxu1 %v4461_v7  ;;  %v368_v40 = vld [vmem:[%s6825_s3 + $0x10] sm:$0xff]  ;;  %v367_v41 = vld [vmem:[%s6825_s3 + $0x8] sm:$0xff]  ;;  %v366_v42 = vld [vmem:[%s6825_s3] sm:$0xff] }
   0xf   :  { %70 = vmatprep.subr.mxu0 %v4354_v0  ;;  %146 = vmatprep.subr.mxu1 %v4354_v0  ;;  %v3810_v43 = vld [vmem:[%s6825_s3 + $0x78] sm:$0xff]  ;;  %v3809_v44 = vld [vmem:[%s6825_s3 + $0x70] sm:$0xff]  ;;  %v3808_v45 = vld [vmem:[%s6825_s3 + $0x68] sm:$0xff] }
  0x10   :  { %71 = vmatpush1.msra.mxu0 %v4470_v8  ;;  %147 = vmatpush1.msra.mxu1 %v4470_v8  ;;  %v3807_v46 = vld [vmem:[%s6825_s3 + $0x60] sm:$0xff]  ;;  %v3806_v47 = vld [vmem:[%s6825_s3 + $0x58] sm:$0xff]  ;;  %v3805_v48 = vld [vmem:[%s6825_s3 + $0x50] sm:$0xff] }
  0x11   :  { %72 = vmatprep.subr.mxu0 %v4354_v0  ;;  %148 = vmatprep.subr.mxu1 %v4354_v0  ;;  %v3804_v49 = vld [vmem:[%s6825_s3 + $0x48] sm:$0xff]  ;;  %v3803_v50 = vld [vmem:[%s6825_s3 + $0x40] sm:$0xff] }
  0x12   :  { %73 = vmatpush1.msra.mxu0 %v4479_v9  ;;  %149 = vmatpush1.msra.mxu1 %v4479_v9  ;;  %v4913_v59 = vld [vmem:[%s6826_s2] ss:$0 sm:$0xff] }
  0x13   :  { %74 = vmatprep.subr.mxu0 %v4354_v0  ;;  %150 = vmatprep.subr.mxu1 %v4354_v0 }
  0x14   :  { %75 = vmatpush1.msra.mxu0 %v4488_v10  ;;  %151 = vmatpush1.msra.mxu1 %v4488_v10 }
  0x15   :  { %76 = vmatprep.subr.mxu0 %v4354_v0  ;;  %152 = vmatprep.subr.mxu1 %v4354_v0 }
  0x16   :  { %77 = vmatpush1.msra.mxu0 %v4497_v11  ;;  %153 = vmatpush1.msra.mxu1 %v4497_v11 }
  0x17   :  { %78 = vmatprep.subr.mxu0 %v4354_v0  ;;  %154 = vmatprep.subr.mxu1 %v4354_v0 }
  0x18   :  { %79 = vmatpush1.msra.mxu0 %v4506_v12  ;;  %155 = vmatpush1.msra.mxu1 %v4506_v12 }
  0x19   :  { %80 = vmatprep.subr.mxu0 %v4354_v0  ;;  %156 = vmatprep.subr.mxu1 %v4354_v0 }
  0x1a   :  { %81 = vmatpush1.msra.mxu0 %v4515_v13  ;;  %157 = vmatpush1.msra.mxu1 %v4515_v13 }
  0x1b   :  { %82 = vmatprep.subr.mxu0 %v4354_v0  ;;  %158 = vmatprep.subr.mxu1 %v4354_v0 }
  0x1c   :  { %83 = vmatpush1.msra.mxu0 %v4524_v14  ;;  %159 = vmatpush1.msra.mxu1 %v4524_v14 }
  0x1d   :  { %84 = vmatprep.subr.mxu0 %v4354_v0  ;;  %160 = vmatprep.subr.mxu1 %v4354_v0 }
  0x1e   :  { %85 = vmatpush1.msra.mxu0 %v4533_v15  ;;  %161 = vmatpush1.msra.mxu1 %v4533_v15 }
  0x1f   :  { %86 = vmatprep.subr.mxu0 %v4354_v0  ;;  %162 = vmatprep.subr.mxu1 %v4354_v0 }
  0x20   :  { %87 = vmatpush1.msra.mxu0 %v4542_v16  ;;  %163 = vmatpush1.msra.mxu1 %v4542_v16 }
  0x21   :  { %116 = vmatprep.subr.mxu0 %v4354_v0  ;;  %192 = vmatprep.subr.mxu1 %v4354_v0 }
  0x22   :  { %117 = vmatpush2.msra.mxu0 %v4551_v17  ;;  %193 = vmatpush2.msra.mxu1 %v4551_v17 }
  0x23   :  { %118 = vmatprep.subr.mxu0 %v4354_v0  ;;  %194 = vmatprep.subr.mxu1 %v4354_v0 }
  0x24   :  { %119 = vmatpush2.msra.mxu0 %v4560_v18  ;;  %3780 = vmatprep.mubr.msk.f32.mxu0 %vm52_vm0, %v33_v19 }
  0x25   :  { %195 = vmatpush2.msra.mxu1 %v4560_v18  ;;  %121 = vmatmul.mubr.f32.vlgmr.msra.gmra.mxu0 %v32_v20  ;;  %v3817_v20 = vld [vmem:[%s6824_s0 + $0xb8] sm:$0xff] }
  0x26   :  { %3783 = vmatprep.mubr.msk.f32.mxu1 %vm52_vm0, %v3782_v21  ;;  %209 = vmatprep.subr.mxu0 %v4354_v0 }
  0x27   :  { %286 = vmatprep.subr.mxu1 %v4354_v0  ;;  %197 = vmatmul.mubr.f32.vlgmr.msra.gmra.mxu1 %v3781_v22 }
  0x28   :  { %210 = vmatpush1.msra.mxu0 %v4411_v1  ;;  %287 = vmatpush1.msra.mxu1 %v4411_v1 }
  0x29   :  { %211 = vmatprep.subr.mxu0 %v4354_v0  ;;  %288 = vmatprep.subr.mxu1 %v4354_v0 }
  0x2a   :  { %212 = vmatpush1.msra.mxu0 %v4416_v2  ;;  %289 = vmatpush1.msra.mxu1 %v4416_v2 }
  0x2b   :  { %213 = vmatprep.subr.mxu0 %v4354_v0  ;;  %290 = vmatprep.subr.mxu1 %v4354_v0 }
  0x2c   :  { %214 = vmatpush1.msra.mxu0 %v4425_v3  ;;  %291 = vmatpush1.msra.mxu1 %v4425_v3 }
  0x2d   :  { %215 = vmatprep.subr.mxu0 %v4354_v0  ;;  %292 = vmatprep.subr.mxu1 %v4354_v0 }
  0x2e   :  { %216 = vmatpush1.msra.mxu0 %v4434_v4  ;;  %293 = vmatpush1.msra.mxu1 %v4434_v4 }
  0x2f   :  { %217 = vmatprep.subr.mxu0 %v4354_v0  ;;  %294 = vmatprep.subr.mxu1 %v4354_v0 }
  0x30   :  { %218 = vmatpush1.msra.mxu0 %v4443_v5  ;;  %295 = vmatpush1.msra.mxu1 %v4443_v5 }
  0x31   :  { %219 = vmatprep.subr.mxu0 %v4354_v0  ;;  %296 = vmatprep.subr.mxu1 %v4354_v0 }
  0x32   :  { %220 = vmatpush1.msra.mxu0 %v4452_v6  ;;  %297 = vmatpush1.msra.mxu1 %v4452_v6 }
  0x33   :  { %221 = vmatprep.subr.mxu0 %v4354_v0  ;;  %298 = vmatprep.subr.mxu1 %v4354_v0 }
  0x34   :  { %222 = vmatpush1.msra.mxu0 %v4461_v7  ;;  %299 = vmatpush1.msra.mxu1 %v4461_v7 }
  0x35   :  { %223 = vmatprep.subr.mxu0 %v4354_v0  ;;  %300 = vmatprep.subr.mxu1 %v4354_v0 }
  0x36   :  { %224 = vmatpush1.msra.mxu0 %v4470_v8  ;;  %301 = vmatpush1.msra.mxu1 %v4470_v8 }
  0x37   :  { %225 = vmatprep.subr.mxu0 %v4354_v0  ;;  %302 = vmatprep.subr.mxu1 %v4354_v0 }
  0x38   :  { %226 = vmatpush1.msra.mxu0 %v4479_v9  ;;  %303 = vmatpush1.msra.mxu1 %v4479_v9 }
  0x39   :  { %227 = vmatprep.subr.mxu0 %v4354_v0  ;;  %304 = vmatprep.subr.mxu1 %v4354_v0 }
  0x3a   :  { %228 = vmatpush1.msra.mxu0 %v4488_v10  ;;  %305 = vmatpush1.msra.mxu1 %v4488_v10 }
  0x3b   :  { %229 = vmatprep.subr.mxu0 %v4354_v0  ;;  %306 = vmatprep.subr.mxu1 %v4354_v0 }
  0x3c   :  { %230 = vmatpush1.msra.mxu0 %v4497_v11  ;;  %307 = vmatpush1.msra.mxu1 %v4497_v11 }
  0x3d   :  { %231 = vmatprep.subr.mxu0 %v4354_v0  ;;  %308 = vmatprep.subr.mxu1 %v4354_v0 }
  0x3e   :  { %232 = vmatpush1.msra.mxu0 %v4506_v12  ;;  %309 = vmatpush1.msra.mxu1 %v4506_v12 }
  0x3f   :  { %233 = vmatprep.subr.mxu0 %v4354_v0  ;;  %310 = vmatprep.subr.mxu1 %v4354_v0 }
  0x40   :  { %234 = vmatpush1.msra.mxu0 %v4515_v13  ;;  %311 = vmatpush1.msra.mxu1 %v4515_v13 }
  0x41   :  { %235 = vmatprep.subr.mxu0 %v4354_v0  ;;  %312 = vmatprep.subr.mxu1 %v4354_v0 }
  0x42   :  { %236 = vmatpush1.msra.mxu0 %v4524_v14  ;;  %313 = vmatpush1.msra.mxu1 %v4524_v14 }
  0x43   :  { %237 = vmatprep.subr.mxu0 %v4354_v0  ;;  %314 = vmatprep.subr.mxu1 %v4354_v0 }
  0x44   :  { %238 = vmatpush1.msra.mxu0 %v4533_v15  ;;  %315 = vmatpush1.msra.mxu1 %v4533_v15 }
  0x45   :  { %239 = vmatprep.subr.mxu0 %v4354_v0  ;;  %316 = vmatprep.subr.mxu1 %v4354_v0 }
  0x46   :  { %240 = vmatpush1.msra.mxu0 %v4542_v16  ;;  %317 = vmatpush1.msra.mxu1 %v4542_v16 }
  0x47   :  { %269 = vmatprep.subr.mxu0 %v4354_v0  ;;  %346 = vmatprep.subr.mxu1 %v4354_v0 }
  0x48   :  { %270 = vmatpush2.msra.mxu0 %v4551_v17  ;;  %347 = vmatpush2.msra.mxu1 %v4551_v17 }
  0x49   :  { %271 = vmatprep.subr.mxu0 %v4354_v0  ;;  %348 = vmatprep.subr.mxu1 %v4354_v0 }
  0x4a   :  { %272 = vmatpush2.msra.mxu0 %v4560_v18  ;;  %3786 = vmatprep.mubr.msk.f32.mxu0 %vm52_vm0, %v3785_v23 }
  0x4b   :  { %349 = vmatpush2.msra.mxu1 %v4560_v18  ;;  %274 = vmatmul.mubr.f32.vlgmr.msra.gmra.mxu0 %v3784_v24 }
  0x4c   :  { %3789 = vmatprep.mubr.msk.f32.mxu1 %vm52_vm0, %v3788_v25  ;;  %380 = vmatprep.subr.mxu0 %v4354_v0  ;;  %v3816_v25 = vld [vmem:[%s6824_s0 + $0xb0] sm:$0xff] }
  0x4d   :  { %456 = vmatprep.subr.mxu1 %v4354_v0  ;;  %351 = vmatmul.mubr.f32.vlgmr.msra.gmra.mxu1 %v3787_v26  ;;  %v3823_v26 = vld [vmem:[%s6824_s0 + $0x1d8] sm:$0xff] }
  0x4e   :  { %381 = vmatpush1.msra.mxu0 %v4411_v1  ;;  %457 = vmatpush1.msra.mxu1 %v4411_v1 }
  0x4f   :  { %382 = vmatprep.subr.mxu0 %v4354_v0  ;;  %458 = vmatprep.subr.mxu1 %v4354_v0 }
  0x50   :  { %383 = vmatpush1.msra.mxu0 %v4416_v2  ;;  %459 = vmatpush1.msra.mxu1 %v4416_v2 }
  0x51   :  { %384 = vmatprep.subr.mxu0 %v4354_v0  ;;  %460 = vmatprep.subr.mxu1 %v4354_v0 }
  0x52   :  { %385 = vmatpush1.msra.mxu0 %v4425_v3  ;;  %461 = vmatpush1.msra.mxu1 %v4425_v3 }
  0x53   :  { %386 = vmatprep.subr.mxu0 %v4354_v0  ;;  %462 = vmatprep.subr.mxu1 %v4354_v0 }
  0x54   :  { %387 = vmatpush1.msra.mxu0 %v4434_v4  ;;  %463 = vmatpush1.msra.mxu1 %v4434_v4 }
  0x55   :  { %388 = vmatprep.subr.mxu0 %v4354_v0  ;;  %464 = vmatprep.subr.mxu1 %v4354_v0 }
  0x56   :  { %389 = vmatpush1.msra.mxu0 %v4443_v5  ;;  %465 = vmatpush1.msra.mxu1 %v4443_v5 }
  0x57   :  { %390 = vmatprep.subr.mxu0 %v4354_v0  ;;  %466 = vmatprep.subr.mxu1 %v4354_v0 }
  0x58   :  { %391 = vmatpush1.msra.mxu0 %v4452_v6  ;;  %467 = vmatpush1.msra.mxu1 %v4452_v6 }
  0x59   :  { %392 = vmatprep.subr.mxu0 %v4354_v0  ;;  %468 = vmatprep.subr.mxu1 %v4354_v0 }
  0x5a   :  { %393 = vmatpush1.msra.mxu0 %v4461_v7  ;;  %469 = vmatpush1.msra.mxu1 %v4461_v7 }
  0x5b   :  { %394 = vmatprep.subr.mxu0 %v4354_v0  ;;  %470 = vmatprep.subr.mxu1 %v4354_v0 }
  0x5c   :  { %395 = vmatpush1.msra.mxu0 %v4470_v8  ;;  %471 = vmatpush1.msra.mxu1 %v4470_v8 }
  0x5d   :  { %396 = vmatprep.subr.mxu0 %v4354_v0  ;;  %472 = vmatprep.subr.mxu1 %v4354_v0 }
  0x5e   :  { %397 = vmatpush1.msra.mxu0 %v4479_v9  ;;  %473 = vmatpush1.msra.mxu1 %v4479_v9 }
  0x5f   :  { %398 = vmatprep.subr.mxu0 %v4354_v0  ;;  %474 = vmatprep.subr.mxu1 %v4354_v0 }
  0x60   :  { %399 = vmatpush1.msra.mxu0 %v4488_v10  ;;  %475 = vmatpush1.msra.mxu1 %v4488_v10 }
  0x61   :  { %400 = vmatprep.subr.mxu0 %v4354_v0  ;;  %476 = vmatprep.subr.mxu1 %v4354_v0 }
  0x62   :  { %401 = vmatpush1.msra.mxu0 %v4497_v11  ;;  %477 = vmatpush1.msra.mxu1 %v4497_v11 }
  0x63   :  { %402 = vmatprep.subr.mxu0 %v4354_v0  ;;  %478 = vmatprep.subr.mxu1 %v4354_v0 }
  0x64   :  { %403 = vmatpush1.msra.mxu0 %v4506_v12  ;;  %479 = vmatpush1.msra.mxu1 %v4506_v12 }
  0x65   :  { %404 = vmatprep.subr.mxu0 %v4354_v0  ;;  %480 = vmatprep.subr.mxu1 %v4354_v0 }
  0x66   :  { %405 = vmatpush1.msra.mxu0 %v4515_v13  ;;  %481 = vmatpush1.msra.mxu1 %v4515_v13 }
  0x67   :  { %406 = vmatprep.subr.mxu0 %v4354_v0  ;;  %482 = vmatprep.subr.mxu1 %v4354_v0 }
  0x68   :  { %407 = vmatpush1.msra.mxu0 %v4524_v14  ;;  %483 = vmatpush1.msra.mxu1 %v4524_v14 }
  0x69   :  { %408 = vmatprep.subr.mxu0 %v4354_v0  ;;  %484 = vmatprep.subr.mxu1 %v4354_v0 }
  0x6a   :  { %409 = vmatpush1.msra.mxu0 %v4533_v15  ;;  %485 = vmatpush1.msra.mxu1 %v4533_v15 }
  0x6b   :  { %410 = vmatprep.subr.mxu0 %v4354_v0  ;;  %486 = vmatprep.subr.mxu1 %v4354_v0 }
  0x6c   :  { %411 = vmatpush1.msra.mxu0 %v4542_v16  ;;  %487 = vmatpush1.msra.mxu1 %v4542_v16 }
  0x6d   :  { %440 = vmatprep.subr.mxu0 %v4354_v0  ;;  %516 = vmatprep.subr.mxu1 %v4354_v0 }
  0x6e   :  { %441 = vmatpush2.msra.mxu0 %v4551_v17  ;;  %517 = vmatpush2.msra.mxu1 %v4551_v17 }
  0x6f   :  { %442 = vmatprep.subr.mxu0 %v4354_v0  ;;  %518 = vmatprep.subr.mxu1 %v4354_v0 }
  0x70   :  { %443 = vmatpush2.msra.mxu0 %v4560_v18  ;;  %3793 = vmatprep.mubr.msk.f32.mxu0 %vm52_vm0, %v3792_v27 }
  0x71   :  { %519 = vmatpush2.msra.mxu1 %v4560_v18  ;;  %445 = vmatmul.mubr.f32.vlgmr.msra.gmra.mxu0 %v3791_v28 }
  0x72   :  { %3796 = vmatprep.mubr.msk.f32.mxu1 %vm52_vm0, %v3795_v29  ;;  %533 = vmatprep.subr.mxu0 %v4354_v0 }
  0x73   :  { %610 = vmatprep.subr.mxu1 %v4354_v0  ;;  %521 = vmatmul.mubr.f32.vlgmr.msra.gmra.mxu1 %v3794_v30 }
  0x74   :  { %534 = vmatpush1.msra.mxu0 %v4411_v1  ;;  %611 = vmatpush1.msra.mxu1 %v4411_v1 }
  0x75   :  { %535 = vmatprep.subr.mxu0 %v4354_v0  ;;  %612 = vmatprep.subr.mxu1 %v4354_v0 }
  0x76   :  { %536 = vmatpush1.msra.mxu0 %v4416_v2  ;;  %613 = vmatpush1.msra.mxu1 %v4416_v2 }
  0x77   :  { %537 = vmatprep.subr.mxu0 %v4354_v0  ;;  %614 = vmatprep.subr.mxu1 %v4354_v0 }
  0x78   :  { %538 = vmatpush1.msra.mxu0 %v4425_v3  ;;  %615 = vmatpush1.msra.mxu1 %v4425_v3 }
  0x79   :  { %539 = vmatprep.subr.mxu0 %v4354_v0  ;;  %616 = vmatprep.subr.mxu1 %v4354_v0 }
  0x7a   :  { %540 = vmatpush1.msra.mxu0 %v4434_v4  ;;  %617 = vmatpush1.msra.mxu1 %v4434_v4 }
  0x7b   :  { %541 = vmatprep.subr.mxu0 %v4354_v0  ;;  %618 = vmatprep.subr.mxu1 %v4354_v0 }
  0x7c   :  { %542 = vmatpush1.msra.mxu0 %v4443_v5  ;;  %619 = vmatpush1.msra.mxu1 %v4443_v5 }
  0x7d   :  { %543 = vmatprep.subr.mxu0 %v4354_v0  ;;  %620 = vmatprep.subr.mxu1 %v4354_v0 }
  0x7e   :  { %544 = vmatpush1.msra.mxu0 %v4452_v6  ;;  %621 = vmatpush1.msra.mxu1 %v4452_v6 }
  0x7f   :  { %545 = vmatprep.subr.mxu0 %v4354_v0  ;;  %622 = vmatprep.subr.mxu1 %v4354_v0 }
  0x80   :  { %546 = vmatpush1.msra.mxu0 %v4461_v7  ;;  %623 = vmatpush1.msra.mxu1 %v4461_v7 }
  0x81   :  { %547 = vmatprep.subr.mxu0 %v4354_v0  ;;  %624 = vmatprep.subr.mxu1 %v4354_v0 }
  0x82   :  { %548 = vmatpush1.msra.mxu0 %v4470_v8  ;;  %625 = vmatpush1.msra.mxu1 %v4470_v8 }
  0x83   :  { %549 = vmatprep.subr.mxu0 %v4354_v0  ;;  %626 = vmatprep.subr.mxu1 %v4354_v0 }
  0x84   :  { %550 = vmatpush1.msra.mxu0 %v4479_v9  ;;  %627 = vmatpush1.msra.mxu1 %v4479_v9 }
  0x85   :  { %551 = vmatprep.subr.mxu0 %v4354_v0  ;;  %628 = vmatprep.subr.mxu1 %v4354_v0 }
  0x86   :  { %552 = vmatpush1.msra.mxu0 %v4488_v10  ;;  %629 = vmatpush1.msra.mxu1 %v4488_v10 }
  0x87   :  { %553 = vmatprep.subr.mxu0 %v4354_v0  ;;  %630 = vmatprep.subr.mxu1 %v4354_v0 }
  0x88   :  { %554 = vmatpush1.msra.mxu0 %v4497_v11  ;;  %631 = vmatpush1.msra.mxu1 %v4497_v11 }
  0x89   :  { %555 = vmatprep.subr.mxu0 %v4354_v0  ;;  %632 = vmatprep.subr.mxu1 %v4354_v0 }
  0x8a   :  { %556 = vmatpush1.msra.mxu0 %v4506_v12  ;;  %633 = vmatpush1.msra.mxu1 %v4506_v12 }
  0x8b   :  { %557 = vmatprep.subr.mxu0 %v4354_v0  ;;  %634 = vmatprep.subr.mxu1 %v4354_v0 }
  0x8c   :  { %558 = vmatpush1.msra.mxu0 %v4515_v13  ;;  %635 = vmatpush1.msra.mxu1 %v4515_v13 }
  0x8d   :  { %559 = vmatprep.subr.mxu0 %v4354_v0  ;;  %636 = vmatprep.subr.mxu1 %v4354_v0 }
  0x8e   :  { %560 = vmatpush1.msra.mxu0 %v4524_v14  ;;  %637 = vmatpush1.msra.mxu1 %v4524_v14 }
  0x8f   :  { %561 = vmatprep.subr.mxu0 %v4354_v0  ;;  %638 = vmatprep.subr.mxu1 %v4354_v0 }
  0x90   :  { %562 = vmatpush1.msra.mxu0 %v4533_v15  ;;  %639 = vmatpush1.msra.mxu1 %v4533_v15 }
  0x91   :  { %563 = vmatprep.subr.mxu0 %v4354_v0  ;;  %640 = vmatprep.subr.mxu1 %v4354_v0 }
  0x92   :  { %564 = vmatpush1.msra.mxu0 %v4542_v16  ;;  %641 = vmatpush1.msra.mxu1 %v4542_v16 }
  0x93   :  { %593 = vmatprep.subr.mxu0 %v4354_v0  ;;  %670 = vmatprep.subr.mxu1 %v4354_v0 }
  0x94   :  { %594 = vmatpush2.msra.mxu0 %v4551_v17  ;;  %671 = vmatpush2.msra.mxu1 %v4551_v17 }
  0x95   :  { %595 = vmatprep.subr.mxu0 %v4354_v0  ;;  %672 = vmatprep.subr.mxu1 %v4354_v0 }
  0x96   :  { %596 = vmatpush2.msra.mxu0 %v4560_v18  ;;  %3799 = vmatprep.mubr.msk.f32.mxu0 %vm52_vm0, %v3798_v31  ;;  %v3822_v31 = vld [vmem:[%s6824_s0 + $0x1d0] sm:$0xff] }
  0x97   :  { %673 = vmatpush2.msra.mxu1 %v4560_v18  ;;  %3802 = vmatprep.mubr.msk.f32.mxu1 %vm52_vm0, %v3801_v32 }
  0x98   :  { %598 = vmatmul.mubr.f32.vlgmr.msra.gmra.mxu0 %v3797_v33  ;;  %675 = vmatmul.mubr.f32.vlgmr.msra.gmra.mxu1 %v3800_v34 }
  0x99   :  { %4090 = vmatprep.subr.mxu1 %v4354_v0  ;;  %4106 = vmatprep.mubr.msk.f32.mxu1 %vm4355_vm1, %v4354_v0 }
  0x9a   :  { %4091 = vmatpush3.msra.mxu1 %v373_v35  ;;  %4071 = vmatprep.subr.mxu0 %v4354_v0 }
  0x9b   :  { %4092 = vmatprep.subr.mxu1 %v4354_v0  ;;  %4087 = vmatprep.mubr.msk.f32.mxu0 %vm4355_vm1, %v4354_v0 }
  0x9c   :  { %4093 = vmatpush3.msra.mxu1 %v372_v36  ;;  %4072 = vmatpush3.msra.mxu0 %v3810_v43  ;;  %v3830_v43 = vld [vmem:[%s6825_s3 + $0xa8] sm:$0xff] }
  0x9d   :  { %4094 = vmatprep.subr.mxu1 %v4354_v0  ;;  %4073 = vmatprep.subr.mxu0 %v4354_v0 }
  0x9e   :  { %4095 = vmatpush3.msra.mxu1 %v371_v37  ;;  %4074 = vmatpush3.msra.mxu0 %v3809_v44  ;;  %v3814_v37 = vld [vmem:[%s6824_s0 + $0x28] sm:$0xff]  ;;  %v3829_v44 = vld [vmem:[%s6825_s3 + $0xa0] sm:$0xff] }
  0x9f   :  { %4096 = vmatprep.subr.mxu1 %v4354_v0  ;;  %4075 = vmatprep.subr.mxu0 %v4354_v0 }
  0xa0   :  { %4097 = vmatpush3.msra.mxu1 %v370_v38  ;;  %4076 = vmatpush3.msra.mxu0 %v3808_v45  ;;  %v5020_v38 = vld [vmem:[%s6823_s1 + $0x70] sm:$0xff] }
  0xa1   :  { %4098 = vmatprep.subr.mxu1 %v4354_v0  ;;  %4077 = vmatprep.subr.mxu0 %v4354_v0 }
  0xa2   :  { %4099 = vmatpush3.msra.mxu1 %v369_v39  ;;  %4078 = vmatpush3.msra.mxu0 %v3807_v46  ;;  %v3819_v39 = vld [vmem:[%s6824_s0 + $0x140] sm:$0xff] }
  0xa3   :  { %4100 = vmatprep.subr.mxu1 %v4354_v0  ;;  %4079 = vmatprep.subr.mxu0 %v4354_v0 }
  0xa4   :  { %4101 = vmatpush3.msra.mxu1 %v368_v40  ;;  %4080 = vmatpush3.msra.mxu0 %v3806_v47  ;;  %v5213_v40 = vld [vmem:[%s6823_s1 + $0x80] sm:$0xff]  ;;  %v3828_v47 = vld [vmem:[%s6825_s3 + $0x98] sm:$0xff] }
  0xa5   :  { %4102 = vmatprep.subr.mxu1 %v4354_v0  ;;  %4081 = vmatprep.subr.mxu0 %v4354_v0 }
  0xa6   :  { %4103 = vmatpush3.msra.mxu1 %v367_v41  ;;  %4082 = vmatpush3.msra.mxu0 %v3805_v48  ;;  %v3832_v41 = vld [vmem:[%s6825_s3 + $0xb8] sm:$0xff]  ;;  %v3827_v48 = vld [vmem:[%s6825_s3 + $0x90] sm:$0xff] }
  0xa7   :  { %4104 = vmatprep.subr.mxu1 %v4354_v0  ;;  %4083 = vmatprep.subr.mxu0 %v4354_v0 }
  0xa8   :  { %4105 = vmatpush3.msra.mxu1 %v366_v42  ;;  %4084 = vmatpush3.msra.mxu0 %v3804_v49  ;;  %v3831_v42 = vld [vmem:[%s6825_s3 + $0xb0] sm:$0xff]  ;;  %v3826_v49 = vld [vmem:[%s6825_s3 + $0x88] sm:$0xff] }
  0xa9   :  { %921 = vmatprep.subr.mxu1 %v4354_v0  ;;  %4085 = vmatprep.subr.mxu0 %v4354_v0 }
  0xaa   :  { %4086 = vmatpush3.msra.mxu0 %v3803_v50  ;;  %v3825_v50 = vld [vmem:[%s6825_s3 + $0x80] sm:$0xff] }
  0xab   :  { %845 = vmatprep.subr.mxu0 %v4354_v0 }
  0xe5   :  { %v122_v51 = vpop.f32.mrf.mxu0 }
  0xe7   :  { %v198_v52 = vpop.f32.mrf.mxu1  ;;  %v124_v53 = vpop.f32.mrf.mxu0 }
  0xe8   :  { %v202_v55 = vmax.f32 %v122_v51, %v198_v52  ;;  %v3835_v51 = vld [vmem:[%s6824_s0 + $0x38] sm:$0xff]  ;;  %v3834_v52 = vld [vmem:[%s6824_s0 + $0x30] sm:$0xff] }
  0xe9   :  { %v200_v54 = vpop.f32.mrf.mxu1 }
 0x10b   :  { %v275_v56 = vpop.f32.mrf.mxu0 }
 0x10c   :  { %v279_v57 = vmax.f32 %v202_v55, %v275_v56  ;;  %v3841_v55 = vld [vmem:[%s6824_s0 + $0x158] sm:$0xff]  ;;  %v3840_v56 = vld [vmem:[%s6824_s0 + $0x150] sm:$0xff] }
 0x10d   :  { %v352_v58 = vpop.f32.mrf.mxu1  ;;  %v277_v60 = vpop.f32.mrf.mxu0 }
 0x10e   :  { %v356_v61 = vmax.f32 %v279_v57, %v352_v58 }
 0x10f   :  { %v354_v62 = vpop.f32.mrf.mxu1 }
 0x110   :  { %v364_v63 = vadd.f32 %v4913_v59, %v356_v61 }
 0x112   :  { %v365_v19 = vmax.f32 %v364_v63, 0.0 }
 0x114   :  { %4107 = vmatmul.mubr.msk.f32.vlgmr.msra.gmra.mxu1 %vm692_vm2, %v365_v19 }
 0x115   :  { %922 = vmatpush1.msra.mxu1 %v4411_v1  ;;  %3818 = vmatprep.mubr.msk.f32.mxu1 %vm52_vm0, %v3817_v20 }
 0x116   :  { %923 = vmatprep.subr.mxu1 %v4354_v0 }
 0x117   :  { %924 = vmatpush1.msra.mxu1 %v4416_v2 }
 0x118   :  { %925 = vmatprep.subr.mxu1 %v4354_v0 }
 0x119   :  { %926 = vmatpush1.msra.mxu1 %v4425_v3 }
 0x11a   :  { %927 = vmatprep.subr.mxu1 %v4354_v0 }
 0x11b   :  { %928 = vmatpush1.msra.mxu1 %v4434_v4 }
 0x11c   :  { %929 = vmatprep.subr.mxu1 %v4354_v0 }
 0x11d   :  { %930 = vmatpush1.msra.mxu1 %v4443_v5 }
 0x11e   :  { %931 = vmatprep.subr.mxu1 %v4354_v0 }
 0x11f   :  { %932 = vmatpush1.msra.mxu1 %v4452_v6 }
 0x120   :  { %933 = vmatprep.subr.mxu1 %v4354_v0 }
 0x121   :  { %934 = vmatpush1.msra.mxu1 %v4461_v7 }
 0x122   :  { %935 = vmatprep.subr.mxu1 %v4354_v0 }
 0x123   :  { %936 = vmatpush1.msra.mxu1 %v4470_v8 }
 0x124   :  { %937 = vmatprep.subr.mxu1 %v4354_v0 }
 0x125   :  { %938 = vmatpush1.msra.mxu1 %v4479_v9 }
 0x126   :  { %939 = vmatprep.subr.mxu1 %v4354_v0 }
 0x127   :  { %940 = vmatpush1.msra.mxu1 %v4488_v10 }
 0x128   :  { %941 = vmatprep.subr.mxu1 %v4354_v0 }
 0x129   :  { %942 = vmatpush1.msra.mxu1 %v4497_v11 }
 0x12a   :  { %943 = vmatprep.subr.mxu1 %v4354_v0 }
 0x12b   :  { %944 = vmatpush1.msra.mxu1 %v4506_v12 }
 0x12c   :  { %945 = vmatprep.subr.mxu1 %v4354_v0 }
 0x12d   :  { %946 = vmatpush1.msra.mxu1 %v4515_v13 }
 0x12e   :  { %947 = vmatprep.subr.mxu1 %v4354_v0 }
 0x12f   :  { %948 = vmatpush1.msra.mxu1 %v4524_v14 }
 0x130   :  { %949 = vmatprep.subr.mxu1 %v4354_v0 }
 0x131   :  { %v446_v21 = vpop.f32.mrf.mxu0  ;;  %950 = vmatpush1.msra.mxu1 %v4533_v15 }
 0x132   :  { %951 = vmatprep.subr.mxu1 %v4354_v0 }
 0x133   :  { %v522_v22 = vpop.f32.mrf.mxu1  ;;  %v448_v23 = vpop.f32.mrf.mxu0  ;;  %952 = vmatpush1.msra.mxu1 %v4542_v16 }
 0x134   :  { %981 = vmatprep.subr.mxu1 %v4354_v0  ;;  %v526_v27 = vmax.f32 %v446_v21, %v522_v22 }
 0x135   :  { %v524_v24 = vpop.f32.mrf.mxu1  ;;  %982 = vmatpush2.msra.mxu1 %v4551_v17 }
 0x136   :  { %983 = vmatprep.subr.mxu1 %v4354_v0 }
 0x137   :  { %984 = vmatpush2.msra.mxu1 %v4560_v18 }
 0x138   :  { %1075 = vmatprep.subr.mxu1 %v4354_v0  ;;  %986 = vmatmul.mubr.f32.vlgmr.msra.gmra.mxu1 %v3816_v25 }
 0x139   :  { %1076 = vmatpush1.msra.mxu1 %v4411_v1  ;;  %3824 = vmatprep.mubr.msk.f32.mxu1 %vm52_vm0, %v3823_v26  ;;  %v3838_v26 = vld [vmem:[%s6824_s0 + $0xc8] sm:$0xff] }
 0x13a   :  { %1077 = vmatprep.subr.mxu1 %v4354_v0 }
 0x13b   :  { %1078 = vmatpush1.msra.mxu1 %v4416_v2 }
 0x13c   :  { %1079 = vmatprep.subr.mxu1 %v4354_v0 }
 0x13d   :  { %1080 = vmatpush1.msra.mxu1 %v4425_v3 }
 0x13e   :  { %1081 = vmatprep.subr.mxu1 %v4354_v0 }
 0x13f   :  { %1082 = vmatpush1.msra.mxu1 %v4434_v4 }
 0x140   :  { %1083 = vmatprep.subr.mxu1 %v4354_v0 }
 0x141   :  { %1084 = vmatpush1.msra.mxu1 %v4443_v5 }
 0x142   :  { %1085 = vmatprep.subr.mxu1 %v4354_v0 }
 0x143   :  { %1086 = vmatpush1.msra.mxu1 %v4452_v6 }
 0x144   :  { %1087 = vmatprep.subr.mxu1 %v4354_v0 }
 0x145   :  { %1088 = vmatpush1.msra.mxu1 %v4461_v7 }
 0x146   :  { %1089 = vmatprep.subr.mxu1 %v4354_v0 }
 0x147   :  { %1090 = vmatpush1.msra.mxu1 %v4470_v8 }
 0x148   :  { %1091 = vmatprep.subr.mxu1 %v4354_v0 }
 0x149   :  { %1092 = vmatpush1.msra.mxu1 %v4479_v9 }
 0x14a   :  { %1093 = vmatprep.subr.mxu1 %v4354_v0 }
 0x14b   :  { %1094 = vmatpush1.msra.mxu1 %v4488_v10 }
 0x14c   :  { %1095 = vmatprep.subr.mxu1 %v4354_v0 }
 0x14d   :  { %1096 = vmatpush1.msra.mxu1 %v4497_v11 }
 0x14e   :  { %1097 = vmatprep.subr.mxu1 %v4354_v0 }
 0x14f   :  { %1098 = vmatpush1.msra.mxu1 %v4506_v12 }
 0x150   :  { %1099 = vmatprep.subr.mxu1 %v4354_v0 }
 0x151   :  { %1100 = vmatpush1.msra.mxu1 %v4515_v13 }
 0x152   :  { %1101 = vmatprep.subr.mxu1 %v4354_v0 }
 0x153   :  { %1102 = vmatpush1.msra.mxu1 %v4524_v14 }
 0x154   :  { %1103 = vmatprep.subr.mxu1 %v4354_v0 }
 0x155   :  { %1104 = vmatpush1.msra.mxu1 %v4533_v15 }
 0x156   :  { %1105 = vmatprep.subr.mxu1 %v4354_v0 }
 0x157   :  { %1106 = vmatpush1.msra.mxu1 %v4542_v16 }
 0x158   :  { %v599_v28 = vpop.f32.mrf.mxu0  ;;  %v676_v29 = vpop.f32.mrf.mxu1  ;;  %1135 = vmatprep.subr.mxu1 %v4354_v0 }
 0x159   :  { %v603_v30 = vmax.f32 %v526_v27, %v599_v28  ;;  %1136 = vmatpush2.msra.mxu1 %v4551_v17  ;;  %v3837_v27 = vld [vmem:[%s6824_s0 + $0xc0] sm:$0xff]  ;;  %v3844_v28 = vld [vmem:[%s6824_s0 + $0x1e8] sm:$0xff] }
 0x15a   :  { %v601_v32 = vpop.f32.mrf.mxu0  ;;  %v678_v33 = vpop.f32.mrf.mxu1  ;;  %1137 = vmatprep.subr.mxu1 %v4354_v0 }
 0x15b   :  { %v680_v34 = vmax.f32 %v603_v30, %v676_v29  ;;  %1138 = vmatpush2.msra.mxu1 %v4560_v18  ;;  %v3843_v30 = vld [vmem:[%s6824_s0 + $0x1e0] sm:$0xff]  ;;  %v3853_v33 = vld [vmem:[%s6825_s3 + $0xf8] sm:$0xff] }
 0x15c   :  { %1140 = vmatmul.mubr.f32.vlgmr.msra.gmra.mxu1 %v3822_v31  ;;  %1237 = vmatprep.subr.mxu1 %v4354_v0 }
 0x15d   :  { %v681_v35 = vadd.f32 %v4913_v59, %v680_v34  ;;  %1238 = vmatpush1.msra.mxu1 %v4411_v1  ;;  %3836 = vmatprep.mubr.msk.f32.mxu1 %vm52_vm0, %v3835_v51  ;;  %v3852_v34 = vld [vmem:[%s6825_s3 + $0xf0] sm:$0xff] }
 0x15e   :  { %1239 = vmatprep.subr.mxu1 %v4354_v0 }
 0x15f   :  { %v682_v36 = vmax.f32 %v681_v35, 0.0  ;;  %1240 = vmatpush1.msra.mxu1 %v4416_v2  ;;  %v3820_v2 = vld [vmem:[%s6824_s0 + $0x148] sm:$0xff] }
 0x160   :  { %1241 = vmatprep.subr.mxu1 %v4354_v0  ;;  %v3851_v35 = vld [vmem:[%s6825_s3 + $0xe8] sm:$0xff] }
 0x161   :  { %4088 = vmatmul.mubr.msk.f32.vlgmr.msra.gmra.mxu0 %vm692_vm2, %v682_v36  ;;  %1242 = vmatpush1.msra.mxu1 %v4425_v3 }
 0x162   :  { %846 = vmatpush1.msra.mxu0 %v4411_v1  ;;  %3815 = vmatprep.mubr.msk.f32.mxu0 %vm52_vm0, %v3814_v37  ;;  %v3813_v1 = vld [vmem:[%s6824_s0 + $0x20] sm:$0xff] }
 0x163   :  { %847 = vmatprep.subr.mxu0 %v4354_v0  ;;  %1243 = vmatprep.subr.mxu1 %v4354_v0  ;;  %v3850_v37 = vld [vmem:[%s6825_s3 + $0xe0] sm:$0xff] }
 0x164   :  { %848 = vmatpush1.msra.mxu0 %v5020_v38  ;;  %1244 = vmatpush1.msra.mxu1 %v4434_v4 }
 0x165   :  { %849 = vmatprep.subr.mxu0 %v4354_v0  ;;  %1245 = vmatprep.subr.mxu1 %v4354_v0 }
 0x166   :  { %850 = vmatpush1.msra.mxu0 %v4425_v3  ;;  %1246 = vmatpush1.msra.mxu1 %v4443_v5  ;;  %v5095_v3 = vld [vmem:[%s6823_s1 + $0x78] sm:$0xff] }
 0x167   :  { %851 = vmatprep.subr.mxu0 %v4354_v0  ;;  %1247 = vmatprep.subr.mxu1 %v4354_v0 }
 0x168   :  { %852 = vmatpush1.msra.mxu0 %v4434_v4  ;;  %1248 = vmatpush1.msra.mxu1 %v4452_v6  ;;  %v5105_v4 = vld [vmem:[%s6823_s1 + $0x68] sm:$0xff] }
 0x169   :  { %853 = vmatprep.subr.mxu0 %v4354_v0  ;;  %1249 = vmatprep.subr.mxu1 %v4354_v0 }
 0x16a   :  { %854 = vmatpush1.msra.mxu0 %v4443_v5  ;;  %1250 = vmatpush1.msra.mxu1 %v4461_v7  ;;  %v5112_v5 = vld [vmem:[%s6823_s1 + $0x60] sm:$0xff] }
 0x16b   :  { %855 = vmatprep.subr.mxu0 %v4354_v0  ;;  %1251 = vmatprep.subr.mxu1 %v4354_v0 }
 0x16c   :  { %856 = vmatpush1.msra.mxu0 %v4452_v6  ;;  %1252 = vmatpush1.msra.mxu1 %v4470_v8  ;;  %v5119_v6 = vld [vmem:[%s6823_s1 + $0x58] sm:$0xff] }
 0x16d   :  { %857 = vmatprep.subr.mxu0 %v4354_v0  ;;  %1253 = vmatprep.subr.mxu1 %v4354_v0 }
 0x16e   :  { %858 = vmatpush1.msra.mxu0 %v4461_v7  ;;  %1254 = vmatpush1.msra.mxu1 %v4479_v9  ;;  %v5126_v7 = vld [vmem:[%s6823_s1 + $0x50] sm:$0xff] }
 0x16f   :  { %859 = vmatprep.subr.mxu0 %v4354_v0  ;;  %1255 = vmatprep.subr.mxu1 %v4354_v0 }
 0x170   :  { %860 = vmatpush1.msra.mxu0 %v4470_v8  ;;  %1256 = vmatpush1.msra.mxu1 %v4488_v10  ;;  %v5133_v8 = vld [vmem:[%s6823_s1 + $0x48] sm:$0xff] }
 0x171   :  { %861 = vmatprep.subr.mxu0 %v4354_v0  ;;  %1257 = vmatprep.subr.mxu1 %v4354_v0 }
 0x172   :  { %862 = vmatpush1.msra.mxu0 %v4479_v9  ;;  %1258 = vmatpush1.msra.mxu1 %v4497_v11  ;;  %v5140_v9 = vld [vmem:[%s6823_s1 + $0x40] sm:$0xff] }
 0x173   :  { %863 = vmatprep.subr.mxu0 %v4354_v0  ;;  %1259 = vmatprep.subr.mxu1 %v4354_v0 }
 0x174   :  { %864 = vmatpush1.msra.mxu0 %v4488_v10  ;;  %1260 = vmatpush1.msra.mxu1 %v4506_v12  ;;  %v5147_v10 = vld [vmem:[%s6823_s1 + $0x38] sm:$0xff] }
 0x175   :  { %865 = vmatprep.subr.mxu0 %v4354_v0  ;;  %1261 = vmatprep.subr.mxu1 %v4354_v0 }
 0x176   :  { %866 = vmatpush1.msra.mxu0 %v4497_v11  ;;  %1262 = vmatpush1.msra.mxu1 %v4515_v13  ;;  %v5154_v11 = vld [vmem:[%s6823_s1 + $0x30] sm:$0xff] }
 0x177   :  { %867 = vmatprep.subr.mxu0 %v4354_v0  ;;  %1263 = vmatprep.subr.mxu1 %v4354_v0 }
 0x178   :  { %868 = vmatpush1.msra.mxu0 %v4506_v12  ;;  %1264 = vmatpush1.msra.mxu1 %v4524_v14  ;;  %v5161_v12 = vld [vmem:[%s6823_s1 + $0x28] sm:$0xff] }
 0x179   :  { %869 = vmatprep.subr.mxu0 %v4354_v0  ;;  %1265 = vmatprep.subr.mxu1 %v4354_v0 }
 0x17a   :  { %870 = vmatpush1.msra.mxu0 %v4515_v13  ;;  %1266 = vmatpush1.msra.mxu1 %v4533_v15  ;;  %v5168_v13 = vld [vmem:[%s6823_s1 + $0x20] sm:$0xff] }
 0x17b   :  { %871 = vmatprep.subr.mxu0 %v4354_v0  ;;  %1267 = vmatprep.subr.mxu1 %v4354_v0 }
 0x17c   :  { %872 = vmatpush1.msra.mxu0 %v4524_v14  ;;  %1268 = vmatpush1.msra.mxu1 %v4542_v16  ;;  %v5175_v14 = vld [vmem:[%s6823_s1 + $0x18] sm:$0xff] }
 0x17d   :  { %873 = vmatprep.subr.mxu0 %v4354_v0  ;;  %1297 = vmatprep.subr.mxu1 %v4354_v0 }
 0x17e   :  { %874 = vmatpush1.msra.mxu0 %v4533_v15  ;;  %1298 = vmatpush2.msra.mxu1 %v4551_v17  ;;  %v5182_v15 = vld [vmem:[%s6823_s1 + $0x10] sm:$0xff] }
 0x17f   :  { %875 = vmatprep.subr.mxu0 %v4354_v0  ;;  %1299 = vmatprep.subr.mxu1 %v4354_v0 }
 0x180   :  { %876 = vmatpush1.msra.mxu0 %v4542_v16  ;;  %1300 = vmatpush2.msra.mxu1 %v4560_v18  ;;  %v5189_v16 = vld [vmem:[%s6823_s1 + $0x8] sm:$0xff] }
 0x181   :  { %905 = vmatprep.subr.mxu0 %v4354_v0  ;;  %1390 = vmatprep.subr.mxu1 %v4354_v0 }
 0x182   :  { %906 = vmatpush2.msra.mxu0 %v4551_v17  ;;  %v5196_v17 = vld [vmem:[%s6823_s1] sm:$0xff]  ;;  %1302 = vmatmul.mubr.f32.vlgmr.msra.gmra.mxu1 %v3834_v52 }
 0x183   :  { %907 = vmatprep.subr.mxu0 %v4354_v0  ;;  %1391 = vmatpush1.msra.mxu1 %v5095_v3 }
 0x184   :  { %908 = vmatpush2.msra.mxu0 %v4560_v18  ;;  %v5203_v18 = vld [vmem:[%s6823_s1 + $0x88] sm:$0xff]  ;;  %1392 = vmatprep.subr.mxu1 %v4354_v0 }
 0x185   :  { %910 = vmatmul.mubr.f32.vlgmr.msra.gmra.mxu0 %v3813_v1  ;;  %998 = vmatprep.subr.mxu0 %v4354_v0  ;;  %v3849_v1 = vld [vmem:[%s6825_s3 + $0xd8] sm:$0xff] }
 0x186   :  { %999 = vmatpush1.msra.mxu0 %v5095_v3  ;;  %3821 = vmatprep.mubr.msk.f32.mxu0 %vm52_vm0, %v3820_v2  ;;  %v3848_v2 = vld [vmem:[%s6825_s3 + $0xd0] sm:$0xff] }
 0x187   :  { %1000 = vmatprep.subr.mxu0 %v4354_v0  ;;  %1393 = vmatpush1.msra.mxu1 %v5020_v38 }
 0x188   :  { %1001 = vmatpush1.msra.mxu0 %v5020_v38  ;;  %1394 = vmatprep.subr.mxu1 %v4354_v0 }
 0x189   :  { %1002 = vmatprep.subr.mxu0 %v4354_v0  ;;  %1395 = vmatpush1.msra.mxu1 %v5105_v4 }
 0x18a   :  { %1003 = vmatpush1.msra.mxu0 %v5105_v4  ;;  %1396 = vmatprep.subr.mxu1 %v4354_v0 }
 0x18b   :  { %1004 = vmatprep.subr.mxu0 %v4354_v0  ;;  %1397 = vmatpush1.msra.mxu1 %v5112_v5 }
 0x18c   :  { %1005 = vmatpush1.msra.mxu0 %v5112_v5  ;;  %1398 = vmatprep.subr.mxu1 %v4354_v0 }
 0x18d   :  { %1006 = vmatprep.subr.mxu0 %v4354_v0  ;;  %1399 = vmatpush1.msra.mxu1 %v5119_v6 }
 0x18e   :  { %1007 = vmatpush1.msra.mxu0 %v5119_v6  ;;  %1400 = vmatprep.subr.mxu1 %v4354_v0 }
 0x18f   :  { %1008 = vmatprep.subr.mxu0 %v4354_v0  ;;  %1401 = vmatpush1.msra.mxu1 %v5126_v7 }
 0x190   :  { %1009 = vmatpush1.msra.mxu0 %v5126_v7  ;;  %1402 = vmatprep.subr.mxu1 %v4354_v0 }
 0x191   :  { %1010 = vmatprep.subr.mxu0 %v4354_v0  ;;  %1403 = vmatpush1.msra.mxu1 %v5133_v8 }
 0x192   :  { %1011 = vmatpush1.msra.mxu0 %v5133_v8  ;;  %1404 = vmatprep.subr.mxu1 %v4354_v0 }
 0x193   :  { %1012 = vmatprep.subr.mxu0 %v4354_v0  ;;  %1405 = vmatpush1.msra.mxu1 %v5140_v9 }
 0x194   :  { %1013 = vmatpush1.msra.mxu0 %v5140_v9  ;;  %1406 = vmatprep.subr.mxu1 %v4354_v0 }
 0x195   :  { %1014 = vmatprep.subr.mxu0 %v4354_v0  ;;  %1407 = vmatpush1.msra.mxu1 %v5147_v10 }
 0x196   :  { %1015 = vmatpush1.msra.mxu0 %v5147_v10  ;;  %1408 = vmatprep.subr.mxu1 %v4354_v0 }
 0x197   :  { %1016 = vmatprep.subr.mxu0 %v4354_v0  ;;  %1409 = vmatpush1.msra.mxu1 %v5154_v11 }
 0x198   :  { %1017 = vmatpush1.msra.mxu0 %v5154_v11  ;;  %1410 = vmatprep.subr.mxu1 %v4354_v0 }
 0x199   :  { %1018 = vmatprep.subr.mxu0 %v4354_v0  ;;  %1411 = vmatpush1.msra.mxu1 %v5161_v12 }
 0x19a   :  { %1019 = vmatpush1.msra.mxu0 %v5161_v12  ;;  %1412 = vmatprep.subr.mxu1 %v4354_v0 }
 0x19b   :  { %1020 = vmatprep.subr.mxu0 %v4354_v0  ;;  %1413 = vmatpush1.msra.mxu1 %v5168_v13 }
 0x19c   :  { %1021 = vmatpush1.msra.mxu0 %v5168_v13  ;;  %1414 = vmatprep.subr.mxu1 %v4354_v0 }
 0x19d   :  { %1022 = vmatprep.subr.mxu0 %v4354_v0  ;;  %1415 = vmatpush1.msra.mxu1 %v5175_v14 }
 0x19e   :  { %1023 = vmatpush1.msra.mxu0 %v5175_v14  ;;  %1416 = vmatprep.subr.mxu1 %v4354_v0 }
 0x19f   :  { %1024 = vmatprep.subr.mxu0 %v4354_v0  ;;  %1417 = vmatpush1.msra.mxu1 %v5182_v15 }
 0x1a0   :  { %1025 = vmatpush1.msra.mxu0 %v5182_v15  ;;  %1418 = vmatprep.subr.mxu1 %v4354_v0 }
 0x1a1   :  { %1026 = vmatprep.subr.mxu0 %v4354_v0  ;;  %1419 = vmatpush1.msra.mxu1 %v5189_v16 }
 0x1a2   :  { %1027 = vmatpush1.msra.mxu0 %v5189_v16  ;;  %1420 = vmatprep.subr.mxu1 %v4354_v0 }
 0x1a3   :  { %1028 = vmatprep.subr.mxu0 %v4354_v0  ;;  %1421 = vmatpush1.msra.mxu1 %v5196_v17 }
 0x1a4   :  { %1029 = vmatpush1.msra.mxu0 %v5196_v17  ;;  %1450 = vmatprep.subr.mxu1 %v4354_v0 }
 0x1a5   :  { %1058 = vmatprep.subr.mxu0 %v4354_v0  ;;  %1451 = vmatpush2.msra.mxu1 %v5203_v18 }
 0x1a6   :  { %1059 = vmatpush2.msra.mxu0 %v5203_v18  ;;  %1452 = vmatprep.subr.mxu1 %v4354_v0 }
 0x1a7   :  { %1060 = vmatprep.subr.mxu0 %v4354_v0  ;;  %3842 = vmatprep.mubr.msk.f32.mxu1 %vm52_vm0, %v3841_v55 }
 0x1a8   :  { %1061 = vmatpush2.msra.mxu0 %v5213_v40  ;;  %1453 = vmatpush2.msra.mxu1 %v5213_v40 }
 0x1a9   :  { %1063 = vmatmul.mubr.f32.vlgmr.msra.gmra.mxu0 %v3819_v39  ;;  %4109 = vmatprep.subr.mxu0 %v4354_v0  ;;  %v3847_v39 = vld [vmem:[%s6825_s3 + $0xc8] sm:$0xff] }
 0x1aa   :  { %4125 = vmatprep.mubr.msk.f32.mxu0 %vm4355_vm1, %v4354_v0  ;;  %4110 = vmatpush3.msra.mxu0 %v3832_v41  ;;  %v3846_v41 = vld [vmem:[%s6825_s3 + $0xc0] sm:$0xff] }
 0x1ab   :  { %4111 = vmatprep.subr.mxu0 %v4354_v0  ;;  %1455 = vmatmul.mubr.f32.vlgmr.msra.gmra.mxu1 %v3840_v56 }
 0x1ac   :  { %4112 = vmatpush3.msra.mxu0 %v3831_v42  ;;  %4128 = vmatprep.subr.mxu1 %v4354_v0  ;;  %v3856_v42 = vld [vmem:[%s6824_s0 + $0x48] sm:$0xff] }
 0x1ad   :  { %4113 = vmatprep.subr.mxu0 %v4354_v0  ;;  %4144 = vmatprep.mubr.msk.f32.mxu1 %vm4355_vm1, %v4354_v0 }
 0x1ae   :  { %4114 = vmatpush3.msra.mxu0 %v3830_v43  ;;  %4129 = vmatpush3.msra.mxu1 %v3853_v33  ;;  %v3855_v43 = vld [vmem:[%s6824_s0 + $0x40] sm:$0xff] }
 0x1af   :  { %4115 = vmatprep.subr.mxu0 %v4354_v0  ;;  %4130 = vmatprep.subr.mxu1 %v4354_v0  ;;  %v5777_v33 = vld [vmem:[%s6823_s1 + $0x60] sm:$0xff] }
 0x1b0   :  { %4116 = vmatpush3.msra.mxu0 %v3829_v44  ;;  %4131 = vmatpush3.msra.mxu1 %v3852_v34  ;;  %v3862_v44 = vld [vmem:[%s6824_s0 + $0x168] sm:$0xff]  ;;  %v5784_v34 = vld [vmem:[%s6823_s1 + $0x58] sm:$0xff] }
 0x1b1   :  { %4117 = vmatprep.subr.mxu0 %v4354_v0  ;;  %4132 = vmatprep.subr.mxu1 %v4354_v0 }
 0x1b2   :  { %4118 = vmatpush3.msra.mxu0 %v3828_v47  ;;  %4133 = vmatpush3.msra.mxu1 %v3851_v35  ;;  %v5791_v35 = vld [vmem:[%s6823_s1 + $0x50] sm:$0xff] }
 0x1b3   :  { %4119 = vmatprep.subr.mxu0 %v4354_v0  ;;  %4134 = vmatprep.subr.mxu1 %v4354_v0 }
 0x1b4   :  { %4120 = vmatpush3.msra.mxu0 %v3827_v48  ;;  %4135 = vmatpush3.msra.mxu1 %v3850_v37  ;;  %v5805_v37 = vld [vmem:[%s6823_s1 + $0x40] sm:$0xff] }
 0x1b5   :  { %4121 = vmatprep.subr.mxu0 %v4354_v0  ;;  %4136 = vmatprep.subr.mxu1 %v4354_v0 }
 0x1b6   :  { %4122 = vmatpush3.msra.mxu0 %v3826_v49  ;;  %4137 = vmatpush3.msra.mxu1 %v3849_v1  ;;  %v5812_v1 = vld [vmem:[%s6823_s1 + $0x38] sm:$0xff] }
 0x1b7   :  { %4123 = vmatprep.subr.mxu0 %v4354_v0  ;;  %4138 = vmatprep.subr.mxu1 %v4354_v0 }
 0x1b8   :  { %4124 = vmatpush3.msra.mxu0 %v3825_v50  ;;  %4139 = vmatpush3.msra.mxu1 %v3848_v2  ;;  %v5819_v2 = vld [vmem:[%s6823_s1 + $0x30] sm:$0xff] }
 0x1b9   :  { %1313 = vmatprep.subr.mxu0 %v4354_v0  ;;  %4140 = vmatprep.subr.mxu1 %v4354_v0 }
 0x1ba   :  { %4141 = vmatpush3.msra.mxu1 %v3847_v39  ;;  %v5826_v39 = vld [vmem:[%s6823_s1 + $0x28] sm:$0xff] }
 0x1bb   :  { %4142 = vmatprep.subr.mxu1 %v4354_v0 }
 0x1bc   :  { %4143 = vmatpush3.msra.mxu1 %v3846_v41  ;;  %v5833_v41 = vld [vmem:[%s6823_s1 + $0x20] sm:$0xff] }
 0x1bd   :  { %1705 = vmatprep.subr.mxu1 %v4354_v0 }
 0x1d4   :  { %v5235_v45 = vpop.f32.mrf.mxu1 }
 0x1d6   :  { %v4108_v46 = vpop.f32.mrf.mxu1 }
 0x1d7   :  { %v3861_v46 = vld [vmem:[%s6824_s0 + $0x160] sm:$0xff] }
 0x1f8   :  { %v987_v53 = vpop.f32.mrf.mxu1 }
 0x1fa   :  { %v989_v54 = vpop.f32.mrf.mxu1 }
 0x21c   :  { %v1141_v57 = vpop.f32.mrf.mxu1 }
 0x21e   :  { %v1143_v58 = vpop.f32.mrf.mxu1 }
 0x221   :  { %v5305_v60 = vpop.f32.mrf.mxu0 }
 0x222   :  { %v836_v47 = vadd.f32 %v5235_v45, %v5305_v60  ;;  %v3859_v45 = vld [vmem:[%s6824_s0 + $0xd8] sm:$0xff] }
 0x223   :  { %v4089_v61 = vpop.f32.mrf.mxu0  ;;  %v3865_v60 = vld [vmem:[%s6824_s0 + $0x1f8] sm:$0xff] }
 0x242   :  { %v5387_v29 = vpop.f32.mrf.mxu1 }
 0x244   :  { %v1305_v31 = vpop.f32.mrf.mxu1 }
 0x245   :  { %v911_v62 = vpop.f32.mrf.mxu0  ;;  %v5697_v31 = vld [vmem:[%s6823_s1 + $0x70] sm:$0xff] }
 0x246   :  { %v991_v19 = vmax.f32 %v911_v62, %v987_v53 }
 0x247   :  { %v913_v63 = vpop.f32.mrf.mxu0 }
 0x248   :  { %v3864_v63 = vld [vmem:[%s6824_s0 + $0x1f0] sm:$0xff] }
 0x269   :  { %v1064_v20 = vpop.f32.mrf.mxu0 }
 0x26a   :  { %v1068_v21 = vmax.f32 %v991_v19, %v1064_v20  ;;  %v3874_v20 = vld [vmem:[%s6825_s3 + $0x138] sm:$0xff] }
 0x26b   :  { %v1066_v22 = vpop.f32.mrf.mxu0  ;;  %v5427_v32 = vpop.f32.mrf.mxu1 }
 0x26c   :  { %v1145_v23 = vmax.f32 %v1068_v21, %v1141_v57  ;;  %v3873_v21 = vld [vmem:[%s6825_s3 + $0x130] sm:$0xff]  ;;  %v3872_v22 = vld [vmem:[%s6825_s3 + $0x128] sm:$0xff] }
 0x26d   :  { %v1458_v36 = vpop.f32.mrf.mxu1 }
 0x26e   :  { %v1146_v24 = vadd.f32 %v4913_v59, %v1145_v23  ;;  %v5798_v36 = vld [vmem:[%s6823_s1 + $0x48] sm:$0xff] }
 0x270   :  { %v1147_v25 = vmax.f32 %v1146_v24, 0.0  ;;  %v3871_v24 = vld [vmem:[%s6825_s3 + $0x120] sm:$0xff] }
 0x272   :  { %4126 = vmatmul.mubr.msk.f32.vlgmr.msra.gmra.mxu0 %vm692_vm2, %v1147_v25  ;;  %v3870_v25 = vld [vmem:[%s6825_s3 + $0x118] sm:$0xff] }
 0x273   :  { %1314 = vmatpush1.msra.mxu0 %v5095_v3  ;;  %3839 = vmatprep.mubr.msk.f32.mxu0 %vm52_vm0, %v3838_v26  ;;  %v3869_v26 = vld [vmem:[%s6825_s3 + $0x110] sm:$0xff] }
 0x274   :  { %1315 = vmatprep.subr.mxu0 %v4354_v0 }
 0x275   :  { %1316 = vmatpush1.msra.mxu0 %v5020_v38 }
 0x276   :  { %1317 = vmatprep.subr.mxu0 %v4354_v0 }
 0x277   :  { %1318 = vmatpush1.msra.mxu0 %v5105_v4 }
 0x278   :  { %1319 = vmatprep.subr.mxu0 %v4354_v0 }
 0x279   :  { %1320 = vmatpush1.msra.mxu0 %v5112_v5 }
 0x27a   :  { %1321 = vmatprep.subr.mxu0 %v4354_v0 }
 0x27b   :  { %1322 = vmatpush1.msra.mxu0 %v5119_v6 }
 0x27c   :  { %1323 = vmatprep.subr.mxu0 %v4354_v0 }
 0x27d   :  { %1324 = vmatpush1.msra.mxu0 %v5126_v7 }
 0x27e   :  { %1325 = vmatprep.subr.mxu0 %v4354_v0 }
 0x27f   :  { %1326 = vmatpush1.msra.mxu0 %v5133_v8 }
 0x280   :  { %1327 = vmatprep.subr.mxu0 %v4354_v0 }
 0x281   :  { %1328 = vmatpush1.msra.mxu0 %v5140_v9 }
 0x282   :  { %1329 = vmatprep.subr.mxu0 %v4354_v0 }
 0x283   :  { %1330 = vmatpush1.msra.mxu0 %v5147_v10 }
 0x284   :  { %1331 = vmatprep.subr.mxu0 %v4354_v0 }
 0x285   :  { %1332 = vmatpush1.msra.mxu0 %v5154_v11 }
 0x286   :  { %1333 = vmatprep.subr.mxu0 %v4354_v0 }
 0x287   :  { %1334 = vmatpush1.msra.mxu0 %v5161_v12 }
 0x288   :  { %1335 = vmatprep.subr.mxu0 %v4354_v0 }
 0x289   :  { %1336 = vmatpush1.msra.mxu0 %v5168_v13 }
 0x28a   :  { %1337 = vmatprep.subr.mxu0 %v4354_v0 }
 0x28b   :  { %1338 = vmatpush1.msra.mxu0 %v5175_v14 }
 0x28c   :  { %1339 = vmatprep.subr.mxu0 %v4354_v0 }
 0x28d   :  { %1340 = vmatpush1.msra.mxu0 %v5182_v15 }
 0x28e   :  { %1341 = vmatprep.subr.mxu0 %v4354_v0 }
 0x28f   :  { %1342 = vmatpush1.msra.mxu0 %v5189_v16 }
 0x290   :  { %1343 = vmatprep.subr.mxu0 %v4354_v0 }
 0x291   :  { %1344 = vmatpush1.msra.mxu0 %v5196_v17 }
 0x292   :  { %1373 = vmatprep.subr.mxu0 %v4354_v0 }
 0x293   :  { %1374 = vmatpush2.msra.mxu0 %v5203_v18 }
 0x294   :  { %1375 = vmatprep.subr.mxu0 %v4354_v0 }
 0x295   :  { %1376 = vmatpush2.msra.mxu0 %v5213_v40 }
 0x296   :  { %1378 = vmatmul.mubr.f32.vlgmr.msra.gmra.mxu0 %v3837_v27  ;;  %1467 = vmatprep.subr.mxu0 %v4354_v0  ;;  %v3868_v27 = vld [vmem:[%s6825_s3 + $0x108] sm:$0xff] }
 0x297   :  { %1468 = vmatpush1.msra.mxu0 %v5095_v3  ;;  %3845 = vmatprep.mubr.msk.f32.mxu0 %vm52_vm0, %v3844_v28  ;;  %v3867_v28 = vld [vmem:[%s6825_s3 + $0x100] sm:$0xff] }
 0x298   :  { %1469 = vmatprep.subr.mxu0 %v4354_v0 }
 0x299   :  { %1470 = vmatpush1.msra.mxu0 %v5020_v38 }
 0x29a   :  { %1471 = vmatprep.subr.mxu0 %v4354_v0 }
 0x29b   :  { %1472 = vmatpush1.msra.mxu0 %v5105_v4 }
 0x29c   :  { %1473 = vmatprep.subr.mxu0 %v4354_v0 }
 0x29d   :  { %1474 = vmatpush1.msra.mxu0 %v5112_v5 }
 0x29e   :  { %1475 = vmatprep.subr.mxu0 %v4354_v0 }
 0x29f   :  { %1476 = vmatpush1.msra.mxu0 %v5119_v6 }
 0x2a0   :  { %1477 = vmatprep.subr.mxu0 %v4354_v0 }
 0x2a1   :  { %1478 = vmatpush1.msra.mxu0 %v5126_v7 }
 0x2a2   :  { %1479 = vmatprep.subr.mxu0 %v4354_v0 }
 0x2a3   :  { %1480 = vmatpush1.msra.mxu0 %v5133_v8 }
 0x2a4   :  { %1481 = vmatprep.subr.mxu0 %v4354_v0 }
 0x2a5   :  { %1482 = vmatpush1.msra.mxu0 %v5140_v9 }
 0x2a6   :  { %1483 = vmatprep.subr.mxu0 %v4354_v0 }
 0x2a7   :  { %1484 = vmatpush1.msra.mxu0 %v5147_v10 }
 0x2a8   :  { %1485 = vmatprep.subr.mxu0 %v4354_v0 }
 0x2a9   :  { %1486 = vmatpush1.msra.mxu0 %v5154_v11 }
 0x2aa   :  { %1487 = vmatprep.subr.mxu0 %v4354_v0 }
 0x2ab   :  { %1488 = vmatpush1.msra.mxu0 %v5161_v12 }
 0x2ac   :  { %1489 = vmatprep.subr.mxu0 %v4354_v0 }
 0x2ad   :  { %1490 = vmatpush1.msra.mxu0 %v5168_v13 }
 0x2ae   :  { %1491 = vmatprep.subr.mxu0 %v4354_v0 }
 0x2af   :  { %1492 = vmatpush1.msra.mxu0 %v5175_v14 }
 0x2b0   :  { %1493 = vmatprep.subr.mxu0 %v4354_v0 }
 0x2b1   :  { %1494 = vmatpush1.msra.mxu0 %v5182_v15 }
 0x2b2   :  { %1495 = vmatprep.subr.mxu0 %v4354_v0 }
 0x2b3   :  { %1496 = vmatpush1.msra.mxu0 %v5189_v16 }
 0x2b4   :  { %1497 = vmatprep.subr.mxu0 %v4354_v0 }
 0x2b5   :  { %1498 = vmatpush1.msra.mxu0 %v5196_v17 }
 0x2b6   :  { %1527 = vmatprep.subr.mxu0 %v4354_v0 }
 0x2b7   :  { %1528 = vmatpush2.msra.mxu0 %v5203_v18 }
 0x2b8   :  { %1529 = vmatprep.subr.mxu0 %v4354_v0 }
 0x2b9   :  { %1530 = vmatpush2.msra.mxu0 %v5213_v40 }
 0x2ba   :  { %1532 = vmatmul.mubr.f32.vlgmr.msra.gmra.mxu0 %v3843_v30  ;;  %1629 = vmatprep.subr.mxu0 %v4354_v0  ;;  %v3876_v30 = vld [vmem:[%s6824_s0 + $0x50] sm:$0xff] }
 0x2bb   :  { %1630 = vmatpush1.msra.mxu0 %v5095_v3  ;;  %3857 = vmatprep.mubr.msk.f32.mxu0 %vm52_vm0, %v3856_v42  ;;  %v5840_v42 = vld [vmem:[%s6823_s1 + $0x18] sm:$0xff] }
 0x2bc   :  { %1631 = vmatprep.subr.mxu0 %v4354_v0 }
 0x2bd   :  { %1632 = vmatpush1.msra.mxu0 %v5020_v38 }
 0x2be   :  { %1633 = vmatprep.subr.mxu0 %v4354_v0 }
 0x2bf   :  { %1634 = vmatpush1.msra.mxu0 %v5105_v4 }
 0x2c0   :  { %1635 = vmatprep.subr.mxu0 %v4354_v0 }
 0x2c1   :  { %1636 = vmatpush1.msra.mxu0 %v5112_v5 }
 0x2c2   :  { %1637 = vmatprep.subr.mxu0 %v4354_v0 }
 0x2c3   :  { %1638 = vmatpush1.msra.mxu0 %v5119_v6 }
 0x2c4   :  { %1639 = vmatprep.subr.mxu0 %v4354_v0 }
 0x2c5   :  { %1640 = vmatpush1.msra.mxu0 %v5126_v7 }
 0x2c6   :  { %1641 = vmatprep.subr.mxu0 %v4354_v0 }
 0x2c7   :  { %1642 = vmatpush1.msra.mxu0 %v5133_v8 }
 0x2c8   :  { %1643 = vmatprep.subr.mxu0 %v4354_v0 }
 0x2c9   :  { %1644 = vmatpush1.msra.mxu0 %v5140_v9 }
 0x2ca   :  { %1645 = vmatprep.subr.mxu0 %v4354_v0 }
 0x2cb   :  { %1646 = vmatpush1.msra.mxu0 %v5147_v10 }
 0x2cc   :  { %1647 = vmatprep.subr.mxu0 %v4354_v0 }
 0x2cd   :  { %1648 = vmatpush1.msra.mxu0 %v5154_v11 }
 0x2ce   :  { %1649 = vmatprep.subr.mxu0 %v4354_v0 }
 0x2cf   :  { %1650 = vmatpush1.msra.mxu0 %v5161_v12 }
 0x2d0   :  { %1651 = vmatprep.subr.mxu0 %v4354_v0 }
 0x2d1   :  { %1652 = vmatpush1.msra.mxu0 %v5168_v13 }
 0x2d2   :  { %1653 = vmatprep.subr.mxu0 %v4354_v0 }
 0x2d3   :  { %1654 = vmatpush1.msra.mxu0 %v5175_v14 }
 0x2d4   :  { %1655 = vmatprep.subr.mxu0 %v4354_v0 }
 0x2d5   :  { %1656 = vmatpush1.msra.mxu0 %v5182_v15 }
 0x2d6   :  { %1657 = vmatprep.subr.mxu0 %v4354_v0 }
 0x2d7   :  { %1658 = vmatpush1.msra.mxu0 %v5189_v16 }
 0x2d8   :  { %1659 = vmatprep.subr.mxu0 %v4354_v0 }
 0x2d9   :  { %1660 = vmatpush1.msra.mxu0 %v5196_v17 }
 0x2da   :  { %1689 = vmatprep.subr.mxu0 %v4354_v0 }
 0x2db   :  { %1690 = vmatpush2.msra.mxu0 %v5203_v18 }
 0x2dc   :  { %1691 = vmatprep.subr.mxu0 %v4354_v0 }
 0x2dd   :  { %1692 = vmatpush2.msra.mxu0 %v5213_v40 }
 0x2de   :  { %1782 = vmatprep.subr.mxu0 %v4354_v0  ;;  %1694 = vmatmul.mubr.f32.vlgmr.msra.gmra.mxu0 %v3855_v43  ;;  %v5847_v43 = vld [vmem:[%s6823_s1 + $0x10] sm:$0xff] }
 0x2df   :  { %1783 = vmatpush1.msra.mxu0 %v5095_v3  ;;  %3863 = vmatprep.mubr.msk.f32.mxu0 %vm52_vm0, %v3862_v44  ;;  %v5854_v44 = vld [vmem:[%s6823_s1 + $0x8] sm:$0xff] }
 0x2e0   :  { %1784 = vmatprep.subr.mxu0 %v4354_v0 }
 0x2e1   :  { %1785 = vmatpush1.msra.mxu0 %v5020_v38 }
 0x2e2   :  { %1786 = vmatprep.subr.mxu0 %v4354_v0 }
 0x2e3   :  { %1787 = vmatpush1.msra.mxu0 %v5105_v4 }
 0x2e4   :  { %1788 = vmatprep.subr.mxu0 %v4354_v0 }
 0x2e5   :  { %1789 = vmatpush1.msra.mxu0 %v5112_v5 }
 0x2e6   :  { %1790 = vmatprep.subr.mxu0 %v4354_v0 }
 0x2e7   :  { %1791 = vmatpush1.msra.mxu0 %v5119_v6 }
 0x2e8   :  { %1792 = vmatprep.subr.mxu0 %v4354_v0 }
 0x2e9   :  { %1793 = vmatpush1.msra.mxu0 %v5126_v7 }
 0x2ea   :  { %1794 = vmatprep.subr.mxu0 %v4354_v0 }
 0x2eb   :  { %1795 = vmatpush1.msra.mxu0 %v5133_v8 }
 0x2ec   :  { %1796 = vmatprep.subr.mxu0 %v4354_v0 }
 0x2ed   :  { %1797 = vmatpush1.msra.mxu0 %v5140_v9 }
 0x2ee   :  { %1798 = vmatprep.subr.mxu0 %v4354_v0 }
 0x2ef   :  { %1799 = vmatpush1.msra.mxu0 %v5147_v10 }
 0x2f0   :  { %1800 = vmatprep.subr.mxu0 %v4354_v0 }
 0x2f1   :  { %1801 = vmatpush1.msra.mxu0 %v5154_v11 }
 0x2f2   :  { %1802 = vmatprep.subr.mxu0 %v4354_v0 }
 0x2f3   :  { %1803 = vmatpush1.msra.mxu0 %v5161_v12 }
 0x2f4   :  { %1804 = vmatprep.subr.mxu0 %v4354_v0 }
 0x2f5   :  { %1805 = vmatpush1.msra.mxu0 %v5168_v13 }
 0x2f6   :  { %1806 = vmatprep.subr.mxu0 %v4354_v0 }
 0x2f7   :  { %1807 = vmatpush1.msra.mxu0 %v5175_v14 }
 0x2f8   :  { %1808 = vmatprep.subr.mxu0 %v4354_v0 }
 0x2f9   :  { %1809 = vmatpush1.msra.mxu0 %v5182_v15 }
 0x2fa   :  { %1810 = vmatprep.subr.mxu0 %v4354_v0 }
 0x2fb   :  { %1811 = vmatpush1.msra.mxu0 %v5189_v16 }
 0x2fc   :  { %1812 = vmatprep.subr.mxu0 %v4354_v0 }
 0x2fd   :  { %1813 = vmatpush1.msra.mxu0 %v5196_v17 }
 0x2fe   :  { %1842 = vmatprep.subr.mxu0 %v4354_v0 }
 0x2ff   :  { %1843 = vmatpush2.msra.mxu0 %v5203_v18 }
 0x300   :  { %1844 = vmatprep.subr.mxu0 %v4354_v0 }
 0x301   :  { %1845 = vmatpush2.msra.mxu0 %v5213_v40 }
 0x302   :  { %1847 = vmatmul.mubr.f32.vlgmr.msra.gmra.mxu0 %v3861_v46  ;;  %4147 = vmatprep.subr.mxu0 %v4354_v0  ;;  %v5861_v46 = vld [vmem:[%s6823_s1] sm:$0xff] }
 0x303   :  { %4163 = vmatprep.mubr.msk.f32.mxu0 %vm4355_vm1, %v4354_v0  ;;  %4148 = vmatpush3.msra.mxu0 %v3874_v20  ;;  %v3903_v20 = vld [vmem:[%s6824_s0 + $0x180] sm:$0xff] }
 0x304   :  { %4149 = vmatprep.subr.mxu0 %v4354_v0 }
 0x305   :  { %4150 = vmatpush3.msra.mxu0 %v3873_v21 }
 0x306   :  { %4151 = vmatprep.subr.mxu0 %v4354_v0 }
 0x307   :  { %4152 = vmatpush3.msra.mxu0 %v3872_v22 }
 0x308   :  { %4153 = vmatprep.subr.mxu0 %v4354_v0 }
 0x309   :  { %4154 = vmatpush3.msra.mxu0 %v3871_v24 }
 0x30a   :  { %4155 = vmatprep.subr.mxu0 %v4354_v0 }
 0x30b   :  { %4156 = vmatpush3.msra.mxu0 %v3870_v25 }
 0x30c   :  { %4157 = vmatprep.subr.mxu0 %v4354_v0 }
 0x30d   :  { %4158 = vmatpush3.msra.mxu0 %v3869_v26 }
 0x30e   :  { %4159 = vmatprep.subr.mxu0 %v4354_v0 }
 0x30f   :  { %4160 = vmatpush3.msra.mxu0 %v3868_v27 }
 0x310   :  { %4161 = vmatprep.subr.mxu0 %v4354_v0 }
 0x311   :  { %4162 = vmatpush3.msra.mxu0 %v3867_v28 }
 0x312   :  { %2097 = vmatprep.subr.mxu0 %v4354_v0 }
 0x332   :  { %v1226_v48 = vpop.f32.mrf.mxu0 }
 0x333   :  { %v5521_v49 = vadd.f32 %v1226_v48, %v836_v47  ;;  %v5868_v47 = vld [vmem:[%s6823_s1 + $0x88] sm:$0xff]  ;;  %v3879_v48 = vld [vmem:[%s6824_s0 + $0xe0] sm:$0xff] }
 0x334   :  { %v4127_v50 = vpop.f32.mrf.mxu0 }
 0x335   :  { %v5881_v50 = vld [vmem:[%s6823_s1 + $0x80] sm:$0xff] }
 0x356   :  { %v1379_v51 = vpop.f32.mrf.mxu0 }
 0x357   :  { %v1383_v53 = vmax.f32 %v5387_v29, %v1379_v51  ;;  %v3877_v29 = vld [vmem:[%s6824_s0 + $0x58] sm:$0xff] }
 0x358   :  { %v1381_v52 = vpop.f32.mrf.mxu0 }
 0x359   :  { %v1460_v54 = vmax.f32 %v1383_v53, %v5427_v32  ;;  %v5770_v32 = vld [vmem:[%s6823_s1 + $0x68] sm:$0xff]  ;;  %v3885_v52 = vld [vmem:[%s6824_s0 + $0x200] sm:$0xff] }
 0x37a   :  { %v1533_v55 = vpop.f32.mrf.mxu0 }
 0x37b   :  { %v1537_v56 = vmax.f32 %v1460_v54, %v1533_v55  ;;  %v3895_v55 = vld [vmem:[%s6825_s3 + $0x178] sm:$0xff] }
 0x37c   :  { %v1535_v57 = vpop.f32.mrf.mxu0 }
 0x37d   :  { %v1538_v58 = vadd.f32 %v4913_v59, %v1537_v56  ;;  %v3858_v59 = vld [vmem:[%s6824_s0 + $0xd0] sm:$0xff]  ;;  %v3893_v57 = vld [vmem:[%s6825_s3 + $0x168] sm:$0xff] }
 0x37e   :  { %v3894_v56 = vld [vmem:[%s6825_s3 + $0x170] sm:$0xff] }
 0x37f   :  { %v1539_v61 = vmax.f32 %v1538_v58, 0.0 }
 0x381   :  { %4145 = vmatmul.mubr.msk.f32.vlgmr.msra.gmra.mxu1 %vm692_vm2, %v1539_v61  ;;  %v3892_v61 = vld [vmem:[%s6825_s3 + $0x160] sm:$0xff] }
 0x382   :  { %1706 = vmatpush1.msra.mxu1 %v5095_v3  ;;  %3860 = vmatprep.mubr.msk.f32.mxu1 %vm52_vm0, %v3859_v45  ;;  %v3891_v45 = vld [vmem:[%s6825_s3 + $0x158] sm:$0xff] }
 0x383   :  { %1707 = vmatprep.subr.mxu1 %v4354_v0 }
 0x384   :  { %1708 = vmatpush1.msra.mxu1 %v5020_v38 }
 0x385   :  { %1709 = vmatprep.subr.mxu1 %v4354_v0 }
 0x386   :  { %1710 = vmatpush1.msra.mxu1 %v5105_v4 }
 0x387   :  { %1711 = vmatprep.subr.mxu1 %v4354_v0 }
 0x388   :  { %1712 = vmatpush1.msra.mxu1 %v5112_v5 }
 0x389   :  { %1713 = vmatprep.subr.mxu1 %v4354_v0 }
 0x38a   :  { %1714 = vmatpush1.msra.mxu1 %v5119_v6 }
 0x38b   :  { %1715 = vmatprep.subr.mxu1 %v4354_v0 }
 0x38c   :  { %1716 = vmatpush1.msra.mxu1 %v5126_v7 }
 0x38d   :  { %1717 = vmatprep.subr.mxu1 %v4354_v0 }
 0x38e   :  { %1718 = vmatpush1.msra.mxu1 %v5133_v8 }
 0x38f   :  { %1719 = vmatprep.subr.mxu1 %v4354_v0 }
 0x390   :  { %1720 = vmatpush1.msra.mxu1 %v5140_v9 }
 0x391   :  { %1721 = vmatprep.subr.mxu1 %v4354_v0 }
 0x392   :  { %1722 = vmatpush1.msra.mxu1 %v5147_v10 }
 0x393   :  { %1723 = vmatprep.subr.mxu1 %v4354_v0 }
 0x394   :  { %1724 = vmatpush1.msra.mxu1 %v5154_v11 }
 0x395   :  { %1725 = vmatprep.subr.mxu1 %v4354_v0 }
 0x396   :  { %1726 = vmatpush1.msra.mxu1 %v5161_v12 }
 0x397   :  { %1727 = vmatprep.subr.mxu1 %v4354_v0 }
 0x398   :  { %1728 = vmatpush1.msra.mxu1 %v5168_v13 }
 0x399   :  { %1729 = vmatprep.subr.mxu1 %v4354_v0 }
 0x39a   :  { %1730 = vmatpush1.msra.mxu1 %v5175_v14 }
 0x39b   :  { %1731 = vmatprep.subr.mxu1 %v4354_v0 }
 0x39c   :  { %1732 = vmatpush1.msra.mxu1 %v5182_v15 }
 0x39d   :  { %1733 = vmatprep.subr.mxu1 %v4354_v0 }
 0x39e   :  { %1734 = vmatpush1.msra.mxu1 %v5189_v16  ;;  %v5605_v62 = vpop.f32.mrf.mxu0 }
 0x39f   :  { %1735 = vmatprep.subr.mxu1 %v4354_v0 }
 0x3a0   :  { %1736 = vmatpush1.msra.mxu1 %v5196_v17  ;;  %v1697_v19 = vpop.f32.mrf.mxu0 }
 0x3a1   :  { %1765 = vmatprep.subr.mxu1 %v4354_v0  ;;  %v3897_v19 = vld [vmem:[%s6824_s0 + $0x60] sm:$0xff] }
 0x3a2   :  { %1766 = vmatpush2.msra.mxu1 %v5203_v18 }
 0x3a3   :  { %1767 = vmatprep.subr.mxu1 %v4354_v0 }
 0x3a4   :  { %1768 = vmatpush2.msra.mxu1 %v5213_v40 }
 0x3a5   :  { %1770 = vmatmul.mubr.f32.vlgmr.msra.gmra.mxu1 %v3858_v59  ;;  %1859 = vmatprep.subr.mxu1 %v4354_v0  ;;  %v3890_v59 = vld [vmem:[%s6825_s3 + $0x150] sm:$0xff] }
 0x3a6   :  { %1860 = vmatpush1.msra.mxu1 %v5095_v3  ;;  %3866 = vmatprep.mubr.msk.f32.mxu1 %vm52_vm0, %v3865_v60  ;;  %v3889_v60 = vld [vmem:[%s6825_s3 + $0x148] sm:$0xff] }
 0x3a7   :  { %1861 = vmatprep.subr.mxu1 %v4354_v0 }
 0x3a8   :  { %1862 = vmatpush1.msra.mxu1 %v5020_v38 }
 0x3a9   :  { %1863 = vmatprep.subr.mxu1 %v4354_v0 }
 0x3aa   :  { %1864 = vmatpush1.msra.mxu1 %v5105_v4 }
 0x3ab   :  { %1865 = vmatprep.subr.mxu1 %v4354_v0 }
 0x3ac   :  { %1866 = vmatpush1.msra.mxu1 %v5112_v5 }
 0x3ad   :  { %1867 = vmatprep.subr.mxu1 %v4354_v0 }
 0x3ae   :  { %1868 = vmatpush1.msra.mxu1 %v5119_v6 }
 0x3af   :  { %1869 = vmatprep.subr.mxu1 %v4354_v0 }
 0x3b0   :  { %1870 = vmatpush1.msra.mxu1 %v5126_v7 }
 0x3b1   :  { %1871 = vmatprep.subr.mxu1 %v4354_v0 }
 0x3b2   :  { %1872 = vmatpush1.msra.mxu1 %v5133_v8 }
 0x3b3   :  { %1873 = vmatprep.subr.mxu1 %v4354_v0 }
 0x3b4   :  { %1874 = vmatpush1.msra.mxu1 %v5140_v9 }
 0x3b5   :  { %1875 = vmatprep.subr.mxu1 %v4354_v0 }
 0x3b6   :  { %1876 = vmatpush1.msra.mxu1 %v5147_v10 }
 0x3b7   :  { %1877 = vmatprep.subr.mxu1 %v4354_v0 }
 0x3b8   :  { %1878 = vmatpush1.msra.mxu1 %v5154_v11 }
 0x3b9   :  { %1879 = vmatprep.subr.mxu1 %v4354_v0 }
 0x3ba   :  { %1880 = vmatpush1.msra.mxu1 %v5161_v12 }
 0x3bb   :  { %1881 = vmatprep.subr.mxu1 %v4354_v0 }
 0x3bc   :  { %1882 = vmatpush1.msra.mxu1 %v5168_v13 }
 0x3bd   :  { %1883 = vmatprep.subr.mxu1 %v4354_v0 }
 0x3be   :  { %1884 = vmatpush1.msra.mxu1 %v5175_v14 }
 0x3bf   :  { %1885 = vmatprep.subr.mxu1 %v4354_v0 }
 0x3c0   :  { %1886 = vmatpush1.msra.mxu1 %v5182_v15 }
 0x3c1   :  { %1887 = vmatprep.subr.mxu1 %v4354_v0 }
 0x3c2   :  { %1888 = vmatpush1.msra.mxu1 %v5189_v16 }
 0x3c3   :  { %1889 = vmatprep.subr.mxu1 %v4354_v0 }
 0x3c4   :  { %1890 = vmatpush1.msra.mxu1 %v5196_v17 }
 0x3c5   :  { %1919 = vmatprep.subr.mxu1 %v4354_v0 }
 0x3c6   :  { %1920 = vmatpush2.msra.mxu1 %v5203_v18 }
 0x3c7   :  { %1921 = vmatprep.subr.mxu1 %v4354_v0 }
 0x3c8   :  { %1922 = vmatpush2.msra.mxu1 %v5213_v40 }
 0x3c9   :  { %1924 = vmatmul.mubr.f32.vlgmr.msra.gmra.mxu1 %v3864_v63  ;;  %2021 = vmatprep.subr.mxu1 %v4354_v0  ;;  %v3898_v63 = vld [vmem:[%s6824_s0 + $0x68] sm:$0xff] }
 0x3ca   :  { %2022 = vmatpush1.msra.mxu1 %v5095_v3  ;;  %3878 = vmatprep.mubr.msk.f32.mxu1 %vm52_vm0, %v3877_v29 }
 0x3cb   :  { %2023 = vmatprep.subr.mxu1 %v4354_v0 }
 0x3cc   :  { %2024 = vmatpush1.msra.mxu1 %v5020_v38  ;;  %v5645_v38 = vpop.f32.mrf.mxu0 }
 0x3cd   :  { %2025 = vmatprep.subr.mxu1 %v4354_v0 }
 0x3ce   :  { %2026 = vmatpush1.msra.mxu1 %v5105_v4  ;;  %v1850_v23 = vpop.f32.mrf.mxu0 }
 0x3cf   :  { %2027 = vmatprep.subr.mxu1 %v4354_v0 }
 0x3d0   :  { %2028 = vmatpush1.msra.mxu1 %v5112_v5 }
 0x3d1   :  { %2029 = vmatprep.subr.mxu1 %v4354_v0 }
 0x3d2   :  { %2030 = vmatpush1.msra.mxu1 %v5119_v6 }
 0x3d3   :  { %2031 = vmatprep.subr.mxu1 %v4354_v0 }
 0x3d4   :  { %2032 = vmatpush1.msra.mxu1 %v5126_v7 }
 0x3d5   :  { %2033 = vmatprep.subr.mxu1 %v4354_v0 }
 0x3d6   :  { %2034 = vmatpush1.msra.mxu1 %v5133_v8 }
 0x3d7   :  { %2035 = vmatprep.subr.mxu1 %v4354_v0 }
 0x3d8   :  { %2036 = vmatpush1.msra.mxu1 %v5140_v9 }
 0x3d9   :  { %2037 = vmatprep.subr.mxu1 %v4354_v0 }
 0x3da   :  { %2038 = vmatpush1.msra.mxu1 %v5147_v10 }
 0x3db   :  { %2039 = vmatprep.subr.mxu1 %v4354_v0 }
 0x3dc   :  { %2040 = vmatpush1.msra.mxu1 %v5154_v11 }
 0x3dd   :  { %2041 = vmatprep.subr.mxu1 %v4354_v0 }
 0x3de   :  { %2042 = vmatpush1.msra.mxu1 %v5161_v12 }
 0x3df   :  { %2043 = vmatprep.subr.mxu1 %v4354_v0 }
 0x3e0   :  { %2044 = vmatpush1.msra.mxu1 %v5168_v13 }
 0x3e1   :  { %2045 = vmatprep.subr.mxu1 %v4354_v0 }
 0x3e2   :  { %2046 = vmatpush1.msra.mxu1 %v5175_v14 }
 0x3e3   :  { %2047 = vmatprep.subr.mxu1 %v4354_v0 }
 0x3e4   :  { %2048 = vmatpush1.msra.mxu1 %v5182_v15 }
 0x3e5   :  { %2049 = vmatprep.subr.mxu1 %v4354_v0 }
 0x3e6   :  { %2050 = vmatpush1.msra.mxu1 %v5189_v16 }
 0x3e7   :  { %2051 = vmatprep.subr.mxu1 %v4354_v0 }
 0x3e8   :  { %2052 = vmatpush1.msra.mxu1 %v5196_v17 }
 0x3e9   :  { %2081 = vmatprep.subr.mxu1 %v4354_v0 }
 0x3ea   :  { %2082 = vmatpush2.msra.mxu1 %v5203_v18 }
 0x3eb   :  { %2083 = vmatprep.subr.mxu1 %v4354_v0 }
 0x3ec   :  { %2084 = vmatpush2.msra.mxu1 %v5213_v40 }
 0x3ed   :  { %2174 = vmatprep.subr.mxu1 %v4354_v0  ;;  %2086 = vmatmul.mubr.f32.vlgmr.msra.gmra.mxu1 %v3876_v30 }
 0x3ee   :  { %2175 = vmatpush1.msra.mxu1 %v5095_v3  ;;  %v3883_v3 = vld [vmem:[%s6824_s0 + $0x178] sm:$0xff] }
 0x3ef   :  { %2176 = vmatprep.subr.mxu1 %v4354_v0  ;;  %3884 = vmatprep.mubr.msk.f32.mxu1 %vm52_vm0, %v3883_v3 }
 0x3f0   :  { %2177 = vmatpush1.msra.mxu1 %v5697_v31 }
 0x3f1   :  { %2178 = vmatprep.subr.mxu1 %v4354_v0 }
 0x3f2   :  { %2179 = vmatpush1.msra.mxu1 %v5105_v4  ;;  %v3882_v4 = vld [vmem:[%s6824_s0 + $0x170] sm:$0xff] }
 0x3f3   :  { %2180 = vmatprep.subr.mxu1 %v4354_v0 }
 0x3f4   :  { %2181 = vmatpush1.msra.mxu1 %v5112_v5 }
 0x3f5   :  { %2182 = vmatprep.subr.mxu1 %v4354_v0 }
 0x3f6   :  { %2183 = vmatpush1.msra.mxu1 %v5119_v6 }
 0x3f7   :  { %2184 = vmatprep.subr.mxu1 %v4354_v0 }
 0x3f8   :  { %2185 = vmatpush1.msra.mxu1 %v5126_v7 }
 0x3f9   :  { %2186 = vmatprep.subr.mxu1 %v4354_v0 }
 0x3fa   :  { %2187 = vmatpush1.msra.mxu1 %v5133_v8 }
 0x3fb   :  { %2188 = vmatprep.subr.mxu1 %v4354_v0 }
 0x3fc   :  { %2189 = vmatpush1.msra.mxu1 %v5140_v9 }
 0x3fd   :  { %2190 = vmatprep.subr.mxu1 %v4354_v0 }
 0x3fe   :  { %2191 = vmatpush1.msra.mxu1 %v5147_v10 }
 0x3ff   :  { %2192 = vmatprep.subr.mxu1 %v4354_v0 }
 0x400   :  { %2193 = vmatpush1.msra.mxu1 %v5154_v11 }
 0x401   :  { %2194 = vmatprep.subr.mxu1 %v4354_v0 }
 0x402   :  { %2195 = vmatpush1.msra.mxu1 %v5161_v12 }
 0x403   :  { %2196 = vmatprep.subr.mxu1 %v4354_v0 }
 0x404   :  { %2197 = vmatpush1.msra.mxu1 %v5168_v13 }
 0x405   :  { %2198 = vmatprep.subr.mxu1 %v4354_v0 }
 0x406   :  { %2199 = vmatpush1.msra.mxu1 %v5175_v14 }
 0x407   :  { %2200 = vmatprep.subr.mxu1 %v4354_v0 }
 0x408   :  { %2201 = vmatpush1.msra.mxu1 %v5182_v15  ;;  %v5750_v15 = vld [vmem:[%s6826_s2] ss:$0 sm:$0xff] }
 0x409   :  { %2202 = vmatprep.subr.mxu1 %v4354_v0 }
 0x40a   :  { %2203 = vmatpush1.msra.mxu1 %v5189_v16 }
 0x40b   :  { %2204 = vmatprep.subr.mxu1 %v4354_v0 }
 0x40c   :  { %2205 = vmatpush1.msra.mxu1 %v5196_v17 }
 0x40d   :  { %2234 = vmatprep.subr.mxu1 %v4354_v0 }
 0x40e   :  { %2235 = vmatpush2.msra.mxu1 %v5203_v18  ;;  %v3880_v18 = vld [vmem:[%s6824_s0 + $0xe8] sm:$0xff] }
 0x40f   :  { %2236 = vmatprep.subr.mxu1 %v4354_v0 }
 0x410   :  { %2237 = vmatpush2.msra.mxu1 %v5213_v40  ;;  %v5760_v40 = vld [vmem:[%s6823_s1 + $0x78] sm:$0xff] }
 0x411   :  { %2239 = vmatmul.mubr.f32.vlgmr.msra.gmra.mxu1 %v3882_v4  ;;  %4166 = vmatprep.subr.mxu1 %v4354_v0 }
 0x412   :  { %4182 = vmatprep.mubr.msk.f32.mxu1 %vm4355_vm1, %v4354_v0  ;;  %4167 = vmatpush3.msra.mxu1 %v3895_v55  ;;  %v3924_v55 = vld [vmem:[%s6824_s0 + $0x190] sm:$0xff] }
 0x413   :  { %4168 = vmatprep.subr.mxu1 %v4354_v0 }
 0x414   :  { %4169 = vmatpush3.msra.mxu1 %v3894_v56 }
 0x415   :  { %4170 = vmatprep.subr.mxu1 %v4354_v0 }
 0x416   :  { %4171 = vmatpush3.msra.mxu1 %v3893_v57 }
 0x417   :  { %4172 = vmatprep.subr.mxu1 %v4354_v0 }
 0x418   :  { %4173 = vmatpush3.msra.mxu1 %v3892_v61 }
 0x419   :  { %4174 = vmatprep.subr.mxu1 %v4354_v0 }
 0x41a   :  { %4175 = vmatpush3.msra.mxu1 %v3891_v45 }
 0x41b   :  { %4176 = vmatprep.subr.mxu1 %v4354_v0 }
 0x41c   :  { %4177 = vmatpush3.msra.mxu1 %v3890_v59 }
 0x41d   :  { %4178 = vmatprep.subr.mxu1 %v4354_v0 }
 0x41e   :  { %4179 = vmatpush3.msra.mxu1 %v3889_v60 }
 0x41f   :  { %4180 = vmatprep.subr.mxu1 %v4354_v0 }
 0x441   :  { %v1618_v5 = vpop.f32.mrf.mxu1 }
 0x442   :  { %v5743_v6 = vadd.f32 %v1618_v5, %v5521_v49  ;;  %v3886_v49 = vld [vmem:[%s6824_s0 + $0x208] sm:$0xff]  ;;  %v3901_v5 = vld [vmem:[%s6824_s0 + $0xf8] sm:$0xff] }
 0x443   :  { %v4146_v7 = vpop.f32.mrf.mxu1 }
 0x444   :  { %v3907_v7 = vld [vmem:[%s6824_s0 + $0x218] sm:$0xff] }
 0x465   :  { %v1771_v8 = vpop.f32.mrf.mxu1 }
 0x466   :  { %v1775_v10 = vmax.f32 %v5605_v62, %v1771_v8  ;;  %v3888_v62 = vld [vmem:[%s6825_s3 + $0x140] sm:$0xff] }
 0x467   :  { %v1773_v9 = vpop.f32.mrf.mxu1  ;;  %4181 = vmatpush3.msra.mxu1 %v3888_v62 }
 0x468   :  { %v1852_v11 = vmax.f32 %v1775_v10, %v5645_v38  ;;  %2489 = vmatprep.subr.mxu1 %v4354_v0  ;;  %v3904_v38 = vld [vmem:[%s6824_s0 + $0x188] sm:$0xff]  ;;  %v3906_v9 = vld [vmem:[%s6824_s0 + $0x210] sm:$0xff] }
 0x489   :  { %v1925_v12 = vpop.f32.mrf.mxu1 }
 0x48a   :  { %v1929_v13 = vmax.f32 %v1852_v11, %v1925_v12  ;;  %v3916_v12 = vld [vmem:[%s6825_s3 + $0x1b8] sm:$0xff] }
 0x48b   :  { %v1927_v14 = vpop.f32.mrf.mxu1 }
 0x48c   :  { %v1930_v16 = vadd.f32 %v5750_v15, %v1929_v13  ;;  %v3915_v13 = vld [vmem:[%s6825_s3 + $0x1b0] sm:$0xff]  ;;  %v3914_v14 = vld [vmem:[%s6825_s3 + $0x1a8] sm:$0xff] }
 0x48e   :  { %v1931_v17 = vmax.f32 %v1930_v16, 0.0 }
 0x490   :  { %4164 = vmatmul.mubr.msk.f32.vlgmr.msra.gmra.mxu0 %vm692_vm2, %v1931_v17  ;;  %v3913_v17 = vld [vmem:[%s6825_s3 + $0x1a0] sm:$0xff] }
 0x491   :  { %2098 = vmatpush1.msra.mxu0 %v5760_v40  ;;  %3881 = vmatprep.mubr.msk.f32.mxu0 %vm52_vm0, %v3880_v18  ;;  %v3912_v18 = vld [vmem:[%s6825_s3 + $0x198] sm:$0xff] }
 0x492   :  { %2099 = vmatprep.subr.mxu0 %v4354_v0 }
 0x493   :  { %2100 = vmatpush1.msra.mxu0 %v5697_v31 }
 0x494   :  { %2101 = vmatprep.subr.mxu0 %v4354_v0 }
 0x495   :  { %2102 = vmatpush1.msra.mxu0 %v5770_v32 }
 0x496   :  { %2103 = vmatprep.subr.mxu0 %v4354_v0 }
 0x497   :  { %2104 = vmatpush1.msra.mxu0 %v5777_v33 }
 0x498   :  { %2105 = vmatprep.subr.mxu0 %v4354_v0 }
 0x499   :  { %2106 = vmatpush1.msra.mxu0 %v5784_v34 }
 0x49a   :  { %2107 = vmatprep.subr.mxu0 %v4354_v0 }
 0x49b   :  { %2108 = vmatpush1.msra.mxu0 %v5791_v35 }
 0x49c   :  { %2109 = vmatprep.subr.mxu0 %v4354_v0 }
 0x49d   :  { %2110 = vmatpush1.msra.mxu0 %v5798_v36 }
 0x49e   :  { %2111 = vmatprep.subr.mxu0 %v4354_v0 }
 0x49f   :  { %2112 = vmatpush1.msra.mxu0 %v5805_v37 }
 0x4a0   :  { %2113 = vmatprep.subr.mxu0 %v4354_v0 }
 0x4a1   :  { %2114 = vmatpush1.msra.mxu0 %v5812_v1 }
 0x4a2   :  { %2115 = vmatprep.subr.mxu0 %v4354_v0 }
 0x4a3   :  { %2116 = vmatpush1.msra.mxu0 %v5819_v2 }
 0x4a4   :  { %2117 = vmatprep.subr.mxu0 %v4354_v0 }
 0x4a5   :  { %2118 = vmatpush1.msra.mxu0 %v5826_v39 }
 0x4a6   :  { %2119 = vmatprep.subr.mxu0 %v4354_v0 }
 0x4a7   :  { %2120 = vmatpush1.msra.mxu0 %v5833_v41 }
 0x4a8   :  { %2121 = vmatprep.subr.mxu0 %v4354_v0 }
 0x4a9   :  { %2122 = vmatpush1.msra.mxu0 %v5840_v42 }
 0x4aa   :  { %2123 = vmatprep.subr.mxu0 %v4354_v0 }
 0x4ab   :  { %2124 = vmatpush1.msra.mxu0 %v5847_v43 }
 0x4ac   :  { %2125 = vmatprep.subr.mxu0 %v4354_v0 }
 0x4ad   :  { %2126 = vmatpush1.msra.mxu0 %v5854_v44  ;;  %v5917_v51 = vpop.f32.mrf.mxu1 }
 0x4ae   :  { %2127 = vmatprep.subr.mxu0 %v4354_v0 }
 0x4af   :  { %2128 = vmatpush1.msra.mxu0 %v5861_v46  ;;  %v2089_v53 = vpop.f32.mrf.mxu1 }
 0x4b0   :  { %2157 = vmatprep.subr.mxu0 %v4354_v0  ;;  %v3918_v53 = vld [vmem:[%s6824_s0 + $0x70] sm:$0xff] }
 0x4b1   :  { %2158 = vmatpush2.msra.mxu0 %v5868_v47 }
 0x4b2   :  { %2159 = vmatprep.subr.mxu0 %v4354_v0 }
 0x4b3   :  { %2160 = vmatpush2.msra.mxu0 %v5881_v50 }
 0x4b4   :  { %2162 = vmatmul.mubr.f32.vlgmr.msra.gmra.mxu0 %v3879_v48  ;;  %2251 = vmatprep.subr.mxu0 %v4354_v0  ;;  %v3911_v48 = vld [vmem:[%s6825_s3 + $0x190] sm:$0xff] }
 0x4b5   :  { %2252 = vmatpush1.msra.mxu0 %v5760_v40  ;;  %3887 = vmatprep.mubr.msk.f32.mxu0 %vm52_vm0, %v3886_v49  ;;  %v3910_v49 = vld [vmem:[%s6825_s3 + $0x188] sm:$0xff] }
 0x4b6   :  { %2253 = vmatprep.subr.mxu0 %v4354_v0 }
 0x4b7   :  { %2254 = vmatpush1.msra.mxu0 %v5697_v31 }
 0x4b8   :  { %2255 = vmatprep.subr.mxu0 %v4354_v0 }
 0x4b9   :  { %2256 = vmatpush1.msra.mxu0 %v5770_v32 }
 0x4ba   :  { %2257 = vmatprep.subr.mxu0 %v4354_v0 }
 0x4bb   :  { %2258 = vmatpush1.msra.mxu0 %v5777_v33 }
 0x4bc   :  { %2259 = vmatprep.subr.mxu0 %v4354_v0 }
 0x4bd   :  { %2260 = vmatpush1.msra.mxu0 %v5784_v34 }
 0x4be   :  { %2261 = vmatprep.subr.mxu0 %v4354_v0 }
 0x4bf   :  { %2262 = vmatpush1.msra.mxu0 %v5791_v35 }
 0x4c0   :  { %2263 = vmatprep.subr.mxu0 %v4354_v0 }
 0x4c1   :  { %2264 = vmatpush1.msra.mxu0 %v5798_v36 }
 0x4c2   :  { %2265 = vmatprep.subr.mxu0 %v4354_v0 }
 0x4c3   :  { %2266 = vmatpush1.msra.mxu0 %v5805_v37 }
 0x4c4   :  { %2267 = vmatprep.subr.mxu0 %v4354_v0 }
 0x4c5   :  { %2268 = vmatpush1.msra.mxu0 %v5812_v1 }
 0x4c6   :  { %2269 = vmatprep.subr.mxu0 %v4354_v0 }
 0x4c7   :  { %2270 = vmatpush1.msra.mxu0 %v5819_v2 }
 0x4c8   :  { %2271 = vmatprep.subr.mxu0 %v4354_v0 }
 0x4c9   :  { %2272 = vmatpush1.msra.mxu0 %v5826_v39 }
 0x4ca   :  { %2273 = vmatprep.subr.mxu0 %v4354_v0 }
 0x4cb   :  { %2274 = vmatpush1.msra.mxu0 %v5833_v41 }
 0x4cc   :  { %2275 = vmatprep.subr.mxu0 %v4354_v0 }
 0x4cd   :  { %2276 = vmatpush1.msra.mxu0 %v5840_v42 }
 0x4ce   :  { %2277 = vmatprep.subr.mxu0 %v4354_v0 }
 0x4cf   :  { %2278 = vmatpush1.msra.mxu0 %v5847_v43 }
 0x4d0   :  { %2279 = vmatprep.subr.mxu0 %v4354_v0 }
 0x4d1   :  { %2280 = vmatpush1.msra.mxu0 %v5854_v44  ;;  %v5957_v54 = vpop.f32.mrf.mxu1 }
 0x4d2   :  { %2281 = vmatprep.subr.mxu0 %v4354_v0 }
 0x4d3   :  { %2282 = vmatpush1.msra.mxu0 %v5861_v46  ;;  %v2242_v58 = vpop.f32.mrf.mxu1 }
 0x4d4   :  { %2311 = vmatprep.subr.mxu0 %v4354_v0 }
 0x4d5   :  { %2312 = vmatpush2.msra.mxu0 %v5868_v47 }
 0x4d6   :  { %2313 = vmatprep.subr.mxu0 %v4354_v0 }
 0x4d7   :  { %2314 = vmatpush2.msra.mxu0 %v5881_v50 }
 0x4d8   :  { %2316 = vmatmul.mubr.f32.vlgmr.msra.gmra.mxu0 %v3885_v52  ;;  %2413 = vmatprep.subr.mxu0 %v4354_v0  ;;  %v3919_v52 = vld [vmem:[%s6824_s0 + $0x78] sm:$0xff] }
 0x4d9   :  { %2414 = vmatpush1.msra.mxu0 %v5760_v40  ;;  %3899 = vmatprep.mubr.msk.f32.mxu0 %vm52_vm0, %v3898_v63 }
 0x4da   :  { %2415 = vmatprep.subr.mxu0 %v4354_v0 }
 0x4db   :  { %2416 = vmatpush1.msra.mxu0 %v5697_v31 }
 0x4dc   :  { %2417 = vmatprep.subr.mxu0 %v4354_v0 }
 0x4dd   :  { %2418 = vmatpush1.msra.mxu0 %v5770_v32 }
 0x4de   :  { %2419 = vmatprep.subr.mxu0 %v4354_v0 }
 0x4df   :  { %2420 = vmatpush1.msra.mxu0 %v5777_v33 }
 0x4e0   :  { %2421 = vmatprep.subr.mxu0 %v4354_v0 }
 0x4e1   :  { %2422 = vmatpush1.msra.mxu0 %v5784_v34 }
 0x4e2   :  { %2423 = vmatprep.subr.mxu0 %v4354_v0 }
 0x4e3   :  { %2424 = vmatpush1.msra.mxu0 %v5791_v35 }
 0x4e4   :  { %2425 = vmatprep.subr.mxu0 %v4354_v0 }
 0x4e5   :  { %2426 = vmatpush1.msra.mxu0 %v5798_v36 }
 0x4e6   :  { %2427 = vmatprep.subr.mxu0 %v4354_v0 }
 0x4e7   :  { %2428 = vmatpush1.msra.mxu0 %v5805_v37 }
 0x4e8   :  { %2429 = vmatprep.subr.mxu0 %v4354_v0 }
 0x4e9   :  { %2430 = vmatpush1.msra.mxu0 %v5812_v1 }
 0x4ea   :  { %2431 = vmatprep.subr.mxu0 %v4354_v0 }
 0x4eb   :  { %2432 = vmatpush1.msra.mxu0 %v5819_v2 }
 0x4ec   :  { %2433 = vmatprep.subr.mxu0 %v4354_v0 }
 0x4ed   :  { %2434 = vmatpush1.msra.mxu0 %v5826_v39 }
 0x4ee   :  { %2435 = vmatprep.subr.mxu0 %v4354_v0 }
 0x4ef   :  { %2436 = vmatpush1.msra.mxu0 %v5833_v41 }
 0x4f0   :  { %2437 = vmatprep.subr.mxu0 %v4354_v0 }
 0x4f1   :  { %2438 = vmatpush1.msra.mxu0 %v5840_v42 }
 0x4f2   :  { %2439 = vmatprep.subr.mxu0 %v4354_v0 }
 0x4f3   :  { %2440 = vmatpush1.msra.mxu0 %v5847_v43 }
 0x4f4   :  { %2441 = vmatprep.subr.mxu0 %v4354_v0 }
 0x4f5   :  { %2442 = vmatpush1.msra.mxu0 %v5854_v44 }
 0x4f6   :  { %2443 = vmatprep.subr.mxu0 %v4354_v0 }
 0x4f7   :  { %2444 = vmatpush1.msra.mxu0 %v5861_v46 }
 0x4f8   :  { %2473 = vmatprep.subr.mxu0 %v4354_v0 }
 0x4f9   :  { %2474 = vmatpush2.msra.mxu0 %v5868_v47 }
 0x4fa   :  { %2475 = vmatprep.subr.mxu0 %v4354_v0 }
 0x4fb   :  { %2476 = vmatpush2.msra.mxu0 %v5881_v50 }
 0x4fc   :  { %2566 = vmatprep.subr.mxu0 %v4354_v0  ;;  %2478 = vmatmul.mubr.f32.vlgmr.msra.gmra.mxu0 %v3897_v19 }
 0x4fd   :  { %2567 = vmatpush1.msra.mxu0 %v5760_v40  ;;  %3905 = vmatprep.mubr.msk.f32.mxu0 %vm52_vm0, %v3904_v38 }
 0x4fe   :  { %2568 = vmatprep.subr.mxu0 %v4354_v0 }
 0x4ff   :  { %2569 = vmatpush1.msra.mxu0 %v5697_v31 }
 0x500   :  { %2570 = vmatprep.subr.mxu0 %v4354_v0 }
 0x501   :  { %2571 = vmatpush1.msra.mxu0 %v5770_v32 }
 0x502   :  { %2572 = vmatprep.subr.mxu0 %v4354_v0 }
 0x503   :  { %2573 = vmatpush1.msra.mxu0 %v5777_v33 }
 0x504   :  { %2574 = vmatprep.subr.mxu0 %v4354_v0 }
 0x505   :  { %2575 = vmatpush1.msra.mxu0 %v5784_v34 }
 0x506   :  { %2576 = vmatprep.subr.mxu0 %v4354_v0 }
 0x507   :  { %2577 = vmatpush1.msra.mxu0 %v5791_v35 }
 0x508   :  { %2578 = vmatprep.subr.mxu0 %v4354_v0 }
 0x509   :  { %2579 = vmatpush1.msra.mxu0 %v5798_v36 }
 0x50a   :  { %2580 = vmatprep.subr.mxu0 %v4354_v0 }
 0x50b   :  { %2581 = vmatpush1.msra.mxu0 %v5805_v37 }
 0x50c   :  { %2582 = vmatprep.subr.mxu0 %v4354_v0 }
 0x50d   :  { %2583 = vmatpush1.msra.mxu0 %v5812_v1 }
 0x50e   :  { %2584 = vmatprep.subr.mxu0 %v4354_v0 }
 0x50f   :  { %2585 = vmatpush1.msra.mxu0 %v5819_v2 }
 0x510   :  { %2586 = vmatprep.subr.mxu0 %v4354_v0 }
 0x511   :  { %2587 = vmatpush1.msra.mxu0 %v5826_v39 }
 0x512   :  { %2588 = vmatprep.subr.mxu0 %v4354_v0 }
 0x513   :  { %2589 = vmatpush1.msra.mxu0 %v5833_v41 }
 0x514   :  { %2590 = vmatprep.subr.mxu0 %v4354_v0 }
 0x515   :  { %2591 = vmatpush1.msra.mxu0 %v5840_v42 }
 0x516   :  { %2592 = vmatprep.subr.mxu0 %v4354_v0 }
 0x517   :  { %2593 = vmatpush1.msra.mxu0 %v5847_v43 }
 0x518   :  { %2594 = vmatprep.subr.mxu0 %v4354_v0 }
 0x519   :  { %2595 = vmatpush1.msra.mxu0 %v5854_v44 }
 0x51a   :  { %2596 = vmatprep.subr.mxu0 %v4354_v0 }
 0x51b   :  { %2597 = vmatpush1.msra.mxu0 %v5861_v46 }
 0x51c   :  { %2626 = vmatprep.subr.mxu0 %v4354_v0 }
 0x51d   :  { %2627 = vmatpush2.msra.mxu0 %v5868_v47 }
 0x51e   :  { %2628 = vmatprep.subr.mxu0 %v4354_v0 }
 0x51f   :  { %2629 = vmatpush2.msra.mxu0 %v5881_v50 }
 0x520   :  { %2631 = vmatmul.mubr.f32.vlgmr.msra.gmra.mxu0 %v3903_v20  ;;  %4185 = vmatprep.subr.mxu0 %v4354_v0 }
 0x521   :  { %4201 = vmatprep.mubr.msk.f32.mxu0 %vm4355_vm1, %v4354_v0  ;;  %4186 = vmatpush3.msra.mxu0 %v3916_v12 }
 0x522   :  { %4187 = vmatprep.subr.mxu0 %v4354_v0 }
 0x523   :  { %4188 = vmatpush3.msra.mxu0 %v3915_v13 }
 0x524   :  { %4189 = vmatprep.subr.mxu0 %v4354_v0 }
 0x525   :  { %4190 = vmatpush3.msra.mxu0 %v3914_v14 }
 0x526   :  { %4191 = vmatprep.subr.mxu0 %v4354_v0 }
 0x527   :  { %4192 = vmatpush3.msra.mxu0 %v3913_v17 }
 0x528   :  { %4193 = vmatprep.subr.mxu0 %v4354_v0 }
 0x529   :  { %4194 = vmatpush3.msra.mxu0 %v3912_v18 }
 0x52a   :  { %4195 = vmatprep.subr.mxu0 %v4354_v0 }
 0x52b   :  { %4196 = vmatpush3.msra.mxu0 %v3911_v48 }
 0x52c   :  { %4197 = vmatprep.subr.mxu0 %v4354_v0 }
 0x52d   :  { %4198 = vmatpush3.msra.mxu0 %v3910_v49 }
 0x52e   :  { %4199 = vmatprep.subr.mxu0 %v4354_v0 }
 0x550   :  { %v2010_v21 = vpop.f32.mrf.mxu0 }
 0x551   :  { %v6050_v22 = vadd.f32 %v2010_v21, %v5743_v6  ;;  %v3900_v6 = vld [vmem:[%s6824_s0 + $0xf0] sm:$0xff]  ;;  %v3922_v21 = vld [vmem:[%s6824_s0 + $0x108] sm:$0xff] }
 0x552   :  { %v4165_v23 = vpop.f32.mrf.mxu0 }
 0x553   :  { %v3927_v23 = vld [vmem:[%s6824_s0 + $0x220] sm:$0xff] }
 0x574   :  { %v2163_v24 = vpop.f32.mrf.mxu0 }
 0x575   :  { %v2167_v26 = vmax.f32 %v5917_v51, %v2163_v24  ;;  %v3909_v51 = vld [vmem:[%s6825_s3 + $0x180] sm:$0xff] }
 0x576   :  { %v2165_v25 = vpop.f32.mrf.mxu0  ;;  %4200 = vmatpush3.msra.mxu0 %v3909_v51 }
 0x577   :  { %v2244_v27 = vmax.f32 %v2167_v26, %v5957_v54  ;;  %2881 = vmatprep.subr.mxu0 %v4354_v0  ;;  %v3925_v54 = vld [vmem:[%s6824_s0 + $0x198] sm:$0xff]  ;;  %v6366_v25 = vld [vmem:[%s6823_s1 + $0x70] sm:$0xff]  ;;  %v6483_v26 = vld [vmem:[%s6823_s1 + $0x48] sm:$0xff] }
 0x598   :  { %v2317_v28 = vpop.f32.mrf.mxu0 }
 0x599   :  { %v2321_v29 = vmax.f32 %v2244_v27, %v2317_v28  ;;  %v6490_v27 = vld [vmem:[%s6823_s1 + $0x40] sm:$0xff]  ;;  %v6497_v28 = vld [vmem:[%s6823_s1 + $0x38] sm:$0xff] }
 0x59a   :  { %v2319_v30 = vpop.f32.mrf.mxu0 }
 0x59b   :  { %v2322_v3 = vadd.f32 %v5750_v15, %v2321_v29  ;;  %v6504_v29 = vld [vmem:[%s6823_s1 + $0x30] sm:$0xff]  ;;  %v6511_v30 = vld [vmem:[%s6823_s1 + $0x28] sm:$0xff] }
 0x59d   :  { %v2323_v4 = vmax.f32 %v2322_v3, 0.0  ;;  %v6518_v3 = vld [vmem:[%s6823_s1 + $0x20] sm:$0xff] }
 0x59f   :  { %4183 = vmatmul.mubr.msk.f32.vlgmr.msra.gmra.mxu1 %vm692_vm2, %v2323_v4  ;;  %v6525_v4 = vld [vmem:[%s6823_s1 + $0x18] sm:$0xff] }
 0x5a0   :  { %2490 = vmatpush1.msra.mxu1 %v5760_v40  ;;  %3902 = vmatprep.mubr.msk.f32.mxu1 %vm52_vm0, %v3901_v5  ;;  %v6532_v5 = vld [vmem:[%s6823_s1 + $0x10] sm:$0xff] }
 0x5a1   :  { %2491 = vmatprep.subr.mxu1 %v4354_v0 }
 0x5a2   :  { %2492 = vmatpush1.msra.mxu1 %v5697_v31 }
 0x5a3   :  { %2493 = vmatprep.subr.mxu1 %v4354_v0 }
 0x5a4   :  { %2494 = vmatpush1.msra.mxu1 %v5770_v32 }
 0x5a5   :  { %2495 = vmatprep.subr.mxu1 %v4354_v0 }
 0x5a6   :  { %2496 = vmatpush1.msra.mxu1 %v5777_v33 }
 0x5a7   :  { %2497 = vmatprep.subr.mxu1 %v4354_v0 }
 0x5a8   :  { %2498 = vmatpush1.msra.mxu1 %v5784_v34 }
 0x5a9   :  { %2499 = vmatprep.subr.mxu1 %v4354_v0 }
 0x5aa   :  { %2500 = vmatpush1.msra.mxu1 %v5791_v35 }
 0x5ab   :  { %2501 = vmatprep.subr.mxu1 %v4354_v0 }
 0x5ac   :  { %2502 = vmatpush1.msra.mxu1 %v5798_v36 }
 0x5ad   :  { %2503 = vmatprep.subr.mxu1 %v4354_v0 }
 0x5ae   :  { %2504 = vmatpush1.msra.mxu1 %v5805_v37 }
 0x5af   :  { %2505 = vmatprep.subr.mxu1 %v4354_v0 }
 0x5b0   :  { %2506 = vmatpush1.msra.mxu1 %v5812_v1 }
 0x5b1   :  { %2507 = vmatprep.subr.mxu1 %v4354_v0 }
 0x5b2   :  { %2508 = vmatpush1.msra.mxu1 %v5819_v2 }
 0x5b3   :  { %2509 = vmatprep.subr.mxu1 %v4354_v0 }
 0x5b4   :  { %2510 = vmatpush1.msra.mxu1 %v5826_v39 }
 0x5b5   :  { %2511 = vmatprep.subr.mxu1 %v4354_v0 }
 0x5b6   :  { %2512 = vmatpush1.msra.mxu1 %v5833_v41 }
 0x5b7   :  { %2513 = vmatprep.subr.mxu1 %v4354_v0 }
 0x5b8   :  { %2514 = vmatpush1.msra.mxu1 %v5840_v42 }
 0x5b9   :  { %2515 = vmatprep.subr.mxu1 %v4354_v0 }
 0x5ba   :  { %2516 = vmatpush1.msra.mxu1 %v5847_v43 }
 0x5bb   :  { %2517 = vmatprep.subr.mxu1 %v4354_v0 }
 0x5bc   :  { %2518 = vmatpush1.msra.mxu1 %v5854_v44  ;;  %v6134_v8 = vpop.f32.mrf.mxu0 }
 0x5bd   :  { %2519 = vmatprep.subr.mxu1 %v4354_v0 }
 0x5be   :  { %2520 = vmatpush1.msra.mxu1 %v5861_v46  ;;  %v2481_v10 = vpop.f32.mrf.mxu0 }
 0x5bf   :  { %2549 = vmatprep.subr.mxu1 %v4354_v0  ;;  %v3945_v10 = vld [vmem:[%s6824_s0 + $0x1a0] sm:$0xff] }
 0x5c0   :  { %2550 = vmatpush2.msra.mxu1 %v5868_v47 }
 0x5c1   :  { %2551 = vmatprep.subr.mxu1 %v4354_v0 }
 0x5c2   :  { %2552 = vmatpush2.msra.mxu1 %v5881_v50 }
 0x5c3   :  { %2554 = vmatmul.mubr.f32.vlgmr.msra.gmra.mxu1 %v3900_v6  ;;  %2643 = vmatprep.subr.mxu1 %v4354_v0  ;;  %v6539_v6 = vld [vmem:[%s6823_s1 + $0x8] sm:$0xff] }
 0x5c4   :  { %2644 = vmatpush1.msra.mxu1 %v5760_v40  ;;  %3908 = vmatprep.mubr.msk.f32.mxu1 %vm52_vm0, %v3907_v7  ;;  %v6546_v7 = vld [vmem:[%s6823_s1] sm:$0xff] }
 0x5c5   :  { %2645 = vmatprep.subr.mxu1 %v4354_v0 }
 0x5c6   :  { %2646 = vmatpush1.msra.mxu1 %v5697_v31 }
 0x5c7   :  { %2647 = vmatprep.subr.mxu1 %v4354_v0 }
 0x5c8   :  { %2648 = vmatpush1.msra.mxu1 %v5770_v32 }
 0x5c9   :  { %2649 = vmatprep.subr.mxu1 %v4354_v0 }
 0x5ca   :  { %2650 = vmatpush1.msra.mxu1 %v5777_v33 }
 0x5cb   :  { %2651 = vmatprep.subr.mxu1 %v4354_v0 }
 0x5cc   :  { %2652 = vmatpush1.msra.mxu1 %v5784_v34 }
 0x5cd   :  { %2653 = vmatprep.subr.mxu1 %v4354_v0 }
 0x5ce   :  { %2654 = vmatpush1.msra.mxu1 %v5791_v35 }
 0x5cf   :  { %2655 = vmatprep.subr.mxu1 %v4354_v0 }
 0x5d0   :  { %2656 = vmatpush1.msra.mxu1 %v5798_v36 }
 0x5d1   :  { %2657 = vmatprep.subr.mxu1 %v4354_v0 }
 0x5d2   :  { %2658 = vmatpush1.msra.mxu1 %v5805_v37 }
 0x5d3   :  { %2659 = vmatprep.subr.mxu1 %v4354_v0 }
 0x5d4   :  { %2660 = vmatpush1.msra.mxu1 %v5812_v1 }
 0x5d5   :  { %2661 = vmatprep.subr.mxu1 %v4354_v0 }
 0x5d6   :  { %2662 = vmatpush1.msra.mxu1 %v5819_v2 }
 0x5d7   :  { %2663 = vmatprep.subr.mxu1 %v4354_v0 }
 0x5d8   :  { %2664 = vmatpush1.msra.mxu1 %v5826_v39 }
 0x5d9   :  { %2665 = vmatprep.subr.mxu1 %v4354_v0 }
 0x5da   :  { %2666 = vmatpush1.msra.mxu1 %v5833_v41 }
 0x5db   :  { %2667 = vmatprep.subr.mxu1 %v4354_v0 }
 0x5dc   :  { %2668 = vmatpush1.msra.mxu1 %v5840_v42 }
 0x5dd   :  { %2669 = vmatprep.subr.mxu1 %v4354_v0 }
 0x5de   :  { %2670 = vmatpush1.msra.mxu1 %v5847_v43 }
 0x5df   :  { %2671 = vmatprep.subr.mxu1 %v4354_v0 }
 0x5e0   :  { %2672 = vmatpush1.msra.mxu1 %v5854_v44  ;;  %v6174_v11 = vpop.f32.mrf.mxu0 }
 0x5e1   :  { %2673 = vmatprep.subr.mxu1 %v4354_v0 }
 0x5e2   :  { %2674 = vmatpush1.msra.mxu1 %v5861_v46  ;;  %v2634_v16 = vpop.f32.mrf.mxu0 }
 0x5e3   :  { %2703 = vmatprep.subr.mxu1 %v4354_v0 }
 0x5e4   :  { %2704 = vmatpush2.msra.mxu1 %v5868_v47 }
 0x5e5   :  { %2705 = vmatprep.subr.mxu1 %v4354_v0 }
 0x5e6   :  { %2706 = vmatpush2.msra.mxu1 %v5881_v50 }
 0x5e7   :  { %2708 = vmatmul.mubr.f32.vlgmr.msra.gmra.mxu1 %v3906_v9  ;;  %2805 = vmatprep.subr.mxu1 %v4354_v0  ;;  %v3946_v9 = vld [vmem:[%s6824_s0 + $0x1a8] sm:$0xff] }
 0x5e8   :  { %2806 = vmatpush1.msra.mxu1 %v5760_v40  ;;  %3920 = vmatprep.mubr.msk.f32.mxu1 %vm52_vm0, %v3919_v52 }
 0x5e9   :  { %2807 = vmatprep.subr.mxu1 %v4354_v0 }
 0x5ea   :  { %2808 = vmatpush1.msra.mxu1 %v5697_v31 }
 0x5eb   :  { %2809 = vmatprep.subr.mxu1 %v4354_v0 }
 0x5ec   :  { %2810 = vmatpush1.msra.mxu1 %v5770_v32 }
 0x5ed   :  { %2811 = vmatprep.subr.mxu1 %v4354_v0 }
 0x5ee   :  { %2812 = vmatpush1.msra.mxu1 %v5777_v33 }
 0x5ef   :  { %2813 = vmatprep.subr.mxu1 %v4354_v0 }
 0x5f0   :  { %2814 = vmatpush1.msra.mxu1 %v5784_v34 }
 0x5f1   :  { %2815 = vmatprep.subr.mxu1 %v4354_v0 }
 0x5f2   :  { %2816 = vmatpush1.msra.mxu1 %v5791_v35 }
 0x5f3   :  { %2817 = vmatprep.subr.mxu1 %v4354_v0 }
 0x5f4   :  { %2818 = vmatpush1.msra.mxu1 %v5798_v36 }
 0x5f5   :  { %2819 = vmatprep.subr.mxu1 %v4354_v0 }
 0x5f6   :  { %2820 = vmatpush1.msra.mxu1 %v5805_v37 }
 0x5f7   :  { %2821 = vmatprep.subr.mxu1 %v4354_v0 }
 0x5f8   :  { %2822 = vmatpush1.msra.mxu1 %v5812_v1 }
 0x5f9   :  { %2823 = vmatprep.subr.mxu1 %v4354_v0 }
 0x5fa   :  { %2824 = vmatpush1.msra.mxu1 %v5819_v2 }
 0x5fb   :  { %2825 = vmatprep.subr.mxu1 %v4354_v0 }
 0x5fc   :  { %2826 = vmatpush1.msra.mxu1 %v5826_v39 }
 0x5fd   :  { %2827 = vmatprep.subr.mxu1 %v4354_v0 }
 0x5fe   :  { %2828 = vmatpush1.msra.mxu1 %v5833_v41 }
 0x5ff   :  { %2829 = vmatprep.subr.mxu1 %v4354_v0 }
 0x600   :  { %2830 = vmatpush1.msra.mxu1 %v5840_v42 }
 0x601   :  { %2831 = vmatprep.subr.mxu1 %v4354_v0 }
 0x602   :  { %2832 = vmatpush1.msra.mxu1 %v5847_v43 }
 0x603   :  { %2833 = vmatprep.subr.mxu1 %v4354_v0 }
 0x604   :  { %2834 = vmatpush1.msra.mxu1 %v5854_v44 }
 0x605   :  { %2835 = vmatprep.subr.mxu1 %v4354_v0 }
 0x606   :  { %2836 = vmatpush1.msra.mxu1 %v5861_v46 }
 0x607   :  { %2865 = vmatprep.subr.mxu1 %v4354_v0 }
 0x608   :  { %2866 = vmatpush2.msra.mxu1 %v5868_v47 }
 0x609   :  { %2867 = vmatprep.subr.mxu1 %v4354_v0 }
 0x60a   :  { %2868 = vmatpush2.msra.mxu1 %v5881_v50 }
 0x60b   :  { %2958 = vmatprep.subr.mxu1 %v4354_v0  ;;  %2870 = vmatmul.mubr.f32.vlgmr.msra.gmra.mxu1 %v3918_v53  ;;  %v6581_v53 = vld [vmem:[%s6826_s2] ss:$0 sm:$0xff] }
 0x60c   :  { %2959 = vmatpush1.msra.mxu1 %v5760_v40  ;;  %3926 = vmatprep.mubr.msk.f32.mxu1 %vm52_vm0, %v3925_v54 }
 0x60d   :  { %2960 = vmatprep.subr.mxu1 %v4354_v0 }
 0x60e   :  { %2961 = vmatpush1.msra.mxu1 %v5697_v31 }
 0x60f   :  { %2962 = vmatprep.subr.mxu1 %v4354_v0 }
 0x610   :  { %2963 = vmatpush1.msra.mxu1 %v5770_v32 }
 0x611   :  { %2964 = vmatprep.subr.mxu1 %v4354_v0 }
 0x612   :  { %2965 = vmatpush1.msra.mxu1 %v5777_v33 }
 0x613   :  { %2966 = vmatprep.subr.mxu1 %v4354_v0 }
 0x614   :  { %2967 = vmatpush1.msra.mxu1 %v5784_v34 }
 0x615   :  { %2968 = vmatprep.subr.mxu1 %v4354_v0 }
 0x616   :  { %2969 = vmatpush1.msra.mxu1 %v5791_v35 }
 0x617   :  { %2970 = vmatprep.subr.mxu1 %v4354_v0 }
 0x618   :  { %2971 = vmatpush1.msra.mxu1 %v5798_v36 }
 0x619   :  { %2972 = vmatprep.subr.mxu1 %v4354_v0 }
 0x61a   :  { %2973 = vmatpush1.msra.mxu1 %v5805_v37 }
 0x61b   :  { %2974 = vmatprep.subr.mxu1 %v4354_v0 }
 0x61c   :  { %2975 = vmatpush1.msra.mxu1 %v5812_v1 }
 0x61d   :  { %2976 = vmatprep.subr.mxu1 %v4354_v0 }
 0x61e   :  { %2977 = vmatpush1.msra.mxu1 %v5819_v2 }
 0x61f   :  { %2978 = vmatprep.subr.mxu1 %v4354_v0 }
 0x620   :  { %2979 = vmatpush1.msra.mxu1 %v5826_v39 }
 0x621   :  { %2980 = vmatprep.subr.mxu1 %v4354_v0 }
 0x622   :  { %2981 = vmatpush1.msra.mxu1 %v5833_v41 }
 0x623   :  { %2982 = vmatprep.subr.mxu1 %v4354_v0 }
 0x624   :  { %2983 = vmatpush1.msra.mxu1 %v5840_v42 }
 0x625   :  { %2984 = vmatprep.subr.mxu1 %v4354_v0 }
 0x626   :  { %2985 = vmatpush1.msra.mxu1 %v5847_v43 }
 0x627   :  { %2986 = vmatprep.subr.mxu1 %v4354_v0 }
 0x628   :  { %2987 = vmatpush1.msra.mxu1 %v5854_v44 }
 0x629   :  { %2988 = vmatprep.subr.mxu1 %v4354_v0 }
 0x62a   :  { %2989 = vmatpush1.msra.mxu1 %v5861_v46 }
 0x62b   :  { %3018 = vmatprep.subr.mxu1 %v4354_v0 }
 0x62c   :  { %3019 = vmatpush2.msra.mxu1 %v5868_v47 }
 0x62d   :  { %3020 = vmatprep.subr.mxu1 %v4354_v0 }
 0x62e   :  { %3021 = vmatpush2.msra.mxu1 %v5881_v50 }
 0x62f   :  { %3023 = vmatmul.mubr.f32.vlgmr.msra.gmra.mxu1 %v3924_v55  ;;  %4204 = vmatprep.subr.mxu1 %v4354_v0 }
 0x630   :  { %4220 = vmatprep.mubr.msk.f32.mxu1 %vm4355_vm1, %v4354_v0 }
 0x65f   :  { %v2402_v56 = vpop.f32.mrf.mxu1 }
 0x660   :  { %v6267_v57 = vadd.f32 %v2402_v56, %v6050_v22  ;;  %v3928_v22 = vld [vmem:[%s6824_s0 + $0x228] sm:$0xff]  ;;  %v3943_v56 = vld [vmem:[%s6824_s0 + $0x118] sm:$0xff] }
 0x661   :  { %v4184_v58 = vpop.f32.mrf.mxu1 }
 0x662   :  { %v3949_v58 = vld [vmem:[%s6824_s0 + $0x238] sm:$0xff] }
 0x683   :  { %v2555_v61 = vpop.f32.mrf.mxu1 }
 0x684   :  { %v2559_v59 = vmax.f32 %v6134_v8, %v2555_v61  ;;  %v6553_v8 = vld [vmem:[%s6823_s1 + $0x88] sm:$0xff] }
 0x685   :  { %v2557_v45 = vpop.f32.mrf.mxu1 }
 0x686   :  { %v2636_v60 = vmax.f32 %v2559_v59, %v6174_v11  ;;  %v6567_v11 = vld [vmem:[%s6823_s1 + $0x80] sm:$0xff]  ;;  %v3948_v45 = vld [vmem:[%s6824_s0 + $0x230] sm:$0xff] }
 0x6a7   :  { %v2709_v62 = vpop.f32.mrf.mxu1 }
 0x6a8   :  { %v2713_v63 = vmax.f32 %v2636_v60, %v2709_v62  ;;  %v3958_v62 = vld [vmem:[%s6825_s3 + $0x238] sm:$0xff] }
 0x6a9   :  { %v2711_v19 = vpop.f32.mrf.mxu1 }
 0x6aa   :  { %v2714_v38 = vadd.f32 %v5750_v15, %v2713_v63  ;;  %v3921_v15 = vld [vmem:[%s6824_s0 + $0x100] sm:$0xff]  ;;  %v3957_v63 = vld [vmem:[%s6825_s3 + $0x230] sm:$0xff]  ;;  %v3956_v19 = vld [vmem:[%s6825_s3 + $0x228] sm:$0xff] }
 0x6ac   :  { %v2715_v20 = vmax.f32 %v2714_v38, 0.0 }
 0x6ae   :  { %4202 = vmatmul.mubr.msk.f32.vlgmr.msra.gmra.mxu0 %vm692_vm2, %v2715_v20  ;;  %v3955_v20 = vld [vmem:[%s6825_s3 + $0x220] sm:$0xff] }
 0x6af   :  { %2882 = vmatpush1.msra.mxu0 %v5760_v40  ;;  %3923 = vmatprep.mubr.msk.f32.mxu0 %vm52_vm0, %v3922_v21  ;;  %v3954_v21 = vld [vmem:[%s6825_s3 + $0x218] sm:$0xff] }
 0x6b0   :  { %2883 = vmatprep.subr.mxu0 %v4354_v0 }
 0x6b1   :  { %2884 = vmatpush1.msra.mxu0 %v5697_v31 }
 0x6b2   :  { %2885 = vmatprep.subr.mxu0 %v4354_v0 }
 0x6b3   :  { %2886 = vmatpush1.msra.mxu0 %v5770_v32 }
 0x6b4   :  { %2887 = vmatprep.subr.mxu0 %v4354_v0 }
 0x6b5   :  { %2888 = vmatpush1.msra.mxu0 %v5777_v33 }
 0x6b6   :  { %2889 = vmatprep.subr.mxu0 %v4354_v0 }
 0x6b7   :  { %2890 = vmatpush1.msra.mxu0 %v5784_v34 }
 0x6b8   :  { %2891 = vmatprep.subr.mxu0 %v4354_v0 }
 0x6b9   :  { %2892 = vmatpush1.msra.mxu0 %v5791_v35 }
 0x6ba   :  { %2893 = vmatprep.subr.mxu0 %v4354_v0 }
 0x6bb   :  { %2894 = vmatpush1.msra.mxu0 %v5798_v36 }
 0x6bc   :  { %2895 = vmatprep.subr.mxu0 %v4354_v0 }
 0x6bd   :  { %2896 = vmatpush1.msra.mxu0 %v5805_v37 }
 0x6be   :  { %2897 = vmatprep.subr.mxu0 %v4354_v0 }
 0x6bf   :  { %2898 = vmatpush1.msra.mxu0 %v5812_v1 }
 0x6c0   :  { %2899 = vmatprep.subr.mxu0 %v4354_v0 }
 0x6c1   :  { %2900 = vmatpush1.msra.mxu0 %v5819_v2 }
 0x6c2   :  { %2901 = vmatprep.subr.mxu0 %v4354_v0 }
 0x6c3   :  { %2902 = vmatpush1.msra.mxu0 %v5826_v39 }
 0x6c4   :  { %2903 = vmatprep.subr.mxu0 %v4354_v0 }
 0x6c5   :  { %2904 = vmatpush1.msra.mxu0 %v5833_v41 }
 0x6c6   :  { %2905 = vmatprep.subr.mxu0 %v4354_v0 }
 0x6c7   :  { %2906 = vmatpush1.msra.mxu0 %v5840_v42 }
 0x6c8   :  { %2907 = vmatprep.subr.mxu0 %v4354_v0 }
 0x6c9   :  { %2908 = vmatpush1.msra.mxu0 %v5847_v43 }
 0x6ca   :  { %2909 = vmatprep.subr.mxu0 %v4354_v0 }
 0x6cb   :  { %2910 = vmatpush1.msra.mxu0 %v5854_v44 }
 0x6cc   :  { %2911 = vmatprep.subr.mxu0 %v4354_v0 }
 0x6cd   :  { %2912 = vmatpush1.msra.mxu0 %v5861_v46 }
 0x6ce   :  { %2941 = vmatprep.subr.mxu0 %v4354_v0 }
 0x6cf   :  { %2942 = vmatpush2.msra.mxu0 %v5868_v47 }
 0x6d0   :  { %2943 = vmatprep.subr.mxu0 %v4354_v0 }
 0x6d1   :  { %2944 = vmatpush2.msra.mxu0 %v5881_v50 }
 0x6d2   :  { %2946 = vmatmul.mubr.f32.vlgmr.msra.gmra.mxu0 %v3921_v15  ;;  %3035 = vmatprep.subr.mxu0 %v4354_v0  ;;  %v3953_v15 = vld [vmem:[%s6825_s3 + $0x210] sm:$0xff] }
 0x6d3   :  { %3036 = vmatpush1.msra.mxu0 %v5760_v40  ;;  %3929 = vmatprep.mubr.msk.f32.mxu0 %vm52_vm0, %v3928_v22  ;;  %v3952_v22 = vld [vmem:[%s6825_s3 + $0x208] sm:$0xff] }
 0x6d4   :  { %3037 = vmatprep.subr.mxu0 %v4354_v0 }
 0x6d5   :  { %3038 = vmatpush1.msra.mxu0 %v5697_v31  ;;  %v6351_v31 = vpop.f32.mrf.mxu1 }
 0x6d6   :  { %3039 = vmatprep.subr.mxu0 %v4354_v0 }
 0x6d7   :  { %3040 = vmatpush1.msra.mxu0 %v5770_v32  ;;  %v2873_v24 = vpop.f32.mrf.mxu1 }
 0x6d8   :  { %3041 = vmatprep.subr.mxu0 %v4354_v0  ;;  %v3606_v24 = vld [vmem:[%s6827_s5 + $0x70] sm:$0xff] }
 0x6d9   :  { %3042 = vmatpush1.msra.mxu0 %v5777_v33 }
 0x6da   :  { %3043 = vmatprep.subr.mxu0 %v4354_v0 }
 0x6db   :  { %3044 = vmatpush1.msra.mxu0 %v5784_v34 }
 0x6dc   :  { %3045 = vmatprep.subr.mxu0 %v4354_v0 }
 0x6dd   :  { %3046 = vmatpush1.msra.mxu0 %v5791_v35 }
 0x6de   :  { %3047 = vmatprep.subr.mxu0 %v4354_v0 }
 0x6df   :  { %3048 = vmatpush1.msra.mxu0 %v5798_v36 }
 0x6e0   :  { %3049 = vmatprep.subr.mxu0 %v4354_v0 }
 0x6e1   :  { %3050 = vmatpush1.msra.mxu0 %v5805_v37 }
 0x6e2   :  { %3051 = vmatprep.subr.mxu0 %v4354_v0 }
 0x6e3   :  { %3052 = vmatpush1.msra.mxu0 %v5812_v1 }
 0x6e4   :  { %3053 = vmatprep.subr.mxu0 %v4354_v0 }
 0x6e5   :  { %3054 = vmatpush1.msra.mxu0 %v5819_v2 }
 0x6e6   :  { %3055 = vmatprep.subr.mxu0 %v4354_v0 }
 0x6e7   :  { %3056 = vmatpush1.msra.mxu0 %v5826_v39 }
 0x6e8   :  { %3057 = vmatprep.subr.mxu0 %v4354_v0 }
 0x6e9   :  { %3058 = vmatpush1.msra.mxu0 %v5833_v41 }
 0x6ea   :  { %3059 = vmatprep.subr.mxu0 %v4354_v0 }
 0x6eb   :  { %3060 = vmatpush1.msra.mxu0 %v5840_v42 }
 0x6ec   :  { %3061 = vmatprep.subr.mxu0 %v4354_v0 }
 0x6ed   :  { %3062 = vmatpush1.msra.mxu0 %v5847_v43 }
 0x6ee   :  { %3063 = vmatprep.subr.mxu0 %v4354_v0 }
 0x6ef   :  { %3064 = vmatpush1.msra.mxu0 %v5854_v44 }
 0x6f0   :  { %3065 = vmatprep.subr.mxu0 %v4354_v0 }
 0x6f1   :  { %3066 = vmatpush1.msra.mxu0 %v5861_v46 }
 0x6f2   :  { %3095 = vmatprep.subr.mxu0 %v4354_v0 }
 0x6f3   :  { %3096 = vmatpush2.msra.mxu0 %v5868_v47 }
 0x6f4   :  { %3097 = vmatprep.subr.mxu0 %v4354_v0 }
 0x6f5   :  { %3098 = vmatpush2.msra.mxu0 %v5881_v50 }
 0x6f6   :  { %3100 = vmatmul.mubr.f32.vlgmr.msra.gmra.mxu0 %v3927_v23  ;;  %3197 = vmatprep.subr.mxu0 %v4354_v0  ;;  %v3607_v23 = vld [vmem:[%s6827_s5 + $0x78] sm:$0xff] }
 0x6f7   :  { %3198 = vmatpush1.msra.mxu0 %v5760_v40  ;;  %v6396_v40 = vpop.f32.mrf.mxu1 }
 0x6f8   :  { %3199 = vmatprep.subr.mxu0 %v4354_v0 }
 0x6f9   :  { %3200 = vmatpush1.msra.mxu0 %v6366_v25 }
 0x6fa   :  { %3201 = vmatprep.subr.mxu0 %v4354_v0 }
 0x6fb   :  { %3202 = vmatpush1.msra.mxu0 %v5770_v32  ;;  %v3937_v32 = vld [vmem:[%s6825_s3 + $0x1f8] sm:$0xff] }
 0x6fc   :  { %3203 = vmatprep.subr.mxu0 %v4354_v0  ;;  %4205 = vmatpush3.msra.mxu1 %v3937_v32  ;;  %v3603_v32 = vld [vmem:[%s6827_s5 + $0x58] sm:$0xff] }
 0x6fd   :  { %3204 = vmatpush1.msra.mxu0 %v5777_v33  ;;  %v3936_v33 = vld [vmem:[%s6825_s3 + $0x1f0] sm:$0xff]  ;;  %4206 = vmatprep.subr.mxu1 %v4354_v0 }
 0x6fe   :  { %3205 = vmatprep.subr.mxu0 %v4354_v0  ;;  %4207 = vmatpush3.msra.mxu1 %v3936_v33  ;;  %v3602_v33 = vld [vmem:[%s6827_s5 + $0x50] sm:$0xff] }
 0x6ff   :  { %3206 = vmatpush1.msra.mxu0 %v5784_v34  ;;  %v3935_v34 = vld [vmem:[%s6825_s3 + $0x1e8] sm:$0xff]  ;;  %4208 = vmatprep.subr.mxu1 %v4354_v0 }
 0x700   :  { %3207 = vmatprep.subr.mxu0 %v4354_v0  ;;  %4209 = vmatpush3.msra.mxu1 %v3935_v34  ;;  %v3601_v34 = vld [vmem:[%s6827_s5 + $0x48] sm:$0xff] }
 0x701   :  { %3208 = vmatpush1.msra.mxu0 %v5791_v35  ;;  %v3026_v35 = vpop.f32.mrf.mxu1  ;;  %4210 = vmatprep.subr.mxu1 %v4354_v0 }
 0x702   :  { %3209 = vmatprep.subr.mxu0 %v4354_v0  ;;  %v3600_v35 = vld [vmem:[%s6827_s5 + $0x40] sm:$0xff] }
 0x703   :  { %3210 = vmatpush1.msra.mxu0 %v5798_v36  ;;  %v3934_v36 = vld [vmem:[%s6825_s3 + $0x1e0] sm:$0xff] }
 0x704   :  { %3211 = vmatprep.subr.mxu0 %v4354_v0  ;;  %4211 = vmatpush3.msra.mxu1 %v3934_v36  ;;  %v3599_v36 = vld [vmem:[%s6827_s5 + $0x38] sm:$0xff] }
 0x705   :  { %3212 = vmatpush1.msra.mxu0 %v5805_v37  ;;  %v3933_v37 = vld [vmem:[%s6825_s3 + $0x1d8] sm:$0xff]  ;;  %4212 = vmatprep.subr.mxu1 %v4354_v0 }
 0x706   :  { %3213 = vmatprep.subr.mxu0 %v4354_v0  ;;  %4213 = vmatpush3.msra.mxu1 %v3933_v37  ;;  %v3598_v37 = vld [vmem:[%s6827_s5 + $0x30] sm:$0xff] }
 0x707   :  { %3214 = vmatpush1.msra.mxu0 %v5812_v1  ;;  %4214 = vmatprep.subr.mxu1 %v4354_v0  ;;  %v3932_v1 = vld [vmem:[%s6825_s3 + $0x1d0] sm:$0xff] }
 0x708   :  { %3215 = vmatprep.subr.mxu0 %v4354_v0  ;;  %4215 = vmatpush3.msra.mxu1 %v3932_v1  ;;  %v3597_v1 = vld [vmem:[%s6827_s5 + $0x28] sm:$0xff] }
 0x709   :  { %3216 = vmatpush1.msra.mxu0 %v5819_v2  ;;  %4216 = vmatprep.subr.mxu1 %v4354_v0  ;;  %v3931_v2 = vld [vmem:[%s6825_s3 + $0x1c8] sm:$0xff] }
 0x70a   :  { %3217 = vmatprep.subr.mxu0 %v4354_v0  ;;  %4217 = vmatpush3.msra.mxu1 %v3931_v2  ;;  %v3596_v2 = vld [vmem:[%s6827_s5 + $0x20] sm:$0xff] }
 0x70b   :  { %3218 = vmatpush1.msra.mxu0 %v5826_v39  ;;  %4218 = vmatprep.subr.mxu1 %v4354_v0  ;;  %v3930_v39 = vld [vmem:[%s6825_s3 + $0x1c0] sm:$0xff] }
 0x70c   :  { %3219 = vmatprep.subr.mxu0 %v4354_v0  ;;  %4219 = vmatpush3.msra.mxu1 %v3930_v39 }
 0x70d   :  { %3220 = vmatpush1.msra.mxu0 %v5833_v41  ;;  %3273 = vmatprep.subr.mxu1 %v4354_v0  ;;  %v3940_v41 = vld [vmem:[%s6824_s0 + $0x88] sm:$0xff] }
 0x70e   :  { %3221 = vmatprep.subr.mxu0 %v4354_v0  ;;  %3941 = vmatprep.mubr.msk.f32.mxu0 %vm52_vm0, %v3940_v41 }
 0x70f   :  { %3222 = vmatpush1.msra.mxu0 %v5840_v42  ;;  %v3939_v42 = vld [vmem:[%s6824_s0 + $0x80] sm:$0xff] }
 0x710   :  { %3223 = vmatprep.subr.mxu0 %v4354_v0 }
 0x711   :  { %3224 = vmatpush1.msra.mxu0 %v5847_v43  ;;  %v6446_v43 = vld [vmem:[%s6823_s1 + $0x78] sm:$0xff] }
 0x712   :  { %3225 = vmatprep.subr.mxu0 %v4354_v0 }
 0x713   :  { %3226 = vmatpush1.msra.mxu0 %v5854_v44  ;;  %v6455_v44 = vld [vmem:[%s6823_s1 + $0x68] sm:$0xff] }
 0x714   :  { %3227 = vmatprep.subr.mxu0 %v4354_v0 }
 0x715   :  { %3228 = vmatpush1.msra.mxu0 %v5861_v46  ;;  %v6462_v46 = vld [vmem:[%s6823_s1 + $0x60] sm:$0xff] }
 0x716   :  { %3257 = vmatprep.subr.mxu0 %v4354_v0 }
 0x717   :  { %3258 = vmatpush2.msra.mxu0 %v5868_v47  ;;  %v6469_v47 = vld [vmem:[%s6823_s1 + $0x58] sm:$0xff] }
 0x718   :  { %3259 = vmatprep.subr.mxu0 %v4354_v0 }
 0x719   :  { %3260 = vmatpush2.msra.mxu0 %v5881_v50  ;;  %v6476_v50 = vld [vmem:[%s6823_s1 + $0x50] sm:$0xff] }
 0x71a   :  { %3350 = vmatprep.subr.mxu0 %v4354_v0  ;;  %3262 = vmatmul.mubr.f32.vlgmr.msra.gmra.mxu0 %v3939_v42 }
 0x71b   :  { %3351 = vmatpush1.msra.mxu0 %v6446_v43  ;;  %3947 = vmatprep.mubr.msk.f32.mxu0 %vm52_vm0, %v3946_v9  ;;  %v3690_v9 = vld [vmem:[%s6828_s7 + $0x20] sm:$0xff] }
 0x71c   :  { %3352 = vmatprep.subr.mxu0 %v4354_v0 }
 0x71d   :  { %3353 = vmatpush1.msra.mxu0 %v6366_v25 }
 0x71e   :  { %3354 = vmatprep.subr.mxu0 %v4354_v0 }
 0x71f   :  { %3355 = vmatpush1.msra.mxu0 %v6455_v44 }
 0x720   :  { %3356 = vmatprep.subr.mxu0 %v4354_v0 }
 0x721   :  { %3357 = vmatpush1.msra.mxu0 %v6462_v46 }
 0x722   :  { %3358 = vmatprep.subr.mxu0 %v4354_v0 }
 0x723   :  { %3359 = vmatpush1.msra.mxu0 %v6469_v47 }
 0x724   :  { %3360 = vmatprep.subr.mxu0 %v4354_v0 }
 0x725   :  { %3361 = vmatpush1.msra.mxu0 %v6476_v50 }
 0x726   :  { %3362 = vmatprep.subr.mxu0 %v4354_v0 }
 0x727   :  { %3363 = vmatpush1.msra.mxu0 %v6483_v26 }
 0x728   :  { %3364 = vmatprep.subr.mxu0 %v4354_v0 }
 0x729   :  { %3365 = vmatpush1.msra.mxu0 %v6490_v27 }
 0x72a   :  { %3366 = vmatprep.subr.mxu0 %v4354_v0 }
 0x72b   :  { %3367 = vmatpush1.msra.mxu0 %v6497_v28 }
 0x72c   :  { %3368 = vmatprep.subr.mxu0 %v4354_v0 }
 0x72d   :  { %3369 = vmatpush1.msra.mxu0 %v6504_v29 }
 0x72e   :  { %3370 = vmatprep.subr.mxu0 %v4354_v0 }
 0x72f   :  { %3371 = vmatpush1.msra.mxu0 %v6511_v30 }
 0x730   :  { %3372 = vmatprep.subr.mxu0 %v4354_v0 }
 0x731   :  { %3373 = vmatpush1.msra.mxu0 %v6518_v3 }
 0x732   :  { %3374 = vmatprep.subr.mxu0 %v4354_v0 }
 0x733   :  { %3375 = vmatpush1.msra.mxu0 %v6525_v4 }
 0x734   :  { %3376 = vmatprep.subr.mxu0 %v4354_v0 }
 0x735   :  { %3377 = vmatpush1.msra.mxu0 %v6532_v5 }
 0x736   :  { %3378 = vmatprep.subr.mxu0 %v4354_v0 }
 0x737   :  { %3379 = vmatpush1.msra.mxu0 %v6539_v6 }
 0x738   :  { %3380 = vmatprep.subr.mxu0 %v4354_v0 }
 0x739   :  { %3381 = vmatpush1.msra.mxu0 %v6546_v7 }
 0x73a   :  { %3410 = vmatprep.subr.mxu0 %v4354_v0 }
 0x73b   :  { %3411 = vmatpush2.msra.mxu0 %v6553_v8 }
 0x73c   :  { %3412 = vmatprep.subr.mxu0 %v4354_v0 }
 0x73d   :  { %3413 = vmatpush2.msra.mxu0 %v6567_v11 }
 0x73e   :  { %3415 = vmatmul.mubr.f32.vlgmr.msra.gmra.mxu0 %v3945_v10  ;;  %4223 = vmatprep.subr.mxu0 %v4354_v0  ;;  %v3689_v10 = vld [vmem:[%s6828_s7 + $0x18] sm:$0xff] }
 0x73f   :  { %4239 = vmatprep.mubr.msk.f32.mxu0 %vm4355_vm1, %v4354_v0  ;;  %4224 = vmatpush3.msra.mxu0 %v3958_v62 }
 0x740   :  { %4225 = vmatprep.subr.mxu0 %v4354_v0 }
 0x741   :  { %4226 = vmatpush3.msra.mxu0 %v3957_v63 }
 0x742   :  { %4227 = vmatprep.subr.mxu0 %v4354_v0 }
 0x743   :  { %4228 = vmatpush3.msra.mxu0 %v3956_v19 }
 0x744   :  { %4229 = vmatprep.subr.mxu0 %v4354_v0 }
 0x745   :  { %4230 = vmatpush3.msra.mxu0 %v3955_v20 }
 0x746   :  { %4231 = vmatprep.subr.mxu0 %v4354_v0 }
 0x747   :  { %4232 = vmatpush3.msra.mxu0 %v3954_v21 }
 0x748   :  { %4233 = vmatprep.subr.mxu0 %v4354_v0 }
 0x749   :  { %4234 = vmatpush3.msra.mxu0 %v3953_v15 }
 0x74a   :  { %4235 = vmatprep.subr.mxu0 %v4354_v0 }
 0x74b   :  { %4236 = vmatpush3.msra.mxu0 %v3952_v22 }
 0x74c   :  { %4237 = vmatprep.subr.mxu0 %v4354_v0 }
 0x76e   :  { %v2794_v12 = vpop.f32.mrf.mxu0 }
 0x76f   :  { %v6574_v13 = vadd.f32 %v2794_v12, %v6267_v57  ;;  %v3942_v57 = vld [vmem:[%s6824_s0 + $0x110] sm:$0xff]  ;;  %v3960_v12 = vld [vmem:[%s6829_s4] ss:$0 sm:$0xff] }
 0x770   :  { %v4203_v14 = vpop.f32.mrf.mxu0 }
 0x792   :  { %v2947_v16 = vpop.f32.mrf.mxu0 }
 0x793   :  { %v2951_v18 = vmax.f32 %v6351_v31, %v2947_v16  ;;  %v3951_v31 = vld [vmem:[%s6825_s3 + $0x200] sm:$0xff] }
 0x794   :  { %v2949_v17 = vpop.f32.mrf.mxu0  ;;  %4238 = vmatpush3.msra.mxu0 %v3951_v31 }
 0x795   :  { %v3028_v48 = vmax.f32 %v2951_v18, %v6396_v40  ;;  %4277 = vmatprep.subr.mxu0 %v4354_v0  ;;  %v3604_v40 = vld [vmem:[%s6827_s5 + $0x60] sm:$0xff]  ;;  %v3688_v18 = vld [vmem:[%s6828_s7 + $0x10] sm:$0xff] }
 0x7b6   :  { %v3101_v49 = vpop.f32.mrf.mxu0 }
 0x7b7   :  { %v3105_v51 = vmax.f32 %v3028_v48, %v3101_v49  ;;  %v3687_v48 = vld [vmem:[%s6828_s7 + $0x8] sm:$0xff]  ;;  %v3686_v49 = vld [vmem:[%s6828_s7] sm:$0xff] }
 0x7b8   :  { %v3103_v52 = vpop.f32.mrf.mxu0 }
 0x7b9   :  { %v3106_v54 = vadd.f32 %v6581_v53, %v3105_v51  ;;  %v3961_v51 = vld [vmem:[%s6830_s6] ss:$0 sm:$0xff] }
 0x7bb   :  { %v3107_v55 = vmax.f32 %v3106_v54, 0.0 }
 0x7bd   :  { %4221 = vmatmul.mubr.msk.f32.vlgmr.msra.gmra.mxu1 %vm692_vm2, %v3107_v55 }
 0x7be   :  { %3274 = vmatpush1.msra.mxu1 %v6446_v43  ;;  %3944 = vmatprep.mubr.msk.f32.mxu1 %vm52_vm0, %v3943_v56  ;;  %v3962_v56 = vld [vmem:[%s6831_s8] ss:$0 sm:$0xff] }
 0x7bf   :  { %3275 = vmatprep.subr.mxu1 %v4354_v0 }
 0x7c0   :  { %3276 = vmatpush1.msra.mxu1 %v6366_v25 }
 0x7c1   :  { %3277 = vmatprep.subr.mxu1 %v4354_v0 }
 0x7c2   :  { %3278 = vmatpush1.msra.mxu1 %v6455_v44 }
 0x7c3   :  { %3279 = vmatprep.subr.mxu1 %v4354_v0 }
 0x7c4   :  { %3280 = vmatpush1.msra.mxu1 %v6462_v46 }
 0x7c5   :  { %3281 = vmatprep.subr.mxu1 %v4354_v0 }
 0x7c6   :  { %3282 = vmatpush1.msra.mxu1 %v6469_v47 }
 0x7c7   :  { %3283 = vmatprep.subr.mxu1 %v4354_v0 }
 0x7c8   :  { %3284 = vmatpush1.msra.mxu1 %v6476_v50 }
 0x7c9   :  { %3285 = vmatprep.subr.mxu1 %v4354_v0 }
 0x7ca   :  { %3286 = vmatpush1.msra.mxu1 %v6483_v26 }
 0x7cb   :  { %3287 = vmatprep.subr.mxu1 %v4354_v0 }
 0x7cc   :  { %3288 = vmatpush1.msra.mxu1 %v6490_v27 }
 0x7cd   :  { %3289 = vmatprep.subr.mxu1 %v4354_v0 }
 0x7ce   :  { %3290 = vmatpush1.msra.mxu1 %v6497_v28 }
 0x7cf   :  { %3291 = vmatprep.subr.mxu1 %v4354_v0 }
 0x7d0   :  { %3292 = vmatpush1.msra.mxu1 %v6504_v29 }
 0x7d1   :  { %3293 = vmatprep.subr.mxu1 %v4354_v0 }
 0x7d2   :  { %3294 = vmatpush1.msra.mxu1 %v6511_v30 }
 0x7d3   :  { %3295 = vmatprep.subr.mxu1 %v4354_v0 }
 0x7d4   :  { %3296 = vmatpush1.msra.mxu1 %v6518_v3 }
 0x7d5   :  { %3297 = vmatprep.subr.mxu1 %v4354_v0 }
 0x7d6   :  { %3298 = vmatpush1.msra.mxu1 %v6525_v4 }
 0x7d7   :  { %3299 = vmatprep.subr.mxu1 %v4354_v0 }
 0x7d8   :  { %3300 = vmatpush1.msra.mxu1 %v6532_v5 }
 0x7d9   :  { %3301 = vmatprep.subr.mxu1 %v4354_v0 }
 0x7da   :  { %3302 = vmatpush1.msra.mxu1 %v6539_v6  ;;  %v6663_v61 = vpop.f32.mrf.mxu0 }
 0x7db   :  { %3303 = vmatprep.subr.mxu1 %v4354_v0 }
 0x7dc   :  { %3304 = vmatpush1.msra.mxu1 %v6546_v7  ;;  %v3265_v59 = vpop.f32.mrf.mxu0 }
 0x7dd   :  { %3333 = vmatprep.subr.mxu1 %v4354_v0 }
 0x7de   :  { %3334 = vmatpush2.msra.mxu1 %v6553_v8 }
 0x7df   :  { %3335 = vmatprep.subr.mxu1 %v4354_v0 }
 0x7e0   :  { %3336 = vmatpush2.msra.mxu1 %v6567_v11 }
 0x7e1   :  { %3338 = vmatmul.mubr.f32.vlgmr.msra.gmra.mxu1 %v3942_v57  ;;  %3427 = vmatprep.subr.mxu1 %v4354_v0 }
 0x7e2   :  { %3428 = vmatpush1.msra.mxu1 %v6446_v43  ;;  %3950 = vmatprep.mubr.msk.f32.mxu1 %vm52_vm0, %v3949_v58 }
 0x7e3   :  { %3429 = vmatprep.subr.mxu1 %v4354_v0 }
 0x7e4   :  { %3430 = vmatpush1.msra.mxu1 %v6366_v25  ;;  %v3605_v25 = vld [vmem:[%s6827_s5 + $0x68] sm:$0xff] }
 0x7e5   :  { %3431 = vmatprep.subr.mxu1 %v4354_v0 }
 0x7e6   :  { %3432 = vmatpush1.msra.mxu1 %v6455_v44 }
 0x7e7   :  { %3433 = vmatprep.subr.mxu1 %v4354_v0 }
 0x7e8   :  { %3434 = vmatpush1.msra.mxu1 %v6462_v46 }
 0x7e9   :  { %3435 = vmatprep.subr.mxu1 %v4354_v0 }
 0x7ea   :  { %3436 = vmatpush1.msra.mxu1 %v6469_v47 }
 0x7eb   :  { %3437 = vmatprep.subr.mxu1 %v4354_v0 }
 0x7ec   :  { %3438 = vmatpush1.msra.mxu1 %v6476_v50 }
 0x7ed   :  { %3439 = vmatprep.subr.mxu1 %v4354_v0 }
 0x7ee   :  { %3440 = vmatpush1.msra.mxu1 %v6483_v26 }
 0x7ef   :  { %3441 = vmatprep.subr.mxu1 %v4354_v0 }
 0x7f0   :  { %3442 = vmatpush1.msra.mxu1 %v6490_v27 }
 0x7f1   :  { %3443 = vmatprep.subr.mxu1 %v4354_v0 }
 0x7f2   :  { %3444 = vmatpush1.msra.mxu1 %v6497_v28 }
 0x7f3   :  { %3445 = vmatprep.subr.mxu1 %v4354_v0 }
 0x7f4   :  { %3446 = vmatpush1.msra.mxu1 %v6504_v29 }
 0x7f5   :  { %3447 = vmatprep.subr.mxu1 %v4354_v0 }
 0x7f6   :  { %3448 = vmatpush1.msra.mxu1 %v6511_v30  ;;  %v3595_v30 = vld [vmem:[%s6827_s5 + $0x18] sm:$0xff] }
 0x7f7   :  { %3449 = vmatprep.subr.mxu1 %v4354_v0 }
 0x7f8   :  { %3450 = vmatpush1.msra.mxu1 %v6518_v3  ;;  %v3594_v3 = vld [vmem:[%s6827_s5 + $0x10] sm:$0xff] }
 0x7f9   :  { %3451 = vmatprep.subr.mxu1 %v4354_v0 }
 0x7fa   :  { %3452 = vmatpush1.msra.mxu1 %v6525_v4  ;;  %v3593_v4 = vld [vmem:[%s6827_s5 + $0x8] sm:$0xff] }
 0x7fb   :  { %3453 = vmatprep.subr.mxu1 %v4354_v0 }
 0x7fc   :  { %3454 = vmatpush1.msra.mxu1 %v6532_v5  ;;  %v3592_v5 = vld [vmem:[%s6827_s5] sm:$0xff] }
 0x7fd   :  { %3455 = vmatprep.subr.mxu1 %v4354_v0 }
 0x7fe   :  { %3456 = vmatpush1.msra.mxu1 %v6539_v6  ;;  %v6675_v60 = vpop.f32.mrf.mxu0  ;;  %v3693_v6 = vld [vmem:[%s6828_s7 + $0x38] sm:$0xff] }
 0x7ff   :  { %3457 = vmatprep.subr.mxu1 %v4354_v0 }
 0x800   :  { %3458 = vmatpush1.msra.mxu1 %v6546_v7  ;;  %v3418_v38 = vpop.f32.mrf.mxu0  ;;  %v3692_v7 = vld [vmem:[%s6828_s7 + $0x30] sm:$0xff] }
 0x801   :  { %3487 = vmatprep.subr.mxu1 %v4354_v0 }
 0x802   :  { %3488 = vmatpush2.msra.mxu1 %v6553_v8  ;;  %v3691_v8 = vld [vmem:[%s6828_s7 + $0x28] sm:$0xff] }
 0x803   :  { %3489 = vmatprep.subr.mxu1 %v4354_v0 }
 0x804   :  { %3490 = vmatpush2.msra.mxu1 %v6567_v11 }
 0x805   :  { %3492 = vmatmul.mubr.f32.vlgmr.msra.gmra.mxu1 %v3948_v45  ;;  %4242 = vmatprep.subr.mxu1 %v4354_v0 }
 0x806   :  { %4274 = vmatprep.mubr.msk.f32.mxu1 %vm4355_vm1, %v4354_v0  ;;  %4243 = vmatpush3.msra.mxu1 %v3607_v23 }
 0x807   :  { %4244 = vmatprep.subr.mxu1 %v4354_v0 }
 0x808   :  { %4245 = vmatpush3.msra.mxu1 %v3606_v24 }
 0x809   :  { %4246 = vmatprep.subr.mxu1 %v4354_v0 }
 0x80a   :  { %4247 = vmatpush3.msra.mxu1 %v3605_v25 }
 0x80b   :  { %4248 = vmatprep.subr.mxu1 %v4354_v0 }
 0x80c   :  { %4249 = vmatpush3.msra.mxu1 %v3604_v40 }
 0x80d   :  { %4250 = vmatprep.subr.mxu1 %v4354_v0 }
 0x80e   :  { %4251 = vmatpush3.msra.mxu1 %v3603_v32 }
 0x80f   :  { %4252 = vmatprep.subr.mxu1 %v4354_v0 }
 0x810   :  { %4253 = vmatpush3.msra.mxu1 %v3602_v33 }
 0x811   :  { %4254 = vmatprep.subr.mxu1 %v4354_v0 }
 0x812   :  { %4255 = vmatpush3.msra.mxu1 %v3601_v34 }
 0x813   :  { %4256 = vmatprep.subr.mxu1 %v4354_v0 }
 0x814   :  { %4257 = vmatpush3.msra.mxu1 %v3600_v35 }
 0x815   :  { %4258 = vmatprep.subr.mxu1 %v4354_v0 }
 0x816   :  { %4259 = vmatpush3.msra.mxu1 %v3599_v36 }
 0x817   :  { %4260 = vmatprep.subr.mxu1 %v4354_v0 }
 0x818   :  { %4261 = vmatpush3.msra.mxu1 %v3598_v37 }
 0x819   :  { %4262 = vmatprep.subr.mxu1 %v4354_v0 }
 0x81a   :  { %4263 = vmatpush3.msra.mxu1 %v3597_v1 }
 0x81b   :  { %4264 = vmatprep.subr.mxu1 %v4354_v0 }
 0x81c   :  { %4265 = vmatpush3.msra.mxu1 %v3596_v2 }
 0x81d   :  { %4266 = vmatprep.subr.mxu1 %v4354_v0 }
 0x81e   :  { %4267 = vmatpush3.msra.mxu1 %v3595_v30 }
 0x81f   :  { %4268 = vmatprep.subr.mxu1 %v4354_v0 }
 0x820   :  { %4269 = vmatpush3.msra.mxu1 %v3594_v3 }
 0x821   :  { %4270 = vmatprep.subr.mxu1 %v4354_v0 }
 0x822   :  { %4271 = vmatpush3.msra.mxu1 %v3593_v4 }
 0x823   :  { %4272 = vmatprep.subr.mxu1 %v4354_v0 }
 0x824   :  { %4273 = vmatpush3.msra.mxu1 %v3592_v5 }
 0x87d   :  { %v3186_v39 = vpop.f32.mrf.mxu1 }
 0x87e   :  { %v3190_v41 = vadd.f32 %v3186_v39, %v6574_v13 }
 0x87f   :  { %v4222_v42 = vpop.f32.mrf.mxu1 }
 0x8a1   :  { %v3339_v43 = vpop.f32.mrf.mxu1 }
 0x8a2   :  { %v3343_v46 = vmax.f32 %v6663_v61, %v3339_v43 }
 0x8a3   :  { %v3341_v44 = vpop.f32.mrf.mxu1 }
 0x8a4   :  { %v3420_v47 = vmax.f32 %v3343_v46, %v6675_v60 }
 0x8c5   :  { %v3493_v50 = vpop.f32.mrf.mxu1 }
 0x8c6   :  { %v3497_v26 = vmax.f32 %v3420_v47, %v3493_v50 }
 0x8c7   :  { %v3495_v27 = vpop.f32.mrf.mxu1 }
 0x8c8   :  { %v3498_v28 = vadd.f32 %v6581_v53, %v3497_v26 }
 0x8ca   :  { %v3499_v29 = vmax.f32 %v3498_v28, 0.0 }
 0x8cc   :  { %4240 = vmatmul.mubr.msk.f32.vlgmr.msra.gmra.mxu0 %vm692_vm2, %v3499_v29 }
 0x8cd   :  { %4293 = vmatprep.mubr.msk.f32.mxu0 %vm4355_vm1, %v4354_v0  ;;  %4278 = vmatpush3.msra.mxu0 %v3693_v6 }
 0x8ce   :  { %4279 = vmatprep.subr.mxu0 %v4354_v0 }
 0x8cf   :  { %4280 = vmatpush3.msra.mxu0 %v3692_v7 }
 0x8d0   :  { %4281 = vmatprep.subr.mxu0 %v4354_v0 }
 0x8d1   :  { %4282 = vmatpush3.msra.mxu0 %v3691_v8 }
 0x8d2   :  { %4283 = vmatprep.subr.mxu0 %v4354_v0 }
 0x8d3   :  { %4284 = vmatpush3.msra.mxu0 %v3690_v9 }
 0x8d4   :  { %4285 = vmatprep.subr.mxu0 %v4354_v0 }
 0x8d5   :  { %4286 = vmatpush3.msra.mxu0 %v3689_v10 }
 0x8d6   :  { %4287 = vmatprep.subr.mxu0 %v4354_v0 }
 0x8d7   :  { %4288 = vmatpush3.msra.mxu0 %v3688_v18 }
 0x8d8   :  { %4289 = vmatprep.subr.mxu0 %v4354_v0 }
 0x8d9   :  { %4290 = vmatpush3.msra.mxu0 %v3687_v48 }
 0x8da   :  { %4291 = vmatprep.subr.mxu0 %v4354_v0 }
 0x8db   :  { %4292 = vmatpush3.msra.mxu0 %v3686_v49 }
 0x98c   :  { %v3578_v11 = vpop.f32.mrf.mxu0 }
 0x98d   :  { %v3582_v13 = vadd.f32 %v3578_v11, %v3190_v41 }
 0x98e   :  { %v4241_v14 = vpop.f32.mrf.mxu0 }
 0x98f   :  { %v3590_v16 = vadd.f32 %v3960_v12, %v3582_v13 }
 0x991   :  { %v3591_v17 = vmax.f32 %v3590_v16, 0.0 }
 0x993   :  { %4275 = vmatmul.mubr.f32.vlgmr.msra.gmra.mxu1 %v3591_v17 }
 0xa53   :  { %v3681_v52 = vpop.f32.mrf.mxu1 }
 0xa54   :  { %v3682_v53 = vadd.f32 %v3961_v51, %v3681_v52 }
 0xa55   :  { %v4276_v54 = vpop.f32.mrf.mxu1 }
 0xa56   :  { %v3685_v55 = vmax.f32 %v3682_v53, 0.0 }
 0xa58   :  { %4294 = vmatmul.mubr.msk.f32.vlgmr.msra.gmra.mxu0 %vm692_vm2, %v3685_v55 }
 0xb18   :  { %v3770_v0 = vpop.f32.mrf.mxu0 }
 0xb19   :  { %v3771_v57 = vadd.f32 %v3962_v56, %v3770_v0 }
 0xb1a   :  { %v4295_v58 = vpop.f32.mrf.mxu0 }
 0xb1b   :  { %3775 = vst.msk [vmem:[%s6832_s9] sm:$0xff] %vm3774_vm3, %v3771_v57 }

</bundles_post_ra>
